<compile_context>
chip_gen: v5e
topology: v5e:2x2
jax: 0.10.0
libtpu: 0.0.40
codegen_flags: <defaults>
</compile_context>

<pallas_src>
import math

import jax
import jax.numpy as jnp
import numpy as np
from jax.experimental import pallas as pl
from jax.experimental.pallas import tpu as pltpu

BLOCK_ROWS_CONV1 = 8
BLOCK_ROWS_FUSED = 16


# ---------------------------------------------------------------------------
# Stride-2 / pad-1 / k=3 ConvTranspose, sub-pixel (4-phase) decomposition:
#   y[2m  ,2n  ] = x[m,n]  @W[1,1]
#   y[2m  ,2n+1] = x[m,n]  @W[1,2] + x[m,n+1]@W[1,0]
#   y[2m+1,2n  ] = x[m,n]  @W[2,1] + x[m+1,n]@W[0,1]
#   y[2m+1,2n+1] = x[m,n]  @W[2,2] + x[m,n+1]@W[2,0] + x[m+1,n]@W[0,2] + x[m+1,n+1]@W[0,0]
# All 4 phases are fused into one matmul against a block weight whose K rows
# are grouped [x, xc, xn, xnc] and whose N columns are grouped [ee, eo, oe, oo].
# ---------------------------------------------------------------------------
def _phase_weight(w):
    """Torch ConvT weight (Cin, Cout, 3, 3) -> (4*Cin, 4*Cout) block weight."""
    Cin, Cout = w.shape[0], w.shape[1]
    Z = jnp.zeros((Cin, Cout), jnp.float32)
    t = lambda kh, kw: w[:, :, kh, kw]
    col = lambda rx, rxc, rxn, rxnc: jnp.concatenate([rx, rxc, rxn, rxnc], axis=0)
    ee = col(t(1, 1), Z,        Z,        Z)
    eo = col(t(1, 2), t(1, 0),  Z,        Z)
    oe = col(t(2, 1), Z,        t(0, 1),  Z)
    oo = col(t(2, 2), t(2, 0),  t(0, 2),  t(0, 0))
    return jnp.concatenate([ee, eo, oe, oo], axis=1)          # (4Cin, 4Cout)


def _build_slab(x_ref, xh_ref, cdt):
    """im2col slab [x, x_col+1, x_row+1, x_row+1_col+1] for one row block."""
    R, W, Cin = x_ref.shape
    x = x_ref[...].astype(cdt)                                 # x[m,   n]
    halo = xh_ref[...].astype(cdt)                             # x[blk_end, n]
    xn = jnp.concatenate([x[1:], halo], axis=0)                # x[m+1, n]
    zc = jnp.zeros((R, 1, Cin), cdt)
    xc = jnp.concatenate([x[:, 1:], zc], axis=1)               # x[m,   n+1]
    xnc = jnp.concatenate([xn[:, 1:], zc], axis=1)             # x[m+1, n+1]
    return jnp.concatenate([x, xc, xn, xnc], axis=-1).reshape(R * W, 4 * Cin)


# ---------------------------------------------------------------------------
# Kernel 1: ConvTranspose2d #1 (3 -> 32).  Output kept in the packed layout
# (Hp, 2, W, 2*C1); viewing it as (2*Hp, 2*W, C1) is a free row-major reshape.
# ---------------------------------------------------------------------------
def _convt1_kernel(x_ref, xh_ref, wt_ref, wb_ref, b_ref, o_ref):
    R, W, _ = x_ref.shape
    Co2 = wt_ref.shape[1]                                      # 2 * Cout
    cdt = wt_ref.dtype

    slab = _build_slab(x_ref, xh_ref, cdt)                     # (R*W, 4*Cin)
    b = b_ref[...]                                             # (1, Co2) f32
    top = jnp.dot(slab, wt_ref[...], preferred_element_type=jnp.float32) + b
    bot = jnp.dot(slab, wb_ref[...], preferred_element_type=jnp.float32) + b
    o_ref[:, 0:1, :, :] = top.reshape(R, 1, W, Co2).astype(o_ref.dtype)
    o_ref[:, 1:2, :, :] = bot.reshape(R, 1, W, Co2).astype(o_ref.dtype)


def conv_transpose_stage1(xp, w_top, w_bot, b1, *, block_rows, out_dtype):
    Hp, W, Cin = xp.shape
    K4, Co2 = w_top.shape
    assert K4 == 4 * Cin and Hp % block_rows == 0
    R = block_rows
    nb = Hp // R
    return pl.pallas_call(
        _convt1_kernel,
        out_shape=jax.ShapeDtypeStruct((Hp, 2, W, Co2), out_dtype),
        grid=(nb,),
        in_specs=[
            pl.BlockSpec((R, W, Cin), lambda i: (i, 0, 0)),
            # one-row halo window (block size 1 -> index is an absolute row)
            pl.BlockSpec((1, W, Cin),
                         lambda i: (jnp.minimum((i + 1) * R, Hp - 1), 0, 0)),
            pl.BlockSpec((K4, Co2), lambda i: (0, 0)),
            pl.BlockSpec((K4, Co2), lambda i: (0, 0)),
            pl.BlockSpec((1, Co2), lambda i: (0, 0)),
        ],
        out_specs=pl.BlockSpec((R, 2, W, Co2), lambda i: (i, 0, 0, 0)),
        compiler_params=pltpu.CompilerParams(
            dimension_semantics=("parallel",),
            vmem_limit_bytes=64 * 1024 * 1024),
    )(xp, xp, w_top, w_bot, b1)


# ---------------------------------------------------------------------------
# Kernel 2: fused ConvTranspose2d #2 (32 -> 64) + Linear reduction.
# Per row block: one K=128 / N=256 MXU matmul produces the conv2 tile in VMEM
# (never written to HBM); its contribution to the 3 logits is accumulated into
# a lane-resident (3, 256) scratch.  The Linear weight is pre-packed (offline)
# into the exact conv2-tile layout with zeros at trimmed / padded positions.
# Grid = (2, nbh): axis 0 is "parallel" (megacore split of the F reduction),
# axis 1 is the sequential reduction; each split writes its partial logits.
# ---------------------------------------------------------------------------
def _convt2_linear_kernel(x_ref, xh_ref, w2_ref, b2_ref, wl_ref, o_ref, acc_ref):
    j = pl.program_id(1)

    @pl.when(j == 0)
    def _init():
        acc_ref[...] = jnp.zeros_like(acc_ref)

    R, Wv, _ = x_ref.shape
    N4 = w2_ref.shape[1]
    NOUT = wl_ref.shape[0]
    cdt = w2_ref.dtype

    slab = _build_slab(x_ref, xh_ref, cdt)                     # (R*Wv, 4*Cin)
    y2 = jnp.dot(slab, w2_ref[...], preferred_element_type=jnp.float32)
    y2 = y2 + b2_ref[...]                                      # (R*Wv, N4) f32

    parts = []
    for k in range(NOUT):                                      # static unroll (3)
        wk = wl_ref[k].reshape(R * Wv, N4).astype(jnp.float32)
        parts.append(jnp.sum(y2 * wk, axis=0, keepdims=True))  # (1, N4)
    acc_ref[...] += jnp.concatenate(parts, axis=0)             # (NOUT, N4)

    @pl.when(j == pl.num_programs(1) - 1)
    def _finalize():
        # single cross-lane reduce per split
        o_ref[0, :, :] = jnp.sum(acc_ref[...], axis=1, keepdims=True)


def conv2_linear_fused(y1, w2_blk, b2, wl_pk, *, block_rows):
    Hp2, Wv, C1 = y1.shape
    K4, N4 = w2_blk.shape
    NOUT = wl_pk.shape[0]
    R = block_rows
    assert K4 == 4 * C1
    assert Hp2 % (2 * R) == 0, "need an even number of row blocks for the split"
    nbh = Hp2 // (2 * R)

    partial = pl.pallas_call(
        _convt2_linear_kernel,
        out_shape=jax.ShapeDtypeStruct((2, NOUT, 1), jnp.float32),
        grid=(2, nbh),
        in_specs=[
            pl.BlockSpec((R, Wv, C1), lambda c, j: (c * nbh + j, 0, 0)),
            pl.BlockSpec((1, Wv, C1),
                         lambda c, j: (jnp.minimum((c * nbh + j + 1) * R, Hp2 - 1),
                                       0, 0)),
            pl.BlockSpec((K4, N4), lambda c, j: (0, 0)),
            pl.BlockSpec((1, N4), lambda c, j: (0, 0)),
            pl.BlockSpec((NOUT, R, Wv, N4), lambda c, j: (0, c * nbh + j, 0, 0)),
        ],
        out_specs=pl.BlockSpec((1, NOUT, 1), lambda c, j: (c, 0, 0)),
        scratch_shapes=[pltpu.VMEM((NOUT, N4), jnp.float32)],
        compiler_params=pltpu.CompilerParams(
            dimension_semantics=("parallel", "arbitrary"),
            vmem_limit_bytes=64 * 1024 * 1024),
    )(y1, y1, w2_blk, b2, wl_pk)
    return partial[:, :, 0]                                    # (2, NOUT)


# ---------------------------------------------------------------------------
# One-time parameter preparation (checkpoint prep): phase-block conv weights,
# phase-tiled biases, and the Linear weight permuted/zero-padded into the
# conv2 packed-tile layout.  This is OUTSIDE the per-call path (review item 1)
# and stored in compute_dtype (bf16 by default, review item 2).
# ---------------------------------------------------------------------------
def prepare_params(params, H, W, *, block_rows_conv1=BLOCK_ROWS_CONV1,
                   block_rows_fused=BLOCK_ROWS_FUSED,
                   compute_dtype=jnp.bfloat16):
    C1 = params["w1"].shape[1]
    C2 = params["w2"].shape[1]
    NOUT = params["wl"].shape[0]
    H1, W1 = 2 * H - 1, 2 * W - 1
    H2, W2 = 2 * H1 - 1, 2 * W1 - 1
    assert params["wl"].shape[1] == C2 * H2 * W2

    L = block_rows_conv1 * block_rows_fused // math.gcd(block_rows_conv1,
                                                        block_rows_fused)
    Hp = -(-H // L) * L
    Hp2, Wv = 2 * Hp, 2 * W
    cdt = compute_dtype

    w1 = params["w1"].astype(jnp.float32)
    w2 = params["w2"].astype(jnp.float32)
    b1 = params["b1"].astype(jnp.float32)
    b2 = params["b2"].astype(jnp.float32)
    wl = params["wl"].astype(jnp.float32)
    bl = params["bl"].astype(jnp.float32)

    w1_blk = _phase_weight(w1)                                  # (12, 4*C1)
    w1_top = w1_blk[:, :2 * C1].astype(cdt)                     # [ee|eo]
    w1_bot = w1_blk[:, 2 * C1:].astype(cdt)                     # [oe|oo]
    b1_pk = jnp.concatenate([b1, b1]).reshape(1, 2 * C1)

    w2_blk = _phase_weight(w2).astype(cdt)                      # (128, 256)
    b2_pk = jnp.tile(b2, 4).reshape(1, 4 * C2)

    # Linear weight: torch CHW-flatten -> HWC -> conv2 packed-tile layout, with
    # zeros on trimmed rows/cols and on the padded region (so garbage conv
    # values never contribute).
    wl_hwc = wl.reshape(NOUT, C2, H2, W2).transpose(0, 2, 3, 1)
    wl_pad = jnp.pad(wl_hwc,
                     ((0, 0), (0, 2 * Hp2 - H2), (0, 2 * Wv - W2), (0, 0)))
    wl_pk = wl_pad.reshape(NOUT, Hp2, 2, Wv, 2, C2)
    wl_pk = wl_pk.transpose(0, 1, 3, 2, 4, 5).reshape(NOUT, Hp2, Wv, 4 * C2)
    wl_pk = wl_pk.astype(cdt)

    return {"w1_top": w1_top, "w1_bot": w1_bot, "b1": b1_pk,
            "w2_blk": w2_blk, "b2": b2_pk, "wl_pk": wl_pk, "bl": bl}


# ---------------------------------------------------------------------------
# Forward pass (torch: x = unsqueeze(x1, 0); squeeze(model(x), dim=0))
# ---------------------------------------------------------------------------
def model_forward(x1, prep, *, block_rows_conv1=BLOCK_ROWS_CONV1,
                  block_rows_fused=BLOCK_ROWS_FUSED):
    H, W, _ = x1.shape
    Hp2 = prep["wl_pk"].shape[1]
    Hp = Hp2 // 2
    xp = x1 if Hp == H else jnp.pad(x1, ((0, Hp - H), (0, 0), (0, 0)))

    y1 = conv_transpose_stage1(xp, prep["w1_top"], prep["w1_bot"], prep["b1"],
                               block_rows=block_rows_conv1,
                               out_dtype=prep["w1_top"].dtype)
    C1 = prep["w1_top"].shape[1] // 2
    y1_view = y1.reshape(Hp2, 2 * W, C1)            # free row-major reshape

    partial = conv2_linear_fused(y1_view, prep["w2_blk"], prep["b2"],
                                 prep["wl_pk"], block_rows=block_rows_fused)
    # 3-element epilogue: combine the two megacore partial logits + softmax.
    logits = partial.sum(axis=0) + prep["bl"]
    return jax.nn.softmax(logits)


# ---------------------------------------------------------------------------
# Pure-numpy reference (independent check of the Pallas path)
# ---------------------------------------------------------------------------
def _conv_transpose2d_ref(x_chw, w_t, b, s, p):
    Cin, H, W = x_chw.shape
    _, Cout, KH, KW = w_t.shape
    Ho, Wo = (H - 1) * s - 2 * p + KH, (W - 1) * s - 2 * p + KW
    out = np.tile(b[:, None, None], (1, Ho, Wo)).astype(np.float32)
    for ih in range(H):
        for iw in range(W):
            for kh in range(KH):
                for kw in range(KW):
                    oh, ow = ih * s - p + kh, iw * s - p + kw
                    if 0 <= oh < Ho and 0 <= ow < Wo:
                        out[:, oh, ow] += w_t[:, :, kh, kw].T @ x_chw[:, ih, iw]
    return out


def model_ref(x1, params):
    x_chw = np.transpose(np.asarray(x1), (2, 0, 1))
    y = _conv_transpose2d_ref(x_chw, np.asarray(params["w1"]),
                              np.asarray(params["b1"]), 2, 1)
    y = _conv_transpose2d_ref(y, np.asarray(params["w2"]),
                              np.asarray(params["b2"]), 2, 1)
    feat = y.reshape(1, -1)
    logits = feat @ np.asarray(params["wl"]).T + np.asarray(params["bl"])
    e = np.exp(logits - logits.max(axis=1, keepdims=True))
    return (e / e.sum(axis=1, keepdims=True))[0]


# ---------------------------------------------------------------------------
if __name__ == "__main__":
    H = W = 16                        # small spatial (original script used 224)
    H2 = 4 * H - 3                    # H -> 2H-1 -> 4H-3 after the two convT layers
    F = 64 * H2 * H2                  # actual flattened feature count

    key = jax.random.PRNGKey(0)
    k = jax.random.split(key, 7)
    x1 = jax.random.normal(k[0], (H, W, 3), jnp.float32)
    params = {
        "w1": jax.random.normal(k[1], (3, 32, 3, 3), jnp.float32) / np.sqrt(3 * 9),
        "b1": jax.random.normal(k[2], (32,), jnp.float32) * 0.1,
        "w2": jax.random.normal(k[3], (32, 64, 3, 3), jnp.float32) / np.sqrt(32 * 9),
        "b2": jax.random.normal(k[4], (64,), jnp.float32) * 0.1,
        "wl": jax.random.normal(k[5], (3, F), jnp.float32) / np.sqrt(F),
        "bl": jax.random.normal(k[6], (3,), jnp.float32) * 0.1,
    }

    ref = model_ref(x1, params)
    fwd = jax.jit(model_forward)

    # f32 operands / f32 weights: tight check against the numpy reference.
    prep_f32 = prepare_params(params, H, W, compute_dtype=jnp.float32)
    out_f32 = jax.block_until_ready(fwd(x1, prep_f32))
    assert out_f32.shape == (3,), out_f32.shape
    assert np.allclose(np.asarray(out_f32), ref, atol=2e-3, rtol=2e-3), (out_f32, ref)

    # bf16 operands / bf16 streamed weights (default), f32 accumulation.
    prep_bf16 = prepare_params(params, H, W, compute_dtype=jnp.bfloat16)
    out_bf16 = jax.block_until_ready(fwd(x1, prep_bf16))
    assert out_bf16.shape == (3,), out_bf16.shape
    assert np.allclose(np.asarray(out_bf16), ref, atol=6e-2), (out_bf16, ref)

    print("KERNEL_OK")
</pallas_src>

<mosaic_0001>
module attributes {stable_mosaic.version = 11 : i64} {
  func.func @_convt1_kernel(%arg0: i32, %arg1: memref<8x16x3xf32, #tpu.memory_space<vmem>>, %arg2: memref<1x16x3xf32, #tpu.memory_space<vmem>>, %arg3: memref<12x64xf32, #tpu.memory_space<vmem>>, %arg4: memref<12x64xf32, #tpu.memory_space<vmem>>, %arg5: memref<1x64xf32, #tpu.memory_space<vmem>>, %arg6: memref<8x2x16x64xf32, #tpu.memory_space<vmem>>) attributes {dimension_semantics = [#tpu.dimension_semantics<parallel>], iteration_bounds = array<i64: 2>, scalar_prefetch = 0 : i64, scratch_operands = 0 : i64, tpu.core_type = #tpu.core_type<tc>, window_params = [{transform_indices = @transform_0, window_bounds = array<i64: 8, 16, 3>}, {transform_indices = @transform_1, window_bounds = array<i64: 1, 16, 3>}, {pipeline_mode = #tpu.pipeline_mode<synchronous>, transform_indices = @transform_2, window_bounds = array<i64: 12, 64>}, {pipeline_mode = #tpu.pipeline_mode<synchronous>, transform_indices = @transform_3, window_bounds = array<i64: 12, 64>}, {pipeline_mode = #tpu.pipeline_mode<synchronous>, transform_indices = @transform_4, window_bounds = array<i64: 1, 64>}, {transform_indices = @transform_5, window_bounds = array<i64: 8, 2, 16, 64>}]} {
    %c0 = arith.constant 0 : index
    %c0_0 = arith.constant 0 : index
    %c0_1 = arith.constant 0 : index
    %0 = vector.load %arg1[%c0, %c0_0, %c0_1] : memref<8x16x3xf32, #tpu.memory_space<vmem>>, vector<8x16x3xf32>
    %c0_2 = arith.constant 0 : index
    %c0_3 = arith.constant 0 : index
    %c0_4 = arith.constant 0 : index
    %1 = vector.load %arg2[%c0_2, %c0_3, %c0_4] : memref<1x16x3xf32, #tpu.memory_space<vmem>>, vector<1x16x3xf32>
    %2 = vector.extract_strided_slice %0 {offsets = [1, 0, 0], sizes = [7, 16, 3], strides = [1, 1, 1]} : vector<8x16x3xf32> to vector<7x16x3xf32>
    %3 = tpu.concatenate %2, %1 in 0 : vector<7x16x3xf32>, vector<1x16x3xf32> -> vector<8x16x3xf32>
    %cst = arith.constant 0.000000e+00 : f32
    %4 = vector.broadcast %cst : f32 to vector<8x1x3xf32>
    %5 = vector.extract_strided_slice %0 {offsets = [0, 1, 0], sizes = [8, 15, 3], strides = [1, 1, 1]} : vector<8x16x3xf32> to vector<8x15x3xf32>
    %6 = tpu.concatenate %5, %4 in 1 : vector<8x15x3xf32>, vector<8x1x3xf32> -> vector<8x16x3xf32>
    %7 = vector.extract_strided_slice %3 {offsets = [0, 1, 0], sizes = [8, 15, 3], strides = [1, 1, 1]} : vector<8x16x3xf32> to vector<8x15x3xf32>
    %8 = tpu.concatenate %7, %4 in 1 : vector<8x15x3xf32>, vector<8x1x3xf32> -> vector<8x16x3xf32>
    %9 = tpu.concatenate %0, %6, %3, %8 in 2 : vector<8x16x3xf32>, vector<8x16x3xf32>, vector<8x16x3xf32>, vector<8x16x3xf32> -> vector<8x16x12xf32>
    %10 = vector.shape_cast %9 : vector<8x16x12xf32> to vector<128x12xf32>
    %c0_5 = arith.constant 0 : index
    %c0_6 = arith.constant 0 : index
    %11 = vector.load %arg5[%c0_5, %c0_6] : memref<1x64xf32, #tpu.memory_space<vmem>>, vector<1x64xf32>
    %c0_7 = arith.constant 0 : index
    %c0_8 = arith.constant 0 : index
    %12 = vector.load %arg3[%c0_7, %c0_8] : memref<12x64xf32, #tpu.memory_space<vmem>>, vector<12x64xf32>
    %cst_9 = arith.constant dense<0.000000e+00> : vector<128x64xf32>
    %13 = tpu.matmul %10, %12, %cst_9 {dimension_numbers = #tpu.dot_dimension_numbers<[1], [0], [0], [1], [0, 0, 1, 1], [], []>} : vector<128x12xf32>, vector<12x64xf32>, vector<128x64xf32> -> vector<128x64xf32>
    %14 = vector.broadcast %11 : vector<1x64xf32> to vector<128x64xf32>
    %15 = arith.addf %13, %14 : vector<128x64xf32>
    %c0_10 = arith.constant 0 : index
    %c0_11 = arith.constant 0 : index
    %16 = vector.load %arg4[%c0_10, %c0_11] : memref<12x64xf32, #tpu.memory_space<vmem>>, vector<12x64xf32>
    %cst_12 = arith.constant dense<0.000000e+00> : vector<128x64xf32>
    %17 = tpu.matmul %10, %16, %cst_12 {dimension_numbers = #tpu.dot_dimension_numbers<[1], [0], [0], [1], [0, 0, 1, 1], [], []>} : vector<128x12xf32>, vector<12x64xf32>, vector<128x64xf32> -> vector<128x64xf32>
    %18 = vector.broadcast %11 : vector<1x64xf32> to vector<128x64xf32>
    %19 = arith.addf %17, %18 : vector<128x64xf32>
    %20 = vector.shape_cast %15 : vector<128x64xf32> to vector<8x1x16x64xf32>
    %c0_13 = arith.constant 0 : index
    %c0_14 = arith.constant 0 : index
    %c0_15 = arith.constant 0 : index
    %c0_16 = arith.constant 0 : index
    %21 = vector.load %arg6[%c0_13, %c0_14, %c0_15, %c0_16] : memref<8x2x16x64xf32, #tpu.memory_space<vmem>>, vector<8x1x16x64xf32>
    tpu.vector_store %arg6[%c0_13, %c0_14, %c0_15, %c0_16], %20 {strides = array<i32>} : memref<8x2x16x64xf32, #tpu.memory_space<vmem>>, vector<8x1x16x64xf32>,
    %22 = vector.shape_cast %19 : vector<128x64xf32> to vector<8x1x16x64xf32>
    %c0_17 = arith.constant 0 : index
    %c1 = arith.constant 1 : index
    %c0_18 = arith.constant 0 : index
    %c0_19 = arith.constant 0 : index
    %23 = vector.load %arg6[%c0_17, %c1, %c0_18, %c0_19] : memref<8x2x16x64xf32, #tpu.memory_space<vmem>>, vector<8x1x16x64xf32>
    tpu.vector_store %arg6[%c0_17, %c1, %c0_18, %c0_19], %22 {strides = array<i32>} : memref<8x2x16x64xf32, #tpu.memory_space<vmem>>, vector<8x1x16x64xf32>,
    return
  }
  func.func @transform_0(%arg0: i32) -> (i32, i32, i32) {
    %c0_i32 = arith.constant 0 : i32
    %c0_i32_0 = arith.constant 0 : i32
    %c0_i32_1 = arith.constant 0 : i32
    return %arg0, %c0_i32, %c0_i32_0 : i32, i32, i32
  }
  func.func @transform_1(%arg0: i32) -> (i32, i32, i32) {
    %c1_i32 = arith.constant 1 : i32
    %0 = arith.addi %arg0, %c1_i32 : i32
    %c8_i32 = arith.constant 8 : i32
    %1 = arith.muli %0, %c8_i32 : i32
    %c15_i32 = arith.constant 15 : i32
    %2 = arith.minsi %1, %c15_i32 : i32
    %c0_i32 = arith.constant 0 : i32
    %c0_i32_0 = arith.constant 0 : i32
    %c0_i32_1 = arith.constant 0 : i32
    return %2, %c0_i32, %c0_i32_0 : i32, i32, i32
  }
  func.func @transform_2(%arg0: i32) -> (i32, i32) {
    %c0_i32 = arith.constant 0 : i32
    %c0_i32_0 = arith.constant 0 : i32
    %c0_i32_1 = arith.constant 0 : i32
    return %c0_i32, %c0_i32_0 : i32, i32
  }
  func.func @transform_3(%arg0: i32) -> (i32, i32) {
    %c0_i32 = arith.constant 0 : i32
    %c0_i32_0 = arith.constant 0 : i32
    %c0_i32_1 = arith.constant 0 : i32
    return %c0_i32, %c0_i32_0 : i32, i32
  }
  func.func @transform_4(%arg0: i32) -> (i32, i32) {
    %c0_i32 = arith.constant 0 : i32
    %c0_i32_0 = arith.constant 0 : i32
    %c0_i32_1 = arith.constant 0 : i32
    return %c0_i32, %c0_i32_0 : i32, i32
  }
  func.func @transform_5(%arg0: i32) -> (i32, i32, i32, i32) {
    %c0_i32 = arith.constant 0 : i32
    %c0_i32_0 = arith.constant 0 : i32
    %c0_i32_1 = arith.constant 0 : i32
    %c0_i32_2 = arith.constant 0 : i32
    return %arg0, %c0_i32, %c0_i32_0, %c0_i32_1 : i32, i32, i32, i32
  }
}

module attributes {stable_mosaic.version = 11 : i64} {
  func.func @_convt2_linear_kernel(%arg0: i32, %arg1: i32, %arg2: memref<16x32x32xf32, #tpu.memory_space<vmem>>, %arg3: memref<1x32x32xf32, #tpu.memory_space<vmem>>, %arg4: memref<128x256xf32, #tpu.memory_space<vmem>>, %arg5: memref<1x256xf32, #tpu.memory_space<vmem>>, %arg6: memref<3x16x32x256xf32, #tpu.memory_space<vmem>>, %arg7: memref<1x3x1xf32, #tpu.memory_space<vmem>>, %arg8: memref<3x256xf32, #tpu.memory_space<vmem>>) attributes {dimension_semantics = [#tpu.dimension_semantics<parallel>, #tpu.dimension_semantics<arbitrary>], iteration_bounds = array<i64: 2, 1>, scalar_prefetch = 0 : i64, scratch_operands = 1 : i64, tpu.core_type = #tpu.core_type<tc>, window_params = [{transform_indices = @transform_0, window_bounds = array<i64: 16, 32, 32>}, {transform_indices = @transform_1, window_bounds = array<i64: 1, 32, 32>}, {pipeline_mode = #tpu.pipeline_mode<synchronous>, transform_indices = @transform_2, window_bounds = array<i64: 128, 256>}, {pipeline_mode = #tpu.pipeline_mode<synchronous>, transform_indices = @transform_3, window_bounds = array<i64: 1, 256>}, {transform_indices = @transform_4, window_bounds = array<i64: 3, 16, 32, 256>}, {transform_indices = @transform_5, window_bounds = array<i64: 1, 3, 1>}]} {
    %c0_i32 = arith.constant 0 : i32
    %0 = arith.cmpi eq, %arg1, %c0_i32 : i32
    %1 = arith.extui %0 : i1 to i32
    %c0_i32_0 = arith.constant 0 : i32
    %2 = arith.cmpi ne, %1, %c0_i32_0 : i32
    scf.if %2 {
      %cst_30 = arith.constant 0.000000e+00 : f32
      %44 = vector.broadcast %cst_30 : f32 to vector<3x256xf32>
      %c0_31 = arith.constant 0 : index
      %c0_32 = arith.constant 0 : index
      %45 = vector.load %arg8[%c0_31, %c0_32] : memref<3x256xf32, #tpu.memory_space<vmem>>, vector<3x256xf32>
      tpu.vector_store %arg8[%c0_31, %c0_32], %44 {strides = array<i32>} : memref<3x256xf32, #tpu.memory_space<vmem>>, vector<3x256xf32>,
    } else {
    }
    %c0 = arith.constant 0 : index
    %c0_1 = arith.constant 0 : index
    %c0_2 = arith.constant 0 : index
    %3 = vector.load %arg2[%c0, %c0_1, %c0_2] : memref<16x32x32xf32, #tpu.memory_space<vmem>>, vector<16x32x32xf32>
    %c0_3 = arith.constant 0 : index
    %c0_4 = arith.constant 0 : index
    %c0_5 = arith.constant 0 : index
    %4 = vector.load %arg3[%c0_3, %c0_4, %c0_5] : memref<1x32x32xf32, #tpu.memory_space<vmem>>, vector<1x32x32xf32>
    %5 = vector.extract_strided_slice %3 {offsets = [1, 0, 0], sizes = [15, 32, 32], strides = [1, 1, 1]} : vector<16x32x32xf32> to vector<15x32x32xf32>
    %6 = tpu.concatenate %5, %4 in 0 : vector<15x32x32xf32>, vector<1x32x32xf32> -> vector<16x32x32xf32>
    %cst = arith.constant 0.000000e+00 : f32
    %7 = vector.broadcast %cst : f32 to vector<16x1x32xf32>
    %8 = vector.extract_strided_slice %3 {offsets = [0, 1, 0], sizes = [16, 31, 32], strides = [1, 1, 1]} : vector<16x32x32xf32> to vector<16x31x32xf32>
    %9 = tpu.concatenate %8, %7 in 1 : vector<16x31x32xf32>, vector<16x1x32xf32> -> vector<16x32x32xf32>
    %10 = vector.extract_strided_slice %6 {offsets = [0, 1, 0], sizes = [16, 31, 32], strides = [1, 1, 1]} : vector<16x32x32xf32> to vector<16x31x32xf32>
    %11 = tpu.concatenate %10, %7 in 1 : vector<16x31x32xf32>, vector<16x1x32xf32> -> vector<16x32x32xf32>
    %12 = tpu.concatenate %3, %9, %6, %11 in 2 : vector<16x32x32xf32>, vector<16x32x32xf32>, vector<16x32x32xf32>, vector<16x32x32xf32> -> vector<16x32x128xf32>
    %13 = vector.shape_cast %12 : vector<16x32x128xf32> to vector<512x128xf32>
    %c0_6 = arith.constant 0 : index
    %c0_7 = arith.constant 0 : index
    %14 = vector.load %arg4[%c0_6, %c0_7] : memref<128x256xf32, #tpu.memory_space<vmem>>, vector<128x256xf32>
    %cst_8 = arith.constant dense<0.000000e+00> : vector<512x256xf32>
    %15 = tpu.matmul %13, %14, %cst_8 {dimension_numbers = #tpu.dot_dimension_numbers<[1], [0], [0], [1], [0, 0, 1, 1], [], []>} : vector<512x128xf32>, vector<128x256xf32>, vector<512x256xf32> -> vector<512x256xf32>
    %c0_9 = arith.constant 0 : index
    %c0_10 = arith.constant 0 : index
    %16 = vector.load %arg5[%c0_9, %c0_10] : memref<1x256xf32, #tpu.memory_space<vmem>>, vector<1x256xf32>
    %17 = vector.broadcast %16 : vector<1x256xf32> to vector<512x256xf32>
    %18 = arith.addf %15, %17 : vector<512x256xf32>
    %c0_11 = arith.constant 0 : index
    %c0_12 = arith.constant 0 : index
    %c0_13 = arith.constant 0 : index
    %c0_14 = arith.constant 0 : index
    %19 = vector.load %arg6[%c0_11, %c0_12, %c0_13, %c0_14] : memref<3x16x32x256xf32, #tpu.memory_space<vmem>>, vector<1x16x32x256xf32>
    %20 = vector.shape_cast %19 : vector<1x16x32x256xf32> to vector<16x32x256xf32>
    %21 = vector.shape_cast %20 : vector<16x32x256xf32> to vector<512x256xf32>
    %22 = arith.mulf %18, %21 : vector<512x256xf32>
    %cst_15 = arith.constant dense<0.000000e+00> : vector<256xf32>
    %23 = vector.multi_reduction <add>, %22, %cst_15 [0] : vector<512x256xf32> to vector<256xf32>
    %24 = vector.shape_cast %23 : vector<256xf32> to vector<1x256xf32>
    %c1 = arith.constant 1 : index
    %c0_16 = arith.constant 0 : index
    %c0_17 = arith.constant 0 : index
    %c0_18 = arith.constant 0 : index
    %25 = vector.load %arg6[%c1, %c0_16, %c0_17, %c0_18] : memref<3x16x32x256xf32, #tpu.memory_space<vmem>>, vector<1x16x32x256xf32>
    %26 = vector.shape_cast %25 : vector<1x16x32x256xf32> to vector<16x32x256xf32>
    %27 = vector.shape_cast %26 : vector<16x32x256xf32> to vector<512x256xf32>
    %28 = arith.mulf %18, %27 : vector<512x256xf32>
    %cst_19 = arith.constant dense<0.000000e+00> : vector<256xf32>
    %29 = vector.multi_reduction <add>, %28, %cst_19 [0] : vector<512x256xf32> to vector<256xf32>
    %30 = vector.shape_cast %29 : vector<256xf32> to vector<1x256xf32>
    %c2 = arith.constant 2 : index
    %c0_20 = arith.constant 0 : index
    %c0_21 = arith.constant 0 : index
    %c0_22 = arith.constant 0 : index
    %31 = vector.load %arg6[%c2, %c0_20, %c0_21, %c0_22] : memref<3x16x32x256xf32, #tpu.memory_space<vmem>>, vector<1x16x32x256xf32>
    %32 = vector.shape_cast %31 : vector<1x16x32x256xf32> to vector<16x32x256xf32>
    %33 = vector.shape_cast %32 : vector<16x32x256xf32> to vector<512x256xf32>
    %34 = arith.mulf %18, %33 : vector<512x256xf32>
    %cst_23 = arith.constant dense<0.000000e+00> : vector<256xf32>
    %35 = vector.multi_reduction <add>, %34, %cst_23 [0] : vector<512x256xf32> to vector<256xf32>
    %36 = vector.shape_cast %35 : vector<256xf32> to vector<1x256xf32>
    %c0_24 = arith.constant 0 : index
    %c0_25 = arith.constant 0 : index
    %37 = vector.load %arg8[%c0_24, %c0_25] : memref<3x256xf32, #tpu.memory_space<vmem>>, vector<3x256xf32>
    %38 = tpu.concatenate %24, %30, %36 in 0 : vector<1x256xf32>, vector<1x256xf32>, vector<1x256xf32> -> vector<3x256xf32>
    %39 = arith.addf %37, %38 : vector<3x256xf32>
    %c0_26 = arith.constant 0 : index
    %c0_27 = arith.constant 0 : index
    %40 = vector.load %arg8[%c0_26, %c0_27] : memref<3x256xf32, #tpu.memory_space<vmem>>, vector<3x256xf32>
    tpu.vector_store %arg8[%c0_26, %c0_27], %39 {strides = array<i32>} : memref<3x256xf32, #tpu.memory_space<vmem>>, vector<3x256xf32>,
    %c0_i32_28 = arith.constant 0 : i32
    %41 = arith.cmpi eq, %arg1, %c0_i32_28 : i32
    %42 = arith.extui %41 : i1 to i32
    %c0_i32_29 = arith.constant 0 : i32
    %43 = arith.cmpi ne, %42, %c0_i32_29 : i32
    scf.if %43 {
      %c0_30 = arith.constant 0 : index
      %c0_31 = arith.constant 0 : index
      %44 = vector.load %arg8[%c0_30, %c0_31] : memref<3x256xf32, #tpu.memory_space<vmem>>, vector<3x256xf32>
      %cst_32 = arith.constant dense<0.000000e+00> : vector<3xf32>
      %45 = vector.multi_reduction <add>, %44, %cst_32 [1] : vector<3x256xf32> to vector<3xf32>
      %46 = vector.shape_cast %45 : vector<3xf32> to vector<3x1xf32>
      %c0_33 = arith.constant 0 : index
      %c0_34 = arith.constant 0 : index
      %c0_35 = arith.constant 0 : index
      %47 = vector.load %arg7[%c0_33, %c0_34, %c0_35] : memref<1x3x1xf32, #tpu.memory_space<vmem>>, vector<1x3x1xf32>
      %48 = vector.shape_cast %47 : vector<1x3x1xf32> to vector<3x1xf32>
      %49 = vector.shape_cast %46 : vector<3x1xf32> to vector<1x3x1xf32>
      tpu.vector_store %arg7[%c0_33, %c0_34, %c0_35], %49 {strides = array<i32>} : memref<1x3x1xf32, #tpu.memory_space<vmem>>, vector<1x3x1xf32>,
    } else {
    }
    return
  }
  func.func @transform_0(%arg0: i32, %arg1: i32) -> (i32, i32, i32) {
    %c1_i32 = arith.constant 1 : i32
    %0 = arith.muli %arg0, %c1_i32 : i32
    %1 = arith.addi %0, %arg1 : i32
    %c0_i32 = arith.constant 0 : i32
    %c0_i32_0 = arith.constant 0 : i32
    %c0_i32_1 = arith.constant 0 : i32
    return %1, %c0_i32, %c0_i32_0 : i32, i32, i32
  }
  func.func @transform_1(%arg0: i32, %arg1: i32) -> (i32, i32, i32) {
    %c1_i32 = arith.constant 1 : i32
    %0 = arith.muli %arg0, %c1_i32 : i32
    %1 = arith.addi %0, %arg1 : i32
    %c1_i32_0 = arith.constant 1 : i32
    %2 = arith.addi %1, %c1_i32_0 : i32
    %c16_i32 = arith.constant 16 : i32
    %3 = arith.muli %2, %c16_i32 : i32
    %c31_i32 = arith.constant 31 : i32
    %4 = arith.minsi %3, %c31_i32 : i32
    %c0_i32 = arith.constant 0 : i32
    %c0_i32_1 = arith.constant 0 : i32
    %c0_i32_2 = arith.constant 0 : i32
    return %4, %c0_i32, %c0_i32_1 : i32, i32, i32
  }
  func.func @transform_2(%arg0: i32, %arg1: i32) -> (i32, i32) {
    %c0_i32 = arith.constant 0 : i32
    %c0_i32_0 = arith.constant 0 : i32
    %c0_i32_1 = arith.constant 0 : i32
    return %c0_i32, %c0_i32_0 : i32, i32
  }
  func.func @transform_3(%arg0: i32, %arg1: i32) -> (i32, i32) {
    %c0_i32 = arith.constant 0 : i32
    %c0_i32_0 = arith.constant 0 : i32
    %c0_i32_1 = arith.constant 0 : i32
    return %c0_i32, %c0_i32_0 : i32, i32
  }
  func.func @transform_4(%arg0: i32, %arg1: i32) -> (i32, i32, i32, i32) {
    %c1_i32 = arith.constant 1 : i32
    %0 = arith.muli %arg0, %c1_i32 : i32
    %1 = arith.addi %0, %arg1 : i32
    %c0_i32 = arith.constant 0 : i32
    %c0_i32_0 = arith.constant 0 : i32
    %c0_i32_1 = arith.constant 0 : i32
    %c0_i32_2 = arith.constant 0 : i32
    return %c0_i32, %1, %c0_i32_0, %c0_i32_1 : i32, i32, i32, i32
  }
  func.func @transform_5(%arg0: i32, %arg1: i32) -> (i32, i32, i32) {
    %c0_i32 = arith.constant 0 : i32
    %c0_i32_0 = arith.constant 0 : i32
    %c0_i32_1 = arith.constant 0 : i32
    return %arg0, %c0_i32, %c0_i32_0 : i32, i32, i32
  }
}

</mosaic_0001>

<bundles_post_ra>
// kernel: model_forward.2
= control target key start
LH: loop header
LB: loop body
LE: loop exit
PB: predicated region body
PF: predicated region fallthrough
CT: control target
= control target key end

     0   :  { %10 = vsyncpa [#allocation3], 0  ;;  %s1645_s0 = inlined_call_operand.vmem [shape: f32[16,16,3], index: 0, kind: input, shape index: {}, may-alias: {0,1}]   ;;  %s1646_s1 = inlined_call_operand.vmem [shape: f32[16,16,3], index: 1, kind: input, shape index: {}, may-alias: {0,1}]   ;;  %s1647_s2 = inlined_call_operand.hbm [shape: f32[12,64], index: 2, kind: input, shape index: {}]   ;;  %s1648_s3 = inlined_call_operand.hbm [shape: f32[12,64], index: 3, kind: input, shape index: {}]   ;;  %s1649_s4 = inlined_call_operand.hbm [shape: f32[1,64], index: 4, kind: input, shape index: {}]   ;;  %s1650_s5 = inlined_call_operand.vmem [shape: f32[16,2,16,64], index: 5, kind: output, shape index: {}]  }
   0x1   :  { %11 = vsyncpa [#allocation5], 0  ;;  %s1223_s18 = smov 0  }
   0x2 LB: > { %s944_s19 = sadd.s32 4294967295, %s1183_s18   ;;  %p948_p0 = scmp.ge.s32.totalorder %s1183_s18, 1  ;;  %s1183_s18 = sphi %s1223_s18, %s17_s18  }
   0x3   : > { %p171_p1 = scmp.lt.s32.totalorder %s1183_s18, 3  ;;  %p1233_p2 = scmp.eq.s32.totalorder %s944_s19, 0 }
   0x4   : > { %s196_s23 = sshll.u32 %s1648_s3, 4  ;;  %s182_s27 = sshll.u32 %s1647_s2, 4  ;;  %s197_s23 = int_to_ptr.hbm [resolvable:$true] %s196_s23  ;;  %s183_s27 = int_to_ptr.hbm [resolvable:$true] %s182_s27 }
   0x5   : > { %p1240_p3 = pnand %p948_p0, %p171_p1  ;;  %s1185_s28 = smov [#allocation4]  }
   0x6   : > { %s198_s29 = sshll.u32 %s1185_s28, 4  ;;  %s1186_s30 = smov [#allocation2]   ;;  %s199_s29 = int_to_ptr.vmem [resolvable:$true] %s198_s29 }
   0x7   : > { %p1046_p4 = pneg %p1240_p3  ;;  %s184_s6 = sshll.u32 %s1186_s30, 4  ;;  %s185_s6 = int_to_ptr.vmem [resolvable:$true] %s184_s6 }
   0x8   : > { %s211_s9 = sshll.u32 %s1649_s4, 4  ;;  %s1187_s10 = smov 128   ;;  %s212_s9 = int_to_ptr.hbm [resolvable:$true] %s211_s9 }
   0x9   : > { %p1047_p5 = pnand %p1233_p2, %p1046_p4  ;;  %s1188_s11 = smov 8  }
   0xa   : > { %s1189_s12 = smov [#allocation6]   ;;  %252 = sbr.rel (%p1240_p3) target bundleno = 396 (0x18c), region = 40 }
   0xb   : > { %1052 = dma.hbm_to_vmem [thread:$0]  (!%p1047_p5), %s197_s23, 256, %s199_s29, [#allocation5], %s1187_s10, %s1187_s10, %s1188_s11  }
   0xc   : > { %1049 = dma.hbm_to_vmem [thread:$0]  (!%p1047_p5), %s183_s27, 256, %s185_s6, [#allocation3], %s1187_s10, %s1187_s10, %s1188_s11  }
   0xd   : > { %s213_s13 = sshll.u32 %s1189_s12, 4  ;;  %s214_s13 = int_to_ptr.vmem [resolvable:$true] %s213_s13 }
   0xe   : > { %1055 = dma.hbm_to_vmem [thread:$0]  (!%p1047_p5), %s212_s9, 16, %s214_s13, [#allocation5]  }
   0xf   : > { %1174 = dma.done.wait (%p1233_p2), [#allocation3], 256  }
  0x10   : > { %1176 = vsyncadd (%p1233_p2), [#allocation3], 4294967040 }
  0x11   : > { %1178 = dma.done.wait (%p1233_p2), [#allocation5], 272  }
  0x12   : > { %1180 = vsyncadd (%p1233_p2), [#allocation5], 4294967024  ;;  %s1266_s14 = sshll.u32 %s944_s19, 3  ;;  %vm363_vm0 = vcmask 1046528   ;;  %s1190_s19 = smov 6   ;;  %vm670_vm1 = vcmask 1043456  }
  0x13   : > { %p303_p6 = scmp.lt.s32.totalorder %s1266_s14, 15  ;;  %s1191_s20 = smov 9   ;;  %v617_v49 = vld [vmem:[#allocation2 + $0x8] sm:$0xf]  ;;  %v740_v50 = vld [vmem:[#allocation4 + $0x8] sm:$0xf] }
  0x14   : > { %s1192_s23 = smov 3   ;;  %s1027_s24 = sadd.s32 8, %s1266_s14  ;;  %1030 = vmatpush.msk.msra.mxu2 %vm670_vm1, %v617_v49  ;;  %v616_v53 = vld [vmem:[#allocation2] sm:$0xff]  ;;  %v739_v54 = vld [vmem:[#allocation4] sm:$0xff]  ;;  %1032 = vmatpush.msk.msra.mxu3 %vm670_vm1, %v740_v50  ;;  %vm564_vm2 = vcmask 23552   ;;  %vm581_vm3 = vcmask 48128  }
  0x15   : > { %s1270_s15 = scalar_select %p303_p6, %s1266_s14, 15  ;;  %969 = vmatpush.msk.msra.mxu0 %vm670_vm1, %v617_v49  ;;  %986 = vmatpush.msk.msra.mxu1 %vm670_vm1, %v740_v50  ;;  %vm598_vm4 = vcmask 72704   ;;  %vm621_vm5 = vcmask 97280   ;;  %vm809_vm6 = vcmask 523264  }
  0x16   : > { %p1393_p7 = scmp.lt.s32.totalorder %s1027_s24, 15  ;;  %1031 = vmatpush.msra.mxu2 %v616_v53  ;;  %1033 = vmatpush.msra.mxu3 %v739_v54 }
  0x17   : > { %s1025_s16 = sshll.u32 %s1270_s15, 4  ;;  %689 = vmatpush.msra.mxu0 %v616_v53  ;;  %759 = vmatpush.msra.mxu1 %v739_v54  ;;  %s1029_s30 = sshll.u32 %s1270_s15, 5 }
  0x18   : > { %s1276_s22 = scalar_lea.vmem %s1645_s0, %s1025_s16  ;;  %s1655_s24 = smov (!%p1393_p7, %s1027_s24), 15 }
  0x19   : > { %v1279_v0 = vld [vmem:[%s1276_s22 + $0x50] sm:$0xff]  ;;  %v1282_v1 = vld [vmem:[%s1276_s22 + $0x58] sm:$0xff]  ;;  %v1285_v2 = vld [vmem:[%s1276_s22 + $0x40] sm:$0xff]  ;;  %s1657_s24 = smov (!%p1393_p7, %s1655_s24), 15  ;;  %s1544_s8 = scalar_lea.vmem %s1650_s5, %s1029_s30 }
  0x1a   : > { %483 = vrot.lane.b32.xlu0 %v1279_v0, %s1190_s19  ;;  %v379_v3 = vrot.slane %v1279_v0, 1  ;;  %v380_v4 = vrot.slane %v1282_v1, 1  ;;  %v1292_v5 = vld [vmem:[%s1276_s22 + $0x48] sm:$0xff]  ;;  %v376_v6 = vrot.slane %v1285_v2, 1  ;;  %v1297_v8 = vld [vmem:[%s1276_s22] sm:$0xff]  ;;  %v1303_v10 = vld [vmem:[%s1276_s22 + $0x10] sm:$0xff] }
  0x1b   : > { %v377_v7 = vrot.slane %v1292_v5, 1  ;;  %v1300_v9 = vld [vmem:[%s1276_s22 + $0x8] sm:$0xff]  ;;  %467 = vrot.lane.b32.xlu2 %v1303_v10, %s1190_s19  ;;  %v364_v12 = vrot.slane %v1297_v8, 1  ;;  %v1315_v15 = vld [vmem:[%s1276_s22 + $0x18] sm:$0xff]  ;;  %v367_v18 = vrot.slane %v1303_v10, 1  ;;  %v1337_v23 = vld [vmem:[%s1276_s22 + $0x60] sm:$0xff] }
  0x1c   : > { %v381_v11 = vsel %vm363_vm0, %v379_v3, %v380_v4  ;;  %v365_v13 = vrot.slane %v1300_v9, 1  ;;  %v368_v19 = vrot.slane %v1315_v15, 1  ;;  %v401_v21 = vsel %vm363_vm0, %v380_v4, 0.0  ;;  %v1340_v24 = vld [vmem:[%s1276_s22 + $0x68] sm:$0xff]  ;;  %v1358_v30 = vld [vmem:[%s1276_s22 + $0x20] sm:$0xff]  ;;  %v1373_v35 = vld [vmem:[%s1276_s22 + $0x70] sm:$0xff] }
  0x1d   : > { %532 = vrot.lane.b32.xlu1 %v381_v11, %s1191_s20  ;;  %v1312_v14 = vsel %vm363_vm0, %v376_v6, %v377_v7  ;;  %v1318_v16 = vsel %vm363_vm0, %v377_v7, 0.0  ;;  %v382_v25 = vrot.slane %v1337_v23, 1  ;;  %v383_v26 = vrot.slane %v1340_v24, 1  ;;  %v1354_v29 = vld [vmem:[%s1276_s22 + $0x28] sm:$0xff]  ;;  %v1376_v36 = vld [vmem:[%s1276_s22 + $0x78] sm:$0xff]  ;;  %v1399_v42 = vld [vmem:[%s1276_s22 + $0x30] sm:$0xff] }
  0x1e   : > { %v366_v17 = vsel %vm363_vm0, %v364_v12, %v365_v13  ;;  %v369_v20 = vsel %vm363_vm0, %v367_v18, %v368_v19  ;;  %v396_v22 = vsel %vm363_vm0, %v365_v13, 0.0  ;;  %v397_v27 = vsel %vm363_vm0, %v368_v19, 0.0  ;;  %v1391_v41 = vld [vmem:[%s1276_s22 + $0x38] sm:$0xff]  ;;  %s1028_s26 = sshll.u32 %s1657_s24, 4 }
  0x1f   : > { %v384_v28 = vsel %vm363_vm0, %v382_v25, %v383_v26  ;;  %v370_v31 = vrot.slane %v1358_v30, 1  ;;  %v371_v32 = vrot.slane %v1354_v29, 1  ;;  %v402_v34 = vsel %vm363_vm0, %v383_v26, 0.0  ;;  %s317_s29 = scalar_lea.vmem %s1646_s1, %s1028_s26 }
  0x20   : > { %v385_v37 = vrot.slane %v1373_v35, 1  ;;  %v386_v38 = vrot.slane %v1376_v36, 1  ;;  %v373_v43 = vrot.slane %v1399_v42, 1  ;;  %v374_v44 = vrot.slane %v1391_v41, 1  ;;  %v345_v47 = vld [vmem:[%s317_s29] sm:$0xff]  ;;  %v346_v48 = vld [vmem:[%s317_s29 + $0x8] sm:$0xff] }
  0x21   : > { %v372_v33 = vsel %vm363_vm0, %v370_v31, %v371_v32  ;;  %v398_v39 = vsel %vm363_vm0, %v371_v32, 0.0  ;;  %v406_v51 = vrot.slane %v345_v47, 1  ;;  %v407_v52 = vrot.slane %v346_v48, 1 }
  0x22   : > { %435 = vrot.lane.b32.xlu0 %v1312_v14, %s1192_s23  ;;  %v387_v40 = vsel %vm363_vm0, %v385_v37, %v386_v38  ;;  %v375_v45 = vsel %vm363_vm0, %v373_v43, %v374_v44  ;;  %v403_v46 = vsel %vm363_vm0, %v386_v38, 0.0  ;;  %v399_v56 = vsel %vm363_vm0, %v374_v44, 0.0 }
  0x23   : > { %437 = vrot.lane.b32.xlu2 %v1318_v16, %s1192_s23  ;;  %v408_v57 = vsel %vm363_vm0, %v406_v51, %v407_v52  ;;  %v410_v60 = vsel %vm363_vm0, %v407_v52, 0.0 }
  0x25   : > { %419 = vrot.lane.b32.xlu1 %v366_v17, %s1192_s23 }
  0x2a   : > { %516 = vrot.lane.b32.xlu0 %v369_v20, %s1191_s20 }
  0x2b   : > { %534 = vrot.lane.b32.xlu2 %v401_v21, %s1191_s20 }
  0x2d   : > { %485 = vrot.lane.b32.xlu1 %v1282_v1, %s1190_s19 }
  0x32   : > { %421 = vrot.lane.b32.xlu0 %v396_v22, %s1192_s23 }
  0x33   : > { %439 = vrot.lane.b32.xlu2 %v381_v11, %s1192_s23 }
  0x35   : > { %469 = vrot.lane.b32.xlu1 %v1315_v15, %s1190_s19 }
  0x3a   : > { %518 = vrot.lane.b32.xlu0 %v397_v27, %s1191_s20 }
  0x3b   : > { %536 = vrot.lane.b32.xlu2 %v384_v28, %s1191_s20 }
  0x3d   : > { %487 = vrot.lane.b32.xlu1 %v1337_v23, %s1190_s19 }
  0x42   : > { %423 = vrot.lane.b32.xlu0 %v369_v20, %s1192_s23 }
  0x43   : > { %441 = vrot.lane.b32.xlu2 %v401_v21, %s1192_s23 }
  0x45   : > { %471 = vrot.lane.b32.xlu1 %v1358_v30, %s1190_s19 }
  0x4a   : > { %520 = vrot.lane.b32.xlu0 %v372_v33, %s1191_s20 }
  0x4b   : > { %538 = vrot.lane.b32.xlu2 %v402_v34, %s1191_s20 }
  0x4d   : > { %489 = vrot.lane.b32.xlu1 %v1340_v24, %s1190_s19 }
  0x52   : > { %425 = vrot.lane.b32.xlu0 %v397_v27, %s1192_s23 }
  0x53   : > { %443 = vrot.lane.b32.xlu2 %v384_v28, %s1192_s23 }
  0x55   : > { %473 = vrot.lane.b32.xlu1 %v1354_v29, %s1190_s19 }
  0x5a   : > { %522 = vrot.lane.b32.xlu0 %v398_v39, %s1191_s20 }
  0x5b   : > { %540 = vrot.lane.b32.xlu2 %v387_v40, %s1191_s20 }
  0x5d   : > { %491 = vrot.lane.b32.xlu1 %v1373_v35, %s1190_s19 }
  0x62   : > { %427 = vrot.lane.b32.xlu0 %v372_v33, %s1192_s23 }
  0x63   : > { %445 = vrot.lane.b32.xlu2 %v402_v34, %s1192_s23 }
  0x65   : > { %475 = vrot.lane.b32.xlu1 %v1399_v42, %s1190_s19 }
  0x6a   : > { %524 = vrot.lane.b32.xlu0 %v375_v45, %s1191_s20 }
  0x6b   : > { %542 = vrot.lane.b32.xlu2 %v403_v46, %s1191_s20 }
  0x6d   : > { %493 = vrot.lane.b32.xlu1 %v1376_v36, %s1190_s19 }
  0x72   : > { %429 = vrot.lane.b32.xlu0 %v398_v39, %s1192_s23 }
  0x73   : > { %447 = vrot.lane.b32.xlu2 %v387_v40, %s1192_s23 }
  0x75   : > { %477 = vrot.lane.b32.xlu1 %v1391_v41, %s1190_s19  ;;  %v468_v55 = vpop.permute.xlu2 %467 }
  0x7a   : > { %526 = vrot.lane.b32.xlu0 %v399_v56, %s1191_s20 }
  0x7b   : > { %544 = vrot.lane.b32.xlu2 %v408_v57, %s1191_s20 }
  0x7d   : > { %495 = vrot.lane.b32.xlu1 %v345_v47, %s1190_s19  ;;  %v438_v58 = vpop.permute.xlu2 %437 }
  0x7e   : > { %v574_v17 = vsel %vm564_vm2, %v1292_v5, %v438_v58 }
  0x82   : > { %431 = vrot.lane.b32.xlu0 %v375_v45, %s1192_s23 }
  0x83   : > { %449 = vrot.lane.b32.xlu2 %v403_v46, %s1192_s23 }
  0x85   : > { %479 = vrot.lane.b32.xlu1 %v1285_v2, %s1190_s19  ;;  %v535_v59 = vpop.permute.xlu2 %534 }
  0x8a   : > { %528 = vrot.lane.b32.xlu0 %v1312_v14, %s1191_s20 }
  0x8b   : > { %546 = vrot.lane.b32.xlu2 %v410_v60, %s1191_s20 }
  0x8c   : > { %v484_v61 = vpop.permute.xlu0 %483 }
  0x8d   : > { %497 = vrot.lane.b32.xlu1 %v346_v48, %s1190_s19  ;;  %v440_v62 = vpop.permute.xlu2 %439 }
  0x8e   : > { %v575_v31 = vsel %vm564_vm2, %v1279_v0, %v440_v62 }
  0x8f   : > { %v533_v63 = vpop.permute.xlu1 %532 }
  0x92   : > { %433 = vrot.lane.b32.xlu0 %v399_v56, %s1192_s23 }
  0x93   : > { %530 = vrot.lane.b32.xlu2 %v1318_v16, %s1191_s20 }
  0x94   : > { %v436_v3 = vpop.permute.xlu0 %435 }
  0x95   : > { %v573_v4 = vsel %vm564_vm2, %v1285_v2, %v436_v3  ;;  %481 = vrot.lane.b32.xlu1 %v1292_v5, %s1190_s19  ;;  %v537_v12 = vpop.permute.xlu2 %536 }
  0x96   : > { %v590_v6 = vsel %vm581_vm3, %v573_v4, %v484_v61 }
  0x97   : > { %v420_v7 = vpop.permute.xlu1 %419  ;;  %v607_v11 = vsel %vm598_vm4, %v590_v6, %v533_v63 }
  0x98   : > { %978 = vmatmul.msk.f32.vlgmr.msra.gmra.mxu2 %vm621_vm5, %v607_v11  ;;  %995 = vmatmul.msk.f32.vlgmr.msra.gmra.mxu3 %vm621_vm5, %v607_v11  ;;  %v565_v13 = vsel %vm564_vm2, %v1297_v8, %v420_v7 }
  0x99   : > { %v582_v2 = vsel %vm581_vm3, %v565_v13, %v468_v55 }
  0x9c   : > { %v517_v14 = vpop.permute.xlu0 %516 }
  0x9d   : > { %v599_v16 = vsel %vm598_vm4, %v582_v2, %v517_v14  ;;  %v442_v8 = vpop.permute.xlu2 %441 }
  0x9e   : > { %970 = vmatmul.msk.f32.vlgmr.msra.gmra.mxu0 %vm621_vm5, %v599_v16  ;;  %987 = vmatmul.msk.f32.vlgmr.msra.gmra.mxu1 %vm621_vm5, %v599_v16  ;;  %v576_v44 = vsel %vm564_vm2, %v1282_v1, %v442_v8 }
  0x9f   : > { %v486_v18 = vpop.permute.xlu1 %485 }
  0xa0   : > { %v591_v19 = vsel %vm581_vm3, %v574_v17, %v486_v18 }
  0xa1   : > { %v608_v20 = vsel %vm598_vm4, %v591_v19, %v535_v59 }
  0xa2   : > { %979 = vmatmul.msk.f32.gmra.mxu2 %vm621_vm5, %v608_v20  ;;  %996 = vmatmul.msk.f32.gmra.mxu3 %vm621_vm5, %v608_v20 }
  0xa4   : > { %v422_v21 = vpop.permute.xlu0 %421 }
  0xa5   : > { %v566_v25 = vsel %vm564_vm2, %v1300_v9, %v422_v21  ;;  %v539_v28 = vpop.permute.xlu2 %538 }
  0xa7   : > { %v470_v22 = vpop.permute.xlu1 %469 }
  0xa8   : > { %v583_v26 = vsel %vm581_vm3, %v566_v25, %v470_v22 }
  0xac   : > { %v519_v27 = vpop.permute.xlu0 %518 }
  0xad   : > { %v600_v5 = vsel %vm598_vm4, %v583_v26, %v519_v27  ;;  %v444_v37 = vpop.permute.xlu2 %443 }
  0xae   : > { %971 = vmatmul.msk.f32.gmra.mxu0 %vm621_vm5, %v600_v5  ;;  %988 = vmatmul.msk.f32.gmra.mxu1 %vm621_vm5, %v600_v5  ;;  %v577_v54 = vsel %vm564_vm2, %v1337_v23, %v444_v37 }
  0xaf   : > { %v488_v32 = vpop.permute.xlu1 %487 }
  0xb0   : > { %v592_v33 = vsel %vm581_vm3, %v575_v31, %v488_v32 }
  0xb1   : > { %v609_v34 = vsel %vm598_vm4, %v592_v33, %v537_v12 }
  0xb2   : > { %980 = vmatmul.msk.f32.gmra.mxu2 %vm621_vm5, %v609_v34  ;;  %997 = vmatmul.msk.f32.gmra.mxu3 %vm621_vm5, %v609_v34 }
  0xb4   : > { %v424_v9 = vpop.permute.xlu0 %423 }
  0xb5   : > { %v567_v39 = vsel %vm564_vm2, %v1303_v10, %v424_v9  ;;  %v541_v47 = vpop.permute.xlu2 %540 }
  0xb7   : > { %v472_v38 = vpop.permute.xlu1 %471 }
  0xb8   : > { %v584_v40 = vsel %vm581_vm3, %v567_v39, %v472_v38 }
  0xbc   : > { %v521_v43 = vpop.permute.xlu0 %520 }
  0xbd   : > { %v601_v0 = vsel %vm598_vm4, %v584_v40, %v521_v43  ;;  %v446_v51 = vpop.permute.xlu2 %445 }
  0xbe   : > { %972 = vmatmul.msk.f32.gmra.mxu0 %vm621_vm5, %v601_v0  ;;  %989 = vmatmul.msk.f32.gmra.mxu1 %vm621_vm5, %v601_v0  ;;  %v578_v3 = vsel %vm564_vm2, %v1340_v24, %v446_v51 }
  0xbf   : > { %v490_v45 = vpop.permute.xlu1 %489 }
  0xc0   : > { %v593_v46 = vsel %vm581_vm3, %v576_v44, %v490_v45 }
  0xc1   : > { %v610_v48 = vsel %vm598_vm4, %v593_v46, %v539_v28 }
  0xc2   : > { %981 = vmatmul.msk.f32.gmra.mxu2 %vm621_vm5, %v610_v48  ;;  %998 = vmatmul.msk.f32.gmra.mxu3 %vm621_vm5, %v610_v48 }
  0xc4   : > { %v426_v10 = vpop.permute.xlu0 %425 }
  0xc5   : > { %v568_v50 = vsel %vm564_vm2, %v1315_v15, %v426_v10  ;;  %v543_v58 = vpop.permute.xlu2 %542 }
  0xc7   : > { %v474_v49 = vpop.permute.xlu1 %473 }
  0xc8   : > { %v585_v52 = vsel %vm581_vm3, %v568_v50, %v474_v49 }
  0xcc   : > { %v523_v53 = vpop.permute.xlu0 %522 }
  0xcd   : > { %v602_v1 = vsel %vm598_vm4, %v585_v52, %v523_v53  ;;  %v448_v63 = vpop.permute.xlu2 %447 }
  0xce   : > { %973 = vmatmul.msk.f32.gmra.mxu0 %vm621_vm5, %v602_v1  ;;  %990 = vmatmul.msk.f32.gmra.mxu1 %vm621_vm5, %v602_v1  ;;  %v579_v16 = vsel %vm564_vm2, %v1373_v35, %v448_v63 }
  0xcf   : > { %v492_v55 = vpop.permute.xlu1 %491 }
  0xd0   : > { %v594_v56 = vsel %vm581_vm3, %v577_v54, %v492_v55 }
  0xd1   : > { %v611_v57 = vsel %vm598_vm4, %v594_v56, %v541_v47 }
  0xd2   : > { %982 = vmatmul.msk.f32.gmra.mxu2 %vm621_vm5, %v611_v57  ;;  %999 = vmatmul.msk.f32.gmra.mxu3 %vm621_vm5, %v611_v57 }
  0xd4   : > { %v428_v15 = vpop.permute.xlu0 %427 }
  0xd5   : > { %v569_v60 = vsel %vm564_vm2, %v1358_v30, %v428_v15  ;;  %v545_v12 = vpop.permute.xlu2 %544 }
  0xd7   : > { %v476_v59 = vpop.permute.xlu1 %475 }
  0xd8   : > { %v586_v61 = vsel %vm581_vm3, %v569_v60, %v476_v59 }
  0xdc   : > { %v525_v62 = vpop.permute.xlu0 %524 }
  0xdd   : > { %v603_v23 = vsel %vm598_vm4, %v586_v61, %v525_v62 }
  0xde   : > { %974 = vmatmul.msk.f32.gmra.mxu0 %vm621_vm5, %v603_v23  ;;  %991 = vmatmul.msk.f32.gmra.mxu1 %vm621_vm5, %v603_v23 }
  0xdf   : > { %v494_v4 = vpop.permute.xlu1 %493 }
  0xe0   : > { %v595_v6 = vsel %vm581_vm3, %v578_v3, %v494_v4 }
  0xe1   : > { %v612_v7 = vsel %vm598_vm4, %v595_v6, %v543_v58 }
  0xe2   : > { %983 = vmatmul.msk.f32.gmra.mxu2 %vm621_vm5, %v612_v7  ;;  %1000 = vmatmul.msk.f32.gmra.mxu3 %vm621_vm5, %v612_v7 }
  0xe4   : > { %v430_v30 = vpop.permute.xlu0 %429 }
  0xe5   : > { %v570_v13 = vsel %vm564_vm2, %v1354_v29, %v430_v30  ;;  %v450_v29 = vpop.permute.xlu2 %449 }
  0xe6   : > { %v580_v27 = vsel %vm564_vm2, %v1376_v36, %v450_v29  ;;  %v1539_v36 = vld [vmem:[#allocation6] ss:$0 sm:$0xff] }
  0xe7   : > { %v478_v11 = vpop.permute.xlu1 %477 }
  0xe8   : > { %v587_v14 = vsel %vm581_vm3, %v570_v13, %v478_v11 }
  0xec   : > { %v527_v2 = vpop.permute.xlu0 %526 }
  0xed   : > { %v604_v24 = vsel %vm598_vm4, %v587_v14, %v527_v2  ;;  %v547_v26 = vpop.permute.xlu2 %546 }
  0xee   : > { %975 = vmatmul.msk.f32.gmra.mxu0 %vm621_vm5, %v604_v24  ;;  %992 = vmatmul.msk.f32.gmra.mxu1 %vm621_vm5, %v604_v24 }
  0xef   : > { %v496_v17 = vpop.permute.xlu1 %495 }
  0xf0   : > { %v596_v18 = vsel %vm581_vm3, %v579_v16, %v496_v17 }
  0xf1   : > { %v613_v19 = vsel %vm598_vm4, %v596_v18, %v545_v12 }
  0xf2   : > { %984 = vmatmul.msk.f32.gmra.mxu2 %vm621_vm5, %v613_v19  ;;  %1001 = vmatmul.msk.f32.gmra.mxu3 %vm621_vm5, %v613_v19 }
  0xf4   : > { %v432_v20 = vpop.permute.xlu0 %431 }
  0xf5   : > { %v571_v21 = vsel %vm564_vm2, %v1399_v42, %v432_v20  ;;  %v531_v33 = vpop.permute.xlu2 %530 }
  0xf7   : > { %v480_v8 = vpop.permute.xlu1 %479 }
  0xf8   : > { %v588_v22 = vsel %vm581_vm3, %v571_v21, %v480_v8 }
  0xfc   : > { %v529_v25 = vpop.permute.xlu0 %528 }
  0xfd   : > { %v605_v35 = vsel %vm598_vm4, %v588_v22, %v529_v25 }
  0xfe   : > { %976 = vmatmul.msk.f32.gmra.mxu0 %vm621_vm5, %v605_v35  ;;  %993 = vmatmul.msk.f32.gmra.mxu1 %vm621_vm5, %v605_v35 }
  0xff   : > { %v498_v28 = vpop.permute.xlu1 %497 }
 0x100   : > { %v597_v5 = vsel %vm581_vm3, %v580_v27, %v498_v28 }
 0x101   : > { %v614_v31 = vsel %vm598_vm4, %v597_v5, %v547_v26 }
 0x102   : > { %985 = vmatmul.msk.f32.gmra.mxu2 %vm621_vm5, %v614_v31  ;;  %1002 = vmatmul.msk.f32.gmra.mxu3 %vm621_vm5, %v614_v31 }
 0x104   : > { %v434_v42 = vpop.permute.xlu0 %433 }
 0x105   : > { %v572_v32 = vsel %vm564_vm2, %v1391_v41, %v434_v42 }
 0x107   : > { %v482_v34 = vpop.permute.xlu1 %481 }
 0x108   : > { %v589_v9 = vsel %vm581_vm3, %v572_v32, %v482_v34 }
 0x109   : > { %v606_v37 = vsel %vm598_vm4, %v589_v9, %v531_v33 }
 0x10a   : > { %977 = vmatmul.msk.f32.gmra.mxu0 %vm621_vm5, %v606_v37  ;;  %994 = vmatmul.msk.f32.gmra.mxu1 %vm621_vm5, %v606_v37 }
 0x11b   : > { %v691_v41 = vpop.f32.mrf.mxu0  ;;  %v715_v38 = vpop.f32.mrf.mxu2 }
 0x11c   : > { %v692_v39 = vadd.f32 %v1539_v36, %v691_v41  ;;  %v716_v40 = vadd.f32 %v1539_v36, %v715_v38  ;;  %v761_v43 = vpop.f32.mrf.mxu1  ;;  %v785_v0 = vpop.f32.mrf.mxu3 }
 0x11d   : > { %v762_v44 = vadd.f32 %v1539_v36, %v761_v43  ;;  %v786_v45 = vadd.f32 %v1539_v36, %v785_v0 }
 0x11e   : > { %810 = vst.msk [vmem:[%s1544_s8] sm:$0xff] %vm809_vm6, %v692_v39 }
 0x11f   : > { %818 = vst.msk [vmem:[%s1544_s8 + $0x80] sm:$0xff] %vm809_vm6, %v716_v40 }
 0x120   : > { %1003 = vst.msk [vmem:[%s1544_s8 + $0x10] sm:$0xff] %vm809_vm6, %v762_v44 }
 0x121   : > { %1011 = vst.msk [vmem:[%s1544_s8 + $0x90] sm:$0xff] %vm809_vm6, %v786_v45 }
 0x125   : > { %v718_v46 = vpop.f32.mrf.mxu2  ;;  %v788_v47 = vpop.f32.mrf.mxu3 }
 0x126   : > { %v719_v48 = vadd.f32 %v1539_v36, %v718_v46  ;;  %v789_v10 = vadd.f32 %v1539_v36, %v788_v47 }
 0x128   : > { %819 = vst.msk [vmem:[%s1544_s8 + $0x88] sm:$0xff] %vm809_vm6, %v719_v48 }
 0x129   : > { %1012 = vst.msk [vmem:[%s1544_s8 + $0x98] sm:$0xff] %vm809_vm6, %v789_v10 }
 0x12b   : > { %v694_v49 = vpop.f32.mrf.mxu0  ;;  %v764_v50 = vpop.f32.mrf.mxu1 }
 0x12c   : > { %v695_v51 = vadd.f32 %v1539_v36, %v694_v49  ;;  %v765_v52 = vadd.f32 %v1539_v36, %v764_v50 }
 0x12e   : > { %811 = vst.msk [vmem:[%s1544_s8 + $0x8] sm:$0xff] %vm809_vm6, %v695_v51 }
 0x12f   : > { %1004 = vst.msk [vmem:[%s1544_s8 + $0x18] sm:$0xff] %vm809_vm6, %v765_v52 }
 0x135   : > { %v721_v53 = vpop.f32.mrf.mxu2  ;;  %v791_v1 = vpop.f32.mrf.mxu3 }
 0x136   : > { %v722_v54 = vadd.f32 %v1539_v36, %v721_v53  ;;  %v792_v55 = vadd.f32 %v1539_v36, %v791_v1 }
 0x138   : > { %820 = vst.msk [vmem:[%s1544_s8 + $0xa0] sm:$0xff] %vm809_vm6, %v722_v54 }
 0x139   : > { %1013 = vst.msk [vmem:[%s1544_s8 + $0xb0] sm:$0xff] %vm809_vm6, %v792_v55 }
 0x13b   : > { %v697_v56 = vpop.f32.mrf.mxu0  ;;  %v767_v57 = vpop.f32.mrf.mxu1 }
 0x13c   : > { %v698_v15 = vadd.f32 %v1539_v36, %v697_v56  ;;  %v768_v58 = vadd.f32 %v1539_v36, %v767_v57 }
 0x13e   : > { %812 = vst.msk [vmem:[%s1544_s8 + $0x20] sm:$0xff] %vm809_vm6, %v698_v15 }
 0x13f   : > { %1005 = vst.msk [vmem:[%s1544_s8 + $0x30] sm:$0xff] %vm809_vm6, %v768_v58 }
 0x145   : > { %v724_v59 = vpop.f32.mrf.mxu2  ;;  %v794_v60 = vpop.f32.mrf.mxu3 }
 0x146   : > { %v725_v61 = vadd.f32 %v1539_v36, %v724_v59  ;;  %v795_v62 = vadd.f32 %v1539_v36, %v794_v60 }
 0x148   : > { %821 = vst.msk [vmem:[%s1544_s8 + $0xa8] sm:$0xff] %vm809_vm6, %v725_v61 }
 0x149   : > { %1014 = vst.msk [vmem:[%s1544_s8 + $0xb8] sm:$0xff] %vm809_vm6, %v795_v62 }
 0x14b   : > { %v700_v23 = vpop.f32.mrf.mxu0  ;;  %v770_v63 = vpop.f32.mrf.mxu1 }
 0x14c   : > { %v701_v3 = vadd.f32 %v1539_v36, %v700_v23  ;;  %v771_v4 = vadd.f32 %v1539_v36, %v770_v63 }
 0x14e   : > { %813 = vst.msk [vmem:[%s1544_s8 + $0x28] sm:$0xff] %vm809_vm6, %v701_v3 }
 0x14f   : > { %1006 = vst.msk [vmem:[%s1544_s8 + $0x38] sm:$0xff] %vm809_vm6, %v771_v4 }
 0x155   : > { %v727_v6 = vpop.f32.mrf.mxu2  ;;  %v797_v7 = vpop.f32.mrf.mxu3 }
 0x156   : > { %v728_v30 = vadd.f32 %v1539_v36, %v727_v6  ;;  %v798_v11 = vadd.f32 %v1539_v36, %v797_v7 }
 0x158   : > { %822 = vst.msk [vmem:[%s1544_s8 + $0xc0] sm:$0xff] %vm809_vm6, %v728_v30 }
 0x159   : > { %1015 = vst.msk [vmem:[%s1544_s8 + $0xd0] sm:$0xff] %vm809_vm6, %v798_v11 }
 0x15b   : > { %v703_v12 = vpop.f32.mrf.mxu0  ;;  %v773_v13 = vpop.f32.mrf.mxu1 }
 0x15c   : > { %v704_v14 = vadd.f32 %v1539_v36, %v703_v12  ;;  %v774_v2 = vadd.f32 %v1539_v36, %v773_v13 }
 0x15e   : > { %814 = vst.msk [vmem:[%s1544_s8 + $0x40] sm:$0xff] %vm809_vm6, %v704_v14 }
 0x15f   : > { %1007 = vst.msk [vmem:[%s1544_s8 + $0x50] sm:$0xff] %vm809_vm6, %v774_v2 }
 0x165   : > { %v730_v24 = vpop.f32.mrf.mxu2  ;;  %v800_v16 = vpop.f32.mrf.mxu3 }
 0x166   : > { %v731_v17 = vadd.f32 %v1539_v36, %v730_v24  ;;  %v801_v18 = vadd.f32 %v1539_v36, %v800_v16 }
 0x168   : > { %823 = vst.msk [vmem:[%s1544_s8 + $0xc8] sm:$0xff] %vm809_vm6, %v731_v17 }
 0x169   : > { %1016 = vst.msk [vmem:[%s1544_s8 + $0xd8] sm:$0xff] %vm809_vm6, %v801_v18 }
 0x16b   : > { %v706_v19 = vpop.f32.mrf.mxu0  ;;  %v776_v29 = vpop.f32.mrf.mxu1 }
 0x16c   : > { %v707_v20 = vadd.f32 %v1539_v36, %v706_v19  ;;  %v777_v8 = vadd.f32 %v1539_v36, %v776_v29 }
 0x16e   : > { %815 = vst.msk [vmem:[%s1544_s8 + $0x48] sm:$0xff] %vm809_vm6, %v707_v20 }
 0x16f   : > { %1008 = vst.msk [vmem:[%s1544_s8 + $0x58] sm:$0xff] %vm809_vm6, %v777_v8 }
 0x175   : > { %v733_v21 = vpop.f32.mrf.mxu2  ;;  %v803_v22 = vpop.f32.mrf.mxu3 }
 0x176   : > { %v734_v25 = vadd.f32 %v1539_v36, %v733_v21  ;;  %v804_v26 = vadd.f32 %v1539_v36, %v803_v22 }
 0x178   : > { %824 = vst.msk [vmem:[%s1544_s8 + $0xe0] sm:$0xff] %vm809_vm6, %v734_v25 }
 0x179   : > { %1017 = vst.msk [vmem:[%s1544_s8 + $0xf0] sm:$0xff] %vm809_vm6, %v804_v26 }
 0x17b   : > { %v709_v35 = vpop.f32.mrf.mxu0  ;;  %v779_v27 = vpop.f32.mrf.mxu1 }
 0x17c   : > { %v710_v28 = vadd.f32 %v1539_v36, %v709_v35  ;;  %v780_v5 = vadd.f32 %v1539_v36, %v779_v27 }
 0x17e   : > { %816 = vst.msk [vmem:[%s1544_s8 + $0x60] sm:$0xff] %vm809_vm6, %v710_v28 }
 0x17f   : > { %1009 = vst.msk [vmem:[%s1544_s8 + $0x70] sm:$0xff] %vm809_vm6, %v780_v5 }
 0x185   : > { %v736_v31 = vpop.f32.mrf.mxu2  ;;  %v806_v42 = vpop.f32.mrf.mxu3 }
 0x186   : > { %v737_v32 = vadd.f32 %v1539_v36, %v736_v31  ;;  %v807_v33 = vadd.f32 %v1539_v36, %v806_v42 }
 0x187   : > { %v712_v34 = vpop.f32.mrf.mxu0  ;;  %v782_v9 = vpop.f32.mrf.mxu1 }
 0x188   : > { %825 = vst.msk [vmem:[%s1544_s8 + $0xe8] sm:$0xff] %vm809_vm6, %v737_v32  ;;  %v713_v37 = vadd.f32 %v1539_v36, %v712_v34  ;;  %v783_v41 = vadd.f32 %v1539_v36, %v782_v9 }
 0x189   : > { %1018 = vst.msk [vmem:[%s1544_s8 + $0xf8] sm:$0xff] %vm809_vm6, %v807_v33 }
 0x18a   : > { %817 = vst.msk [vmem:[%s1544_s8 + $0x68] sm:$0xff] %vm809_vm6, %v713_v37 }
 0x18b   : > { %1010 = vst.msk [vmem:[%s1544_s8 + $0x78] sm:$0xff] %vm809_vm6, %v783_v41 }
 0x18c PF: > { %s17_s18 = sadd.s32 1, %s1183_s18  }
 0x18d   : > { %p14_p8 = scmp.ge.s32.totalorder %s17_s18, 4  }
 0x18f   :  { %16 = sbr.rel (!%p14_p8) target bundleno = 2 (0x2), region = 87 }
 0x194   :  { %867 = vsyncpa [#allocation3], 1 }
 0x195   :  { %869 = vsyncpa [#allocation3 + $0x1], 1 }
 0x196   :  { %870 = vsyncpa [#allocation5], 1 }

// kernel: model_forward.3
= control target key start
LH: loop header
LB: loop body
LE: loop exit
PB: predicated region body
PF: predicated region fallthrough
CT: control target
= control target key end

     0   :  { %10 = vsyncpa [#allocation4], 0  ;;  %s6965_s0 = inlined_call_operand.vmem [shape: f32[32,32,32], index: 0, kind: input, shape index: {}, may-alias: {0,1}]   ;;  %s6966_s1 = inlined_call_operand.vmem [shape: f32[32,32,32], index: 1, kind: input, shape index: {}, may-alias: {0,1}]   ;;  %s6967_s2 = inlined_call_operand.hbm [shape: f32[128,256], index: 2, kind: input, shape index: {}]   ;;  %s6968_s3 = inlined_call_operand.hbm [shape: f32[1,256], index: 3, kind: input, shape index: {}]   ;;  %s6969_s4 = inlined_call_operand.hbm [shape: f32[3,32,32,256], index: 4, kind: input, shape index: {}]   ;;  %s6970_s5 = inlined_call_operand.vmem [shape: f32[2,3,1], index: 5, kind: output, shape index: {}]  }
   0x1   :  { %11 = vsyncpa [#allocation6], 0  ;;  %s4355_s18 = smov 0   ;;  %s4357_s19 = smov 0  }
   0x2   :  { %s4359_s20 = smov 0   ;;  %s4361_s21 = smov 0  }
   0x3   :  { %s4363_s22 = smov 0   ;;  %s4365_s23 = smov 0  }
   0x4 LB: > { %s3277_s24 = sadd.s32 4294967295, %s4309_s23   ;;  %s29_s25 = sadd.s32 1, %s4305_s22  ;;  %s4309_s23 = sphi %s4365_s23, %s17_s23   ;;  %s4305_s22 = sphi %s4363_s22, %s7234_s22   ;;  %s4301_s21 = sphi %s4361_s21, %s7233_s21   ;;  %s4297_s20 = sphi %s4359_s20, %s7232_s20   ;;  %s4293_s19 = sphi %s4357_s19, %s7231_s19   ;;  %s4289_s18 = sphi %s4355_s18, %s7230_s18  }
   0x5   : > { %p31_p0 = scmp.ge.s32.totalorder %s29_s25, 2  ;;  %s144_s26 = sadd.s32 1, %s4297_s20 }
   0x6   : > { %p151_p1 = scmp.ne.s32.totalorder %s4297_s20, %s4293_s19  ;;  %p152_p2 = scmp.eq.s32.totalorder %s4309_s23, 0 }
   0x7   : > { %s7236_s25 = smov (%p31_p0, %s29_s25), 0  ;;  %p157_p4 = scmp.ne.s32.totalorder %s4293_s19, %s4289_s18 }
   0x8   : > { %p4391_p3 = por %p152_p2, %p151_p1  ;;  %s141_s28 = ssub.s32 %s4305_s22, %s7236_s25 }
   0x9   : > { %p4400_p5 = scmp.eq.s32.totalorder %s3277_s24, 0  ;;  %p142_p6 = scmp.eq.s32.totalorder %s141_s28, 0 }
   0xa   : > { %p3281_p7 = scmp.ge.s32.totalorder %s4309_s23, 1  ;;  %p194_p9 = scmp.lt.s32.totalorder %s4309_s23, 3 }
   0xb   : > { %p4407_p8 = por %p4400_p5, %p157_p4  ;;  %s205_s10 = sshll.u32 %s6967_s2, 4  ;;  %s206_s10 = int_to_ptr.hbm [resolvable:$true] %s205_s10 }
   0xc   : > { %s4413_s6 = scalar_select %p142_p6, %s4297_s20, %s144_s26  }
   0xd   : > { %p4415_p10 = pnand %p3281_p7, %p194_p9  ;;  %s4311_s11 = smov [#allocation3]  }
   0xe   : > { %s207_s12 = sshll.u32 %s4311_s11, 4  ;;  %s220_s15 = sshll.u32 %s6968_s3, 4  ;;  %s208_s12 = int_to_ptr.vmem [resolvable:$true] %s207_s12  ;;  %s221_s15 = int_to_ptr.hbm [resolvable:$true] %s220_s15 }
   0xf   : > { %p3622_p11 = pneg %p4415_p10  ;;  %s4312_s16 = smov 256  }
  0x10   : > { %s4313_s17 = smov 16   ;;  %s4314_s18 = smov [#allocation5]  }
  0x11   : > { %p3623_p12 = pnand %p3622_p11, %p4400_p5  ;;  %s222_s26 = sshll.u32 %s4314_s18, 4  ;;  %s223_s26 = int_to_ptr.vmem [resolvable:$true] %s222_s26 }
  0x12   : > { %p3284_p13 = scmp.ge.s32.totalorder %s4309_s23, 2 }
  0x13   : > { %3625 = dma.hbm_to_vmem [thread:$0]  (!%p3623_p12), %s206_s10, 4096, %s208_s12, [#allocation4], %s4312_s16, %s4312_s16, %s4313_s17  }
  0x14   : > { %3628 = dma.hbm_to_vmem [thread:$0]  (!%p3623_p12), %s221_s15, 32, %s223_s26, [#allocation6]  }
  0x15   : > { %229 = sbr.rel (%p3284_p13) target bundleno = 40 (0x28), region = 24 }
  0x1a   : > { %s263_s28 = sand.u32 1, %s4309_s23   ;;  %s265_s8 = sand.u32 1, %s4297_s20  }
  0x1b   : > { %s3603_s9 = smul.u32 3072, %s265_s8  ;;  %s3566_s11 = sshll.u32 %s4305_s22, 10 }
  0x1c   : > { %s274_s13 = scalar_lea.hbm %s6969_s4, %s3566_s11  ;;  %s4315_s26 = smov 32768  }
  0x1d   : > { %s3609_s14 = scalar_select %p4391_p3, [#allocation0], [#allocation10] }
  0x1e   : > { %s287_s15 = sshll.u32 %s274_s13, 4  ;;  %s267_s16 = scalar_lea.vmem [#allocation7], %s3603_s9  ;;  %s288_s15 = int_to_ptr.hbm [resolvable:$true] %s287_s15 }
  0x1f   : > { %s289_s17 = sshll.u32 %s267_s16, 4  ;;  %s279_s18 = sld [smem:[%s3609_s14]]   ;;  %s290_s17 = int_to_ptr.vmem [resolvable:$true] %s289_s17 }
  0x20   : > { %3610 = sst [smem:[#allocation9]] (%p4391_p3), %s4315_s26  ;;  %s4316_s8 = smov 16384  }
  0x21   : > { %3611 = sst [smem:[#allocation9 + $0x1]] (%p4391_p3), %s4316_s8  ;;  %s4317_s10 = smov 64  }
  0x22   : > { %3612 = sst [smem:[#allocation9 + $0x2]] (%p4391_p3), %s4317_s10  ;;  %s4318_s11 = smov 256  }
  0x23   : > { %3613 = sst [smem:[#allocation9 + $0x3]] (%p4391_p3), %s4318_s11  ;;  %s4319_s13 = smov 16  }
  0x24   : > { %3614 = sst [smem:[#allocation9 + $0x4]] (%p4391_p3), %s4318_s11  ;;  %s264_s14 = scalar_lea.sflag [#allocation4], %s263_s28 }
  0x25   : > { %s3288_s12 = sshll.u32 %s279_s18, 26  ;;  %3615 = sst [smem:[#allocation9 + $0x5]] (%p4391_p3), %s4319_s13 }
  0x26   : > { %s3289_s9 = sadd.s32 134217728, %s3288_s12  ;;  %s4320_s16 = smov [#allocation8]  }
  0x27   : > { %3616 = dma.general (%p4391_p3), %s288_s15, 49152, %s290_s17, %s264_s14, %s4320_s16, [#allocation9], %s3289_s9, 0  }
  0x28 PF: > { %314 = sbr.rel (%p4415_p10) target bundleno = 850 (0x352), region = 40 }
  0x2d   : > { %4276 = dma.done.wait (%p4400_p5), [#allocation4], 4096  }
  0x2e   : > { %4278 = vsyncadd (%p4400_p5), [#allocation4], 4294963200 }
  0x2f   : > { %4280 = dma.done.wait (%p4400_p5), [#allocation6], 32  }
  0x30   : > { %4282 = vsyncadd (%p4400_p5), [#allocation6], 4294967264  ;;  %s326_s27 = sand.u32 1, %s3277_s24   ;;  %s328_s28 = sand.u32 1, %s4293_s19  }
  0x31   : > { %s3604_s7 = smul.u32 3072, %s328_s28  ;;  %s327_s15 = scalar_lea.sflag [#allocation4], %s326_s27 }
  0x33   : > { %s4465_s17 = scalar_lea.vmem [#allocation7], %s3604_s7 }
  0x34   : > { %4284 = dma.done.wait (%p4407_p8), %s327_s15, 49152  }
  0x35   : > { %4286 = vsyncadd (%p4407_p8), %s327_s15, 4294918144  ;;  %s4472_s18 = sshll.u32 %s4301_s21, 4  ;;  %vm541_vm0 = vcmask 1046528   ;;  %s4321_s30 = smov 64   ;;  %vm1292_vm1 = vcmask 261120   ;;  %vm1357_vm2 = vcmask 523264  }
  0x36   : > { %p376_p0 = scmp.lt.s32.totalorder %s4472_s18, 31  ;;  %s4322_s11 = smov 32   ;;  %vm1422_vm3 = vcmask 785408   ;;  %vm3128_vm4 = vcmask 1040384   ;;  %vm3131_vm5 = vcmask 1041408   ;;  %vm3137_vm6 = vcmask 1043456  }
  0x37   : > { %s4323_s12 = smov 96   ;;  %s3569_s9 = sadd.s32 16, %s4472_s18  ;;  %vm3152_vm7 = vcmask 1042432   ;;  %vm3158_vm8 = vcmask 2048  }
  0x38   : > { %s377_s29 = scalar_select %p376_p0, %s4472_s18, 31 }
  0x39   : > { %p5185_p1 = scmp.lt.s32.totalorder %s3569_s9, 31  ;;  %p400_p2 = scmp.lt.s32.totalorder %s4301_s21, 1 }
  0x3a   : > { %s3567_s26 = sshll.u32 %s377_s29, 5 }
  0x3b   : > { %s4479_s10 = scalar_lea.vmem %s6965_s0, %s3567_s26  ;;  %s7238_s9 = smov (!%p5185_p1, %s3569_s9), 31 }
  0x3c   : > { %v4482_v0 = vld [vmem:[%s4479_s10 + $0x20] sm:$0xff]  ;;  %v4485_v1 = vld [vmem:[%s4479_s10 + $0x28] sm:$0xff]  ;;  %v4488_v2 = vld [vmem:[%s4479_s10 + $0x30] sm:$0xff]  ;;  %s7240_s9 = smov (!%p5185_p1, %s7238_s9), 31  ;;  %s7242_s21 = smov (!%p400_p2, %s4301_s21), 1 }
  0x3d   : > { %v549_v3 = vrot.slane %v4482_v0, 1  ;;  %v550_v4 = vrot.slane %v4485_v1, 1  ;;  %v552_v5 = vrot.slane %v4488_v2, 1  ;;  %v4494_v6 = vld [vmem:[%s4479_s10] sm:$0xff]  ;;  %v4497_v7 = vld [vmem:[%s4479_s10 + $0x8] sm:$0xff]  ;;  %v4500_v8 = vld [vmem:[%s4479_s10 + $0x10] sm:$0xff]  ;;  %v3695_v9 = vpack.i.bf16 %v4485_v1, %v4482_v0 }
  0x3e   : > { %v542_v10 = vrot.slane %v4494_v6, 1  ;;  %v543_v11 = vrot.slane %v4497_v7, 1  ;;  %v545_v12 = vrot.slane %v4500_v8, 1  ;;  %v4508_v13 = vld [vmem:[%s4479_s10 + $0x38] sm:$0xff]  ;;  %v417_v18 = vld [vmem:[%s4479_s10 + $0x40] sm:$0xff]  ;;  %v418_v19 = vld [vmem:[%s4479_s10 + $0x48] sm:$0xff] }
  0x3f   : > { %v4511_v14 = vld [vmem:[%s4479_s10 + $0x18] sm:$0xff]  ;;  %v551_v15 = vsel %vm541_vm0, %v549_v3, %v550_v4  ;;  %v553_v16 = vsel %vm541_vm0, %v550_v4, %v552_v5  ;;  %3696 = vrot.lane.b32.xlu2 %v3695_v9, %s4321_s30  ;;  %v554_v17 = vrot.slane %v4508_v13, 1  ;;  %v419_v24 = vld [vmem:[%s4479_s10 + $0x50] sm:$0xff]  ;;  %v556_v26 = vrot.slane %v417_v18, 1  ;;  %v421_v44 = vld [vmem:[%s4479_s10 + $0x60] sm:$0xff]  ;;  %s3570_s14 = sshll.u32 %s7240_s9, 5 }
  0x40   : > { %v3710_v20 = vpack.i.bf16 %v553_v16, %v551_v15  ;;  %v544_v21 = vsel %vm541_vm0, %v542_v10, %v543_v11  ;;  %v546_v22 = vsel %vm541_vm0, %v543_v11, %v545_v12  ;;  %v547_v23 = vrot.slane %v4511_v14, 1  ;;  %v420_v34 = vld [vmem:[%s4479_s10 + $0x58] sm:$0xff]  ;;  %v422_v45 = vld [vmem:[%s4479_s10 + $0x68] sm:$0xff]  ;;  %v4545_v46 = vld [vmem:[%s4479_s10 + $0x70] sm:$0xff]  ;;  %s5261_s28 = scalar_lea.vmem %s6966_s1, %s3570_s14  ;;  %s3302_s7 = sshll.u32 %s7242_s21, 2 }
  0x41   : > { %v3700_v25 = vpack.i.bf16 %v546_v22, %v544_v21  ;;  %v557_v27 = vrot.slane %v418_v19, 1  ;;  %v555_v28 = vsel %vm541_vm0, %v552_v5, %v554_v17  ;;  %v671_v29 = vsel %vm541_vm0, %v554_v17, 0.0  ;;  %v4551_v51 = vld [vmem:[%s4479_s10 + $0x128] sm:$0xff]  ;;  %v4557_v54 = vld [vmem:[%s4479_s10 + $0x120] sm:$0xff]  ;;  %v4567_v58 = vld [vmem:[%s4479_s10 + $0x110] sm:$0xff]  ;;  %s403_s18 = scalar_lea.vmem %s6970_s5, %s3302_s7 }
  0x42   : > { %3711 = vrot.lane.b32.xlu1 %v3710_v20, %s4322_s11  ;;  %v559_v30 = vrot.slane %v419_v24, 1  ;;  %v548_v31 = vsel %vm541_vm0, %v545_v12, %v547_v23  ;;  %v670_v32 = vsel %vm541_vm0, %v547_v23, 0.0  ;;  %v3715_v36 = vpack.i.bf16 %v671_v29, %v555_v28  ;;  %v4561_v56 = vld [vmem:[%s4479_s10 + $0x100] sm:$0xff]  ;;  %v4564_v57 = vld [vmem:[%s4479_s10 + $0x108] sm:$0xff]  ;;  %v4579_v5 = vld [vmem:[%s4479_s10 + $0x118] sm:$0xff] }
  0x43   : > { %3701 = vrot.lane.b32.xlu0 %v3700_v25, %s4322_s11  ;;  %v558_v33 = vsel %vm541_vm0, %v556_v26, %v557_v27  ;;  %v3705_v38 = vpack.i.bf16 %v670_v32, %v548_v31  ;;  %v561_v39 = vrot.slane %v420_v34, 1  ;;  %v3735_v42 = vpack.i.bf16 %v4508_v13, %v4488_v2  ;;  %v4590_v12 = vld [vmem:[%s4479_s10 + $0x130] sm:$0xff]  ;;  %v424_v23 = vld [vmem:[%s4479_s10 + $0x78] sm:$0xff] }
  0x44   : > { %v560_v35 = vsel %vm541_vm0, %v557_v27, %v559_v30  ;;  %v3745_v47 = vpack.i.bf16 %v418_v19, %v417_v18  ;;  %v563_v48 = vrot.slane %v421_v44, 1  ;;  %v564_v49 = vrot.slane %v422_v45, 1 }
  0x45   : > { %v3720_v37 = vpack.i.bf16 %v560_v35, %v558_v33  ;;  %v562_v40 = vsel %vm541_vm0, %v559_v30, %v561_v39  ;;  %v672_v41 = vsel %vm541_vm0, %v561_v39, 0.0  ;;  %v566_v50 = vrot.slane %v4545_v46, 1  ;;  %v4630_v35 = vld [vmem:[%s4479_s10 + $0x150] sm:$0xff]  ;;  %v425_v39 = vld [vmem:[%s4479_s10 + $0x80] sm:$0xff] }
  0x46   : > { %v3730_v43 = vpack.i.bf16 %v672_v41, %v562_v40  ;;  %v565_v52 = vsel %vm541_vm0, %v563_v48, %v564_v49  ;;  %v605_v55 = vrot.slane %v4557_v54, 1  ;;  %v606_v59 = vrot.slane %v4551_v51, 1  ;;  %v4637_v40 = vld [vmem:[%s4479_s10 + $0x140] sm:$0xff]  ;;  %v1516_v41 = vld [vmem:[#allocation3 + $0xe8] sm:$0xff] }
  0x47   : > { %3721 = vrot.lane.b32.xlu2 %v3720_v37, %s4322_s11  ;;  %v567_v53 = vsel %vm541_vm0, %v564_v49, %v566_v50  ;;  %v3760_v60 = vpack.i.bf16 %v420_v34, %v419_v24  ;;  %v598_v62 = vrot.slane %v4561_v56, 1  ;;  %v599_v63 = vrot.slane %v4564_v57, 1  ;;  %v4611_v24 = vld [vmem:[%s4479_s10 + $0x138] sm:$0xff]  ;;  %v4627_v34 = vld [vmem:[%s4479_s10 + $0x90] sm:$0xff] }
  0x48   : > { %v3755_v61 = vpack.i.bf16 %v567_v53, %v565_v52  ;;  %v601_v3 = vrot.slane %v4567_v58, 1  ;;  %v4575_v4 = vsel %vm541_vm0, %v605_v55, %v606_v59  ;;  %v603_v15 = vrot.slane %v4579_v5, 1 }
  0x49   : > { %v4583_v9 = vsel %vm541_vm0, %v598_v62, %v599_v63  ;;  %v3780_v11 = vpack.i.bf16 %v565_v52, %v4575_v4  ;;  %v3775_v16 = vpack.i.bf16 %v421_v44, %v4557_v54  ;;  %v608_v18 = vrot.slane %v4590_v12, 1  ;;  %v426_v44 = vld [vmem:[%s4479_s10 + $0x88] sm:$0xff]  ;;  %v1513_v62 = vld [vmem:[#allocation3 + $0xd0] sm:$0xff] }
  0x4a   : > { %3716 = vrot.lane.b32.xlu1 %v3715_v36, %s4322_s11  ;;  %v4586_v10 = vsel %vm541_vm0, %v599_v63, %v601_v3  ;;  %v4599_v19 = vsel %vm541_vm0, %v601_v3, %v603_v15  ;;  %v3785_v26 = vpack.i.bf16 %v422_v45, %v4551_v51  ;;  %v568_v27 = vrot.slane %v424_v23, 1  ;;  %v450_v45 = vld [vmem:[%s4479_s10 + $0x148] sm:$0xff]  ;;  %v1511_v3 = vld [vmem:[#allocation3 + $0xc0] sm:$0xff] }
  0x4b   : > { %3706 = vrot.lane.b32.xlu0 %v3705_v38, %s4322_s11  ;;  %v3770_v17 = vpack.i.bf16 %v4586_v10, %v4583_v9  ;;  %v609_v21 = vsel %vm541_vm0, %v606_v59, %v608_v18  ;;  %v610_v28 = vrot.slane %v4611_v24, 1  ;;  %v3810_v31 = vpack.i.bf16 %v424_v23, %v4611_v24  ;;  %v1515_v38 = vld [vmem:[#allocation3 + $0xe0] sm:$0xff]  ;;  %v1514_v63 = vld [vmem:[#allocation3 + $0xd8] sm:$0xff] }
  0x4c   : > { %v3790_v25 = vpack.i.bf16 %v567_v53, %v609_v21  ;;  %v569_v29 = vsel %vm541_vm0, %v566_v50, %v568_v27  ;;  %v3800_v33 = vpack.i.bf16 %v4545_v46, %v4590_v12  ;;  %v3825_v46 = vpack.i.bf16 %v425_v39, %v4637_v40  ;;  %v1507_v23 = vld [vmem:[#allocation3 + $0xa0] sm:$0xff] }
  0x4d   : > { %v611_v30 = vsel %vm541_vm0, %v608_v18, %v610_v28  ;;  %v615_v48 = vrot.slane %v4630_v35, 1  ;;  %v3820_v49 = vpack.i.bf16 %v609_v21, %v4575_v4  ;;  %v613_v52 = vrot.slane %v450_v45, 1  ;;  %v1510_v21 = vld [vmem:[#allocation3 + $0xb8] sm:$0xff] }
  0x4e   : > { %v4621_v32 = vpack.i.bf16 %v569_v29, %v611_v30  ;;  %v571_v53 = vrot.slane %v426_v44, 1  ;;  %v570_v55 = vrot.slane %v425_v39, 1  ;;  %v612_v59 = vrot.slane %v4637_v40, 1  ;;  %v1503_v29 = vld [vmem:[#allocation3 + $0x80] sm:$0xff]  ;;  %v1504_v30 = vld [vmem:[#allocation3 + $0x88] sm:$0xff] }
  0x4f   : > { %3736 = vrot.lane.b32.xlu2 %v3735_v42, %s4321_s30  ;;  %v673_v42 = vsel %vm541_vm0, %v568_v27, 0.0  ;;  %v3835_v18 = vpack.i.bf16 %v426_v44, %v450_v45  ;;  %v1505_v27 = vld [vmem:[#allocation3 + $0x90] sm:$0xff]  ;;  %v1500_v39 = vld [vmem:[#allocation3 + $0x68] sm:$0xff] }
  0x50   : > { %v572_v4 = vsel %vm541_vm0, %v570_v55, %v571_v53  ;;  %v1496_v44 = vld [vmem:[#allocation3 + $0x48] sm:$0xff]  ;;  %v1493_v45 = vld [vmem:[#allocation3 + $0x30] sm:$0xff] }
  0x52   : > { %3731 = vrot.lane.b32.xlu1 %v3730_v43, %s4322_s11 }
  0x53   : > { %3726 = vrot.lane.b32.xlu0 %v3710_v20, %s4323_s12  ;;  %v4602_v20 = vsel %vm541_vm0, %v603_v15, 0.0 }
  0x54   : > { %v3795_v22 = vpack.i.bf16 %v4602_v20, %v4599_v19 }
  0x57   : > { %3751 = vrot.lane.b32.xlu2 %v3720_v37, %s4323_s12  ;;  %v1518_v37 = vld [vmem:[#allocation3 + $0xf8] sm:$0xff] }
  0x58   : > { %1734 = vmatpush.msra.mxu1 %v1518_v37  ;;  %3587 = vmatpush.msra.mxu3 %v1518_v37  ;;  %v4680_v37 = vld [vmem:[%s4479_s10 + $0x158] sm:$0xff] }
  0x5a   : > { %3746 = vrot.lane.b32.xlu1 %v3745_v47, %s4321_s30  ;;  %v573_v47 = vrot.slane %v4627_v34, 1  ;;  %1735 = vmatpush.msra.mxu1 %v1516_v41 }
  0x5b   : > { %3741 = vrot.lane.b32.xlu0 %v3715_v36, %s4323_s12  ;;  %v1517_v36 = vld [vmem:[#allocation3 + $0xf0] sm:$0xff]  ;;  %3588 = vmatpush.msra.mxu3 %v1516_v41 }
  0x5c   : > { %1525 = vmatpush.msra.mxu0 %v1517_v36  ;;  %3571 = vmatpush.msra.mxu2 %v1517_v36  ;;  %v4677_v36 = vld [vmem:[%s4479_s10 + $0x98] sm:$0xff]  ;;  %v1497_v41 = vld [vmem:[#allocation3 + $0x50] sm:$0xff] }
  0x5d   : > { %1736 = vmatpush.msra.mxu1 %v1514_v63  ;;  %3589 = vmatpush.msra.mxu3 %v1514_v63 }
  0x5e   : > { %1526 = vmatpush.msra.mxu0 %v1515_v38  ;;  %3572 = vmatpush.msra.mxu2 %v1515_v38  ;;  %v1499_v38 = vld [vmem:[#allocation3 + $0x60] sm:$0xff] }
  0x5f   : > { %3766 = vrot.lane.b32.xlu2 %v3730_v43, %s4323_s12  ;;  %v679_v43 = vsel %vm541_vm0, %v610_v28, 0.0  ;;  %v1506_v28 = vld [vmem:[#allocation3 + $0x98] sm:$0xff] }
  0x60   : > { %v4647_v50 = vpack.i.bf16 %v673_v42, %v679_v43  ;;  %1527 = vmatpush.msra.mxu0 %v1513_v62  ;;  %3573 = vmatpush.msra.mxu2 %v1513_v62  ;;  %v1498_v42 = vld [vmem:[#allocation3 + $0x58] sm:$0xff]  ;;  %v1495_v43 = vld [vmem:[#allocation3 + $0x40] sm:$0xff] }
  0x61   : > { %v1490_v62 = vld [vmem:[#allocation3 + $0x18] sm:$0xff] }
  0x62   : > { %3761 = vrot.lane.b32.xlu1 %v3760_v60, %s4321_s30  ;;  %v574_v60 = vsel %vm541_vm0, %v571_v53, %v573_v47  ;;  %1528 = vmatpush.msra.mxu0 %v1511_v3  ;;  %v1492_v53 = vld [vmem:[#allocation3 + $0x28] sm:$0xff] }
  0x63   : > { %3756 = vrot.lane.b32.xlu0 %v3755_v61, %s4322_s11  ;;  %v616_v61 = vsel %vm541_vm0, %v613_v52, %v615_v48  ;;  %3574 = vmatpush.msra.mxu2 %v1511_v3  ;;  %v1487_v3 = vld [vmem:[#allocation3] sm:$0xff] }
  0x64   : > { %v4662_v15 = vpack.i.bf16 %v574_v60, %v616_v61  ;;  %v575_v60 = vrot.slane %v4677_v36, 1  ;;  %v1489_v61 = vld [vmem:[#allocation3 + $0x10] sm:$0xff] }
  0x67   : > { %3781 = vrot.lane.b32.xlu2 %v3780_v11, %s4323_s12  ;;  %v614_v11 = vsel %vm541_vm0, %v612_v59, %v613_v52  ;;  %v1491_v52 = vld [vmem:[#allocation3 + $0x20] sm:$0xff]  ;;  %v617_v59 = vrot.slane %v4680_v37, 1 }
  0x6a   : > { %3776 = vrot.lane.b32.xlu1 %v3775_v16, %s4321_s30  ;;  %v1512_v16 = vld [vmem:[#allocation3 + $0xc8] sm:$0xff] }
  0x6b   : > { %3771 = vrot.lane.b32.xlu0 %v3770_v17, %s4322_s11  ;;  %v1509_v17 = vld [vmem:[#allocation3 + $0xb0] sm:$0xff]  ;;  %1737 = vmatpush.msra.mxu1 %v1512_v16 }
  0x6c   : > { %3590 = vmatpush.msra.mxu3 %v1512_v16  ;;  %1529 = vmatpush.msra.mxu0 %v1509_v17  ;;  %v4704_v16 = vld [vmem:[%s4479_s10 + $0x168] sm:$0xff] }
  0x6d   : > { %1738 = vmatpush.msra.mxu1 %v1510_v21  ;;  %3575 = vmatpush.msra.mxu2 %v1509_v17  ;;  %v576_v17 = vsel %vm541_vm0, %v573_v47, %v575_v60  ;;  %v455_v47 = vld [vmem:[%s4479_s10 + $0x170] sm:$0xff] }
  0x6e   : > { %1530 = vmatpush.msra.mxu0 %v1507_v23  ;;  %3591 = vmatpush.msra.mxu3 %v1510_v21 }
  0x6f   : > { %3796 = vrot.lane.b32.xlu2 %v3795_v22, %s4322_s11  ;;  %v4664_v22 = vpack.i.bf16 %v572_v4, %v614_v11  ;;  %3576 = vmatpush.msra.mxu2 %v1507_v23  ;;  %v1488_v4 = vld [vmem:[#allocation3 + $0x8] sm:$0xff]  ;;  %v430_v11 = vld [vmem:[%s4479_s10 + $0xa8] sm:$0xff]  ;;  %v680_v23 = vsel %vm541_vm0, %v617_v59, 0.0 }
  0x70   : > { %1531 = vmatpush.msra.mxu0 %v1505_v27  ;;  %v3895_v21 = vpack.i.bf16 %v430_v11, %v4704_v16 }
  0x71   : > { %3577 = vmatpush.msra.mxu2 %v1505_v27 }
  0x72   : > { %3791 = vrot.lane.b32.xlu1 %v3790_v25, %s4323_s12  ;;  %v1508_v25 = vld [vmem:[#allocation3 + $0xa8] sm:$0xff]  ;;  %1532 = vmatpush.msra.mxu0 %v1503_v29 }
  0x73   : > { %3786 = vrot.lane.b32.xlu0 %v3785_v26, %s4321_s30  ;;  %1739 = vmatpush.msra.mxu1 %v1508_v25  ;;  %v3850_v26 = vpack.i.bf16 %v4627_v34, %v4630_v35  ;;  %v431_v35 = vld [vmem:[%s4479_s10 + $0xb0] sm:$0xff] }
  0x74   : > { %3592 = vmatpush.msra.mxu3 %v1508_v25  ;;  %3578 = vmatpush.msra.mxu2 %v1503_v29  ;;  %v3910_v25 = vpack.i.bf16 %v431_v35, %v455_v47  ;;  %v578_v29 = vrot.slane %v430_v11, 1 }
  0x75   : > { %1740 = vmatpush.msra.mxu1 %v1506_v28 }
  0x76   : > { %3593 = vmatpush.msra.mxu3 %v1506_v28 }
  0x77   : > { %3811 = vrot.lane.b32.xlu2 %v3810_v31, %s4321_s30  ;;  %v1501_v31 = vld [vmem:[#allocation3 + $0x70] sm:$0xff]  ;;  %1741 = vmatpush.msra.mxu1 %v1504_v30 }
  0x78   : > { %3594 = vmatpush.msra.mxu3 %v1504_v30  ;;  %1533 = vmatpush.msra.mxu0 %v1501_v31 }
  0x79   : > { %3579 = vmatpush.msra.mxu2 %v1501_v31  ;;  %v620_v31 = vrot.slane %v4704_v16, 1 }
  0x7a   : > { %3806 = vrot.lane.b32.xlu1 %v4621_v32, %s4323_s12  ;;  %1534 = vmatpush.msra.mxu0 %v1499_v38 }
  0x7b   : > { %3801 = vrot.lane.b32.xlu0 %v3800_v33, %s4321_s30  ;;  %v1502_v33 = vld [vmem:[#allocation3 + $0x78] sm:$0xff]  ;;  %3580 = vmatpush.msra.mxu2 %v1499_v38 }
  0x7c   : > { %1742 = vmatpush.msra.mxu1 %v1502_v33  ;;  %3595 = vmatpush.msra.mxu3 %v1502_v33  ;;  %v4732_v33 = vld [vmem:[%s4479_s10 + $0xb8] sm:$0xff] }
  0x7d   : > { %1535 = vmatpush.msra.mxu0 %v1497_v41  ;;  %3581 = vmatpush.msra.mxu2 %v1497_v41 }
  0x7e   : > { %1743 = vmatpush.msra.mxu1 %v1500_v39  ;;  %3596 = vmatpush.msra.mxu3 %v1500_v39 }
  0x7f   : > { %3826 = vrot.lane.b32.xlu2 %v3825_v46, %s4321_s30  ;;  %v1494_v46 = vld [vmem:[#allocation3 + $0x38] sm:$0xff]  ;;  %1536 = vmatpush.msra.mxu0 %v1495_v43 }
  0x80   : > { %1744 = vmatpush.msra.mxu1 %v1498_v42  ;;  %3597 = vmatpush.msra.mxu3 %v1498_v42 }
  0x81   : > { %1537 = vmatpush.msra.mxu0 %v1493_v45  ;;  %3582 = vmatpush.msra.mxu2 %v1495_v43 }
  0x82   : > { %3821 = vrot.lane.b32.xlu1 %v3820_v49, %s4322_s11  ;;  %1745 = vmatpush.msra.mxu1 %v1496_v44  ;;  %v4688_v49 = vld [vmem:[%s4479_s10 + $0xa0] sm:$0xff] }
  0x83   : > { %3816 = vrot.lane.b32.xlu0 %v4647_v50, %s4323_s12  ;;  %1538 = vmatpush.msra.mxu0 %v1491_v52  ;;  %v577_v28 = vrot.slane %v4688_v49, 1 }
  0x84   : > { %1746 = vmatpush.msra.mxu1 %v1494_v46  ;;  %3598 = vmatpush.msra.mxu3 %v1496_v44 }
  0x85   : > { %1539 = vmatpush.msra.mxu0 %v1489_v61  ;;  %3583 = vmatpush.msra.mxu2 %v1493_v45  ;;  %v579_v38 = vsel %vm541_vm0, %v577_v28, %v578_v29  ;;  %v580_v45 = vrot.slane %v431_v35, 1 }
  0x86   : > { %1747 = vmatpush.msra.mxu1 %v1492_v53  ;;  %3599 = vmatpush.msra.mxu3 %v1494_v46  ;;  %v622_v46 = vrot.slane %v455_v47, 1 }
  0x87   : > { %3841 = vrot.lane.b32.xlu2 %v4662_v15, %s4323_s12  ;;  %1540 = vmatpush.msra.mxu0 %v1487_v3 }
  0x88   : > { %1748 = vmatpush.msra.mxu1 %v1490_v62  ;;  %3584 = vmatpush.msra.mxu2 %v1491_v52  ;;  %v4751_v52 = vld [vmem:[%s4479_s10 + $0xc0] sm:$0xff] }
  0x89   : > { %3600 = vmatpush.msra.mxu3 %v1492_v53  ;;  %v4754_v53 = vld [vmem:[%s4479_s10 + $0x180] sm:$0xff] }
  0x8a   : > { %3836 = vrot.lane.b32.xlu1 %v3835_v18, %s4321_s30  ;;  %1749 = vmatpush.msra.mxu1 %v1488_v4  ;;  %v618_v18 = vsel %vm541_vm0, %v615_v48, %v617_v59  ;;  %v674_v48 = vsel %vm541_vm0, %v575_v60, 0.0  ;;  %v3940_v59 = vpack.i.bf16 %v4751_v52, %v4754_v53  ;;  %v623_v60 = vsel %vm541_vm0, %v620_v31, %v622_v46 }
  0x8b   : > { %3831 = vrot.lane.b32.xlu0 %v4664_v22, %s4323_s12  ;;  %3585 = vmatpush.msra.mxu2 %v1489_v61 }
  0x8c   : > { %3601 = vmatpush.msra.mxu3 %v1490_v62 }
  0x8d   : > { %3586 = vmatpush.msra.mxu2 %v1487_v3 }
  0x8e   : > { %3602 = vmatpush.msra.mxu3 %v1488_v4 }
  0x92   : > { %3851 = vrot.lane.b32.xlu1 %v3850_v26, %s4321_s30 }
  0x93   : > { %3846 = vrot.lane.b32.xlu0 %v4621_v32, %s4322_s11  ;;  %v3865_v32 = vpack.i.bf16 %v4677_v36, %v4680_v37  ;;  %v4735_v36 = vld [vmem:[%s4479_s10 + $0x178] sm:$0xff] }
  0x99   : > { %v4700_v63 = vpop.permute.xlu2 %3696 }
  0x9a   : > { %3866 = vrot.lane.b32.xlu1 %v3865_v32, %s4321_s30  ;;  %v3925_v32 = vpack.i.bf16 %v4732_v33, %v4735_v36  ;;  %v3698_v61 = vunpack.i.l.bf16 %v4700_v63 }
  0x9b   : > { %3861 = vrot.lane.b32.xlu0 %v4647_v50, %s4322_s11  ;;  %v4691_v50 = vld [vmem:[%s4479_s10 + $0x160] sm:$0xff] }
  0x9c   : > { %v3880_v55 = vpack.i.bf16 %v4688_v49, %v4691_v50  ;;  %v619_v30 = vrot.slane %v4691_v50, 1 }
  0x9e   : > { %v621_v41 = vsel %vm541_vm0, %v619_v30, %v620_v31 }
  0x9f   : > { %v3885_v42 = vpack.i.bf16 %v579_v38, %v621_v41 }
  0xa1   : > { %v4717_v34 = vpop.permute.xlu2 %3721 }
  0xa2   : > { %3881 = vrot.lane.b32.xlu1 %v3880_v55, %s4321_s30  ;;  %v581_v55 = vsel %vm541_vm0, %v578_v29, %v580_v45 }
  0xa3   : > { %3876 = vrot.lane.b32.xlu0 %v4664_v22, %s4322_s11  ;;  %v3855_v22 = vpack.i.bf16 %v576_v17, %v618_v18  ;;  %v3900_v62 = vpack.i.bf16 %v581_v55, %v623_v60  ;;  %v624_v18 = vrot.slane %v4735_v36, 1 }
  0xa5   : > { %3856 = vrot.lane.b32.xlu2 %v3855_v22, %s4323_s12 }
  0xa9   : > { %v4738_v39 = vpop.permute.xlu2 %3736 }
  0xaa   : > { %3896 = vrot.lane.b32.xlu1 %v3895_v21, %s4321_s30  ;;  %v582_v21 = vrot.slane %v4732_v33, 1 }
  0xab   : > { %3891 = vrot.lane.b32.xlu0 %v4662_v15, %s4322_s11  ;;  %v3870_v15 = vpack.i.bf16 %v674_v48, %v680_v23  ;;  %v4778_v23 = vld [vmem:[%s4479_s10 + $0x188] sm:$0xff] }
  0xad   : > { %3871 = vrot.lane.b32.xlu2 %v3870_v15, %s4323_s12 }
  0xb1   : > { %v4762_v3 = vpop.permute.xlu2 %3751 }
  0xb2   : > { %3911 = vrot.lane.b32.xlu1 %v3910_v25, %s4321_s30  ;;  %v583_v25 = vsel %vm541_vm0, %v580_v45, %v582_v21  ;;  %v4801_v45 = vld [vmem:[%s4479_s10 + $0x190] sm:$0xff] }
  0xb3   : > { %3906 = vrot.lane.b32.xlu0 %v3855_v22, %s4322_s11 }
  0xb4   : > { %v4724_v26 = vpop.permute.xlu1 %3711 }
  0xb5   : > { %v3702_v27 = vpop.permute.xlu0 %3701  ;;  %3886 = vrot.lane.b32.xlu2 %v3885_v42, %s4323_s12 }
  0xb6   : > { %v3703_v49 = vunpack.i.l.bf16 %v3702_v27  ;;  %v3704_v47 = vunpack.i.h.bf16 %v3702_v27  ;;  %v3699_v27 = vunpack.i.h.bf16 %v4700_v63 }
  0xb8   : > { %v1293_v11 = vsel %vm1292_vm1, %v4494_v6, %v3703_v49  ;;  %v4775_v6 = vld [vmem:[%s4479_s10 + $0xc8] sm:$0xff]  ;;  %v1294_v33 = vsel %vm1292_vm1, %v4497_v7, %v3704_v47  ;;  %v675_v7 = vsel %vm541_vm0, %v582_v21, 0.0  ;;  %v627_v21 = vrot.slane %v4778_v23, 1 }
  0xb9   : > { %v1358_v35 = vsel %vm1357_vm2, %v1293_v11, %v3698_v61  ;;  %v3955_v28 = vpack.i.bf16 %v4775_v6, %v4778_v23  ;;  %v4792_v38 = vpop.permute.xlu2 %3766 }
  0xba   : > { %3926 = vrot.lane.b32.xlu1 %v3925_v32, %s4321_s30  ;;  %v1359_v32 = vsel %vm1357_vm2, %v1294_v33, %v3699_v27 }
  0xbb   : > { %3921 = vrot.lane.b32.xlu0 %v3870_v15, %s4322_s11  ;;  %v625_v15 = vsel %vm541_vm0, %v622_v46, %v624_v18  ;;  %v681_v46 = vsel %vm541_vm0, %v624_v18, 0.0  ;;  %v584_v18 = vrot.slane %v4751_v52, 1 }
  0xbc   : > { %v4744_v43 = vpop.permute.xlu1 %3716  ;;  %v3915_v29 = vpack.i.bf16 %v583_v25, %v625_v15  ;;  %v3930_v55 = vpack.i.bf16 %v675_v7, %v681_v46  ;;  %v4827_v25 = vld [vmem:[%s4479_s10 + $0xd8] sm:$0xff] }
  0xbd   : > { %v4747_v44 = vpop.permute.xlu0 %3706  ;;  %3901 = vrot.lane.b32.xlu2 %v3900_v62, %s4323_s12 }
  0xbe   : > { %v3708_v41 = vunpack.i.l.bf16 %v4747_v44  ;;  %v3709_v47 = vunpack.i.h.bf16 %v4747_v44  ;;  %v3739_v44 = vunpack.i.h.bf16 %v4738_v39 }
  0xc0   : > { %v1296_v27 = vsel %vm1292_vm1, %v4511_v14, %v3709_v47  ;;  %v629_v14 = vrot.slane %v4801_v45, 1 }
  0xc2   : > { %3941 = vrot.lane.b32.xlu1 %v3940_v59, %s4321_s30  ;;  %v3738_v59 = vunpack.i.l.bf16 %v4738_v39  ;;  %v3713_v39 = vunpack.i.l.bf16 %v4724_v26  ;;  %v630_v47 = vsel %vm541_vm0, %v627_v21, %v629_v14 }
  0xc3   : > { %3936 = vrot.lane.b32.xlu0 %v3885_v42, %s4322_s11  ;;  %v4798_v42 = vld [vmem:[%s4479_s10 + $0xd0] sm:$0xff] }
  0xc4   : > { %v4764_v4 = vpop.permute.xlu1 %3731  ;;  %v3970_v49 = vpack.i.bf16 %v4798_v42, %v4801_v45  ;;  %v1297_v45 = vsel %vm1292_vm1, %v4482_v0, %v3713_v39 }
  0xc5   : > { %v3727_v17 = vpop.permute.xlu0 %3726  ;;  %3916 = vrot.lane.b32.xlu2 %v3915_v29, %s4323_s12 }
  0xc6   : > { %v3728_v22 = vunpack.i.l.bf16 %v3727_v17  ;;  %v3729_v30 = vunpack.i.h.bf16 %v3727_v17  ;;  %v626_v17 = vrot.slane %v4754_v53, 1  ;;  %v4830_v53 = vld [vmem:[%s4479_s10 + $0x198] sm:$0xff] }
  0xc7   : > { %v3985_v23 = vpack.i.bf16 %v4827_v25, %v4830_v53 }
  0xc8   : > { %v1423_v48 = vsel %vm1422_vm3, %v1358_v35, %v3728_v22  ;;  %v1424_v63 = vsel %vm1422_vm3, %v1359_v32, %v3729_v30  ;;  %v585_v22 = vrot.slane %v4775_v6, 1  ;;  %v628_v6 = vsel %vm541_vm0, %v626_v17, %v627_v21 }
  0xc9   : > { %1541 = vmatmul.f32.vlgmr.msra.gmra.mxu0 %v1423_v48  ;;  %1750 = vmatmul.f32.vlgmr.msra.gmra.mxu1 %v1423_v48  ;;  %v4823_v48 = vpop.permute.xlu2 %3781  ;;  %v587_v32 = vrot.slane %v4798_v42, 1 }
  0xca   : > { %3956 = vrot.lane.b32.xlu1 %v3955_v28, %s4321_s30  ;;  %v586_v52 = vsel %vm541_vm0, %v584_v18, %v585_v22 }
  0xcb   : > { %3951 = vrot.lane.b32.xlu0 %v3900_v62, %s4322_s11  ;;  %v1295_v62 = vsel %vm1292_vm1, %v4500_v8, %v3708_v41  ;;  %v3945_v15 = vpack.i.bf16 %v586_v52, %v628_v6 }
  0xcc   : > { %v4786_v31 = vpop.permute.xlu1 %3746  ;;  %v1360_v35 = vsel %vm1357_vm2, %v1295_v62, %v3738_v59  ;;  %v4856_v59 = vld [vmem:[%s4479_s10 + $0xe0] sm:$0xff]  ;;  %v588_v62 = vsel %vm541_vm0, %v585_v22, %v587_v32 }
  0xcd   : > { %v3742_v36 = vpop.permute.xlu0 %3741  ;;  %3931 = vrot.lane.b32.xlu2 %v3930_v55, %s4323_s12  ;;  %v3748_v7 = vunpack.i.l.bf16 %v4786_v31  ;;  %v3960_v22 = vpack.i.bf16 %v588_v62, %v630_v47 }
  0xce   : > { %v3743_v60 = vunpack.i.l.bf16 %v3742_v36  ;;  %v3744_v28 = vunpack.i.h.bf16 %v3742_v36  ;;  %v3783_v36 = vunpack.i.l.bf16 %v4823_v48 }
  0xd0   : > { %v1425_v8 = vsel %vm1422_vm3, %v1360_v35, %v3743_v60  ;;  %v4859_v60 = vld [vmem:[%s4479_s10 + $0x1a0] sm:$0xff] }
  0xd1   : > { %1544 = vmatmul.f32.gmra.mxu0 %v1424_v63  ;;  %1753 = vmatmul.f32.gmra.mxu1 %v1424_v63  ;;  %v1361_v63 = vsel %vm1357_vm2, %v1296_v27, %v3739_v44  ;;  %v4862_v17 = vpop.permute.xlu2 %3796  ;;  %v4000_v35 = vpack.i.bf16 %v4856_v59, %v4859_v60  ;;  %v589_v44 = vrot.slane %v4827_v25, 1  ;;  %v631_v27 = vrot.slane %v4830_v53, 1 }
  0xd2   : > { %3971 = vrot.lane.b32.xlu1 %v3970_v49, %s4321_s30  ;;  %v1426_v46 = vsel %vm1422_vm3, %v1361_v63, %v3744_v28  ;;  %v3714_v28 = vunpack.i.h.bf16 %v4724_v26  ;;  %v4895_v26 = vld [vmem:[%s4479_s10 + $0x1a8] sm:$0xff] }
  0xd3   : > { %3966 = vrot.lane.b32.xlu0 %v3915_v29, %s4322_s11  ;;  %v590_v53 = vsel %vm541_vm0, %v587_v32, %v589_v44 }
  0xd4   : > { %v4809_v61 = vpop.permute.xlu1 %3761  ;;  %v1298_v63 = vsel %vm1292_vm1, %v4485_v1, %v3714_v28 }
  0xd5   : > { %v4814_v11 = vpop.permute.xlu0 %3756  ;;  %3946 = vrot.lane.b32.xlu2 %v3945_v15, %s4323_s12 }
  0xd9   : > { %1547 = vmatmul.f32.gmra.mxu0 %v1425_v8  ;;  %1756 = vmatmul.f32.gmra.mxu1 %v1425_v8  ;;  %v3753_v8 = vunpack.i.l.bf16 %v4762_v3 }
  0xda   : > { %3986 = vrot.lane.b32.xlu1 %v3985_v23, %s4321_s30  ;;  %v1362_v23 = vsel %vm1357_vm2, %v1297_v45, %v3748_v7  ;;  %v3799_v45 = vunpack.i.h.bf16 %v4862_v17 }
  0xdb   : > { %3981 = vrot.lane.b32.xlu0 %v3930_v55, %s4322_s11 }
  0xdc   : > { %v4838_v29 = vpop.permute.xlu1 %3776  ;;  %v1328_v28 = vsel %vm1292_vm1, %v4579_v5, %v3799_v45 }
  0xdd   : > { %v3778_v30 = vunpack.i.l.bf16 %v4838_v29  ;;  %v3772_v33 = vpop.permute.xlu0 %3771  ;;  %3961 = vrot.lane.b32.xlu2 %v3960_v22, %s4323_s12 }
  0xde   : > { %v3773_v41 = vunpack.i.l.bf16 %v3772_v33  ;;  %v3774_v55 = vunpack.i.h.bf16 %v3772_v33  ;;  %v1427_v33 = vsel %vm1422_vm3, %v1362_v23, %v3753_v8  ;;  %v4929_v23 = vld [vmem:[%s4479_s10 + $0x1b0] sm:$0xff] }
  0xe0   : > { %v1325_v49 = vsel %vm1292_vm1, %v4561_v56, %v3773_v41  ;;  %v1326_v21 = vsel %vm1292_vm1, %v4564_v57, %v3774_v55  ;;  %v4892_v41 = vld [vmem:[%s4479_s10 + $0xe8] sm:$0xff]  ;;  %v4904_v55 = vpop.permute.xlu2 %3811 }
  0xe1   : > { %1550 = vmatmul.f32.gmra.mxu0 %v1426_v46  ;;  %1759 = vmatmul.f32.gmra.mxu1 %v1426_v46  ;;  %v1390_v42 = vsel %vm1357_vm2, %v1325_v49, %v3778_v30  ;;  %v3798_v30 = vunpack.i.l.bf16 %v4862_v17  ;;  %v4015_v7 = vpack.i.bf16 %v4892_v41, %v4895_v26  ;;  %v632_v46 = vsel %vm541_vm0, %v629_v14, %v631_v27 }
  0xe2   : > { %v1455_v18 = vsel %vm1422_vm3, %v1390_v42, %v3783_v36  ;;  %4001 = vrot.lane.b32.xlu1 %v4000_v35, %s4321_s30  ;;  %v3749_v36 = vunpack.i.h.bf16 %v4786_v31  ;;  %v3975_v31 = vpack.i.bf16 %v590_v53, %v632_v46  ;;  %v3754_v49 = vunpack.i.h.bf16 %v4762_v3 }
  0xe3   : > { %1637 = vmatmul.f32.vlgmr.msra.gmra.mxu2 %v1455_v18  ;;  %1846 = vmatmul.f32.vlgmr.msra.gmra.mxu3 %v1455_v18  ;;  %v1327_v62 = vsel %vm1292_vm1, %v4567_v58, %v3798_v30  ;;  %v3718_v3 = vunpack.i.l.bf16 %v4744_v43  ;;  %v3813_v35 = vunpack.i.l.bf16 %v4904_v55  ;;  %v676_v17 = vsel %vm541_vm0, %v589_v44, 0.0 }
  0xe4   : > { %v4871_v52 = vpop.permute.xlu1 %3791  ;;  %3996 = vrot.lane.b32.xlu0 %v3945_v15, %s4322_s11  ;;  %v1363_v14 = vsel %vm1357_vm2, %v1298_v63, %v3749_v36  ;;  %v682_v30 = vsel %vm541_vm0, %v631_v27, 0.0  ;;  %v592_v27 = vrot.slane %v4892_v41, 1  ;;  %v3719_v63 = vunpack.i.h.bf16 %v4744_v43  ;;  %v4960_v43 = vld [vmem:[%s4479_s10 + $0xf8] sm:$0xff] }
  0xe5   : > { %v3793_v0 = vunpack.i.l.bf16 %v4871_v52  ;;  %v4876_v6 = vpop.permute.xlu0 %3786  ;;  %3976 = vrot.lane.b32.xlu2 %v3975_v31, %s4323_s12  ;;  %v1428_v47 = vsel %vm1422_vm3, %v1363_v14, %v3754_v49  ;;  %v1393_v53 = vsel %vm1357_vm2, %v1328_v28, %v3813_v35  ;;  %v634_v49 = vrot.slane %v4895_v26, 1 }
  0xe6   : > { %v3788_v15 = vunpack.i.l.bf16 %v4876_v6  ;;  %v3764_v14 = vunpack.i.h.bf16 %v4809_v61  ;;  %v3723_v28 = vunpack.i.l.bf16 %v4717_v34 }
  0xe8   : > { %v1391_v39 = vsel %vm1357_vm2, %v1326_v21, %v3788_v15  ;;  %v1299_v21 = vsel %vm1292_vm1, %v4488_v2, %v3718_v3  ;;  %v4940_v36 = vpop.permute.xlu2 %3826  ;;  %v3990_v2 = vpack.i.bf16 %v676_v17, %v682_v30 }
  0xe9   : > { %1553 = vmatmul.f32.gmra.mxu0 %v1427_v33  ;;  %1762 = vmatmul.f32.gmra.mxu1 %v1427_v33  ;;  %v1456_v25 = vsel %vm1422_vm3, %v1391_v39, %v3793_v0  ;;  %v4926_v0 = vld [vmem:[%s4479_s10 + $0xf0] sm:$0xff]  ;;  %v3768_v33 = vunpack.i.l.bf16 %v4792_v38  ;;  %v3828_v41 = vunpack.i.l.bf16 %v4940_v36 }
  0xea   : > { %4016 = vrot.lane.b32.xlu1 %v4015_v7, %s4321_s30  ;;  %v4030_v15 = vpack.i.bf16 %v4926_v0, %v4929_v23 }
  0xeb   : > { %1640 = vmatmul.f32.gmra.mxu2 %v1456_v25  ;;  %1849 = vmatmul.f32.gmra.mxu3 %v1456_v25  ;;  %v591_v25 = vrot.slane %v4856_v59, 1 }
  0xec   : > { %v4906_v42 = vpop.permute.xlu1 %3806  ;;  %4011 = vrot.lane.b32.xlu0 %v3960_v22, %s4322_s11  ;;  %v3763_v22 = vunpack.i.l.bf16 %v4809_v61 }
  0xed   : > { %v3808_v1 = vunpack.i.l.bf16 %v4906_v42  ;;  %v4911_v32 = vpop.permute.xlu0 %3801  ;;  %3991 = vrot.lane.b32.xlu2 %v3990_v2, %s4323_s12  ;;  %v593_v3 = vsel %vm541_vm0, %v591_v25, %v592_v27 }
  0xee   : > { %v3803_v18 = vunpack.i.l.bf16 %v4911_v32  ;;  %v1364_v5 = vsel %vm1357_vm2, %v1299_v21, %v3763_v22  ;;  %v636_v21 = vrot.slane %v4929_v23, 1 }
  0xf0   : > { %v1392_v8 = vsel %vm1357_vm2, %v1327_v62, %v3803_v18  ;;  %v4963_v62 = vld [vmem:[%s4479_s10 + $0x1b8] sm:$0xff]  ;;  %v3769_v18 = vunpack.i.h.bf16 %v4792_v38  ;;  %v4984_v38 = vpop.permute.xlu2 %3841  ;;  %v637_v25 = vsel %vm541_vm0, %v634_v49, %v636_v21 }
  0xf1   : > { %1556 = vmatmul.f32.gmra.mxu0 %v1428_v47  ;;  %1765 = vmatmul.f32.gmra.mxu1 %v1428_v47  ;;  %v1457_v58 = vsel %vm1422_vm3, %v1392_v8, %v3808_v1  ;;  %v1429_v1 = vsel %vm1422_vm3, %v1364_v5, %v3768_v33  ;;  %v4045_v45 = vpack.i.bf16 %v4960_v43, %v4963_v62  ;;  %v594_v8 = vrot.slane %v4926_v0, 1 }
  0xf2   : > { %4031 = vrot.lane.b32.xlu1 %v4030_v15, %s4321_s30  ;;  %v3779_v0 = vunpack.i.h.bf16 %v4838_v29  ;;  %v3784_v29 = vunpack.i.h.bf16 %v4823_v48  ;;  %v638_v48 = vrot.slane %v4963_v62, 1  ;;  %v5026_v62 = vld [vmem:[%s4479_s10 + $0x1c8] sm:$0xff] }
  0xf3   : > { %1643 = vmatmul.f32.gmra.mxu2 %v1457_v58  ;;  %1852 = vmatmul.f32.gmra.mxu3 %v1457_v58 }
  0xf4   : > { %v3822_v39 = vpop.permute.xlu1 %3821  ;;  %4026 = vrot.lane.b32.xlu0 %v3975_v31, %s4322_s11  ;;  %v633_v31 = vrot.slane %v4859_v60, 1  ;;  %v1300_v60 = vsel %vm1292_vm1, %v4508_v13, %v3719_v63  ;;  %v3843_v63 = vunpack.i.l.bf16 %v4984_v38 }
  0xf5   : > { %v4944_v44 = vpop.permute.xlu0 %3816  ;;  %v3823_v7 = vunpack.i.l.bf16 %v3822_v39  ;;  %v3824_v58 = vunpack.i.h.bf16 %v3822_v39  ;;  %v4994_v39 = vld [vmem:[%s4479_s10 + $0x1c0] sm:$0xff] }
  0xf6   : > { %v3818_v46 = vunpack.i.l.bf16 %v4944_v44  ;;  %v635_v61 = vsel %vm541_vm0, %v633_v31, %v634_v49  ;;  %v4060_v5 = vpack.i.bf16 %v4561_v56, %v4994_v39 }
  0xf7   : > { %v1329_v26 = vsel %vm1292_vm1, %v4557_v54, %v3823_v7  ;;  %v4005_v47 = vpack.i.bf16 %v593_v3, %v635_v61  ;;  %v1365_v54 = vsel %vm1357_vm2, %v1300_v60, %v3764_v14  ;;  %v1330_v23 = vsel %vm1292_vm1, %v4551_v51, %v3824_v58  ;;  %v4145_v7 = vld [vmem:[%s4479_s10 + $0x40] sm:$0xff] }
  0xf8   : > { %v1458_v59 = vsel %vm1422_vm3, %v1393_v53, %v3818_v46  ;;  %v1394_v22 = vsel %vm1357_vm2, %v1329_v26, %v3828_v41  ;;  %v1430_v15 = vsel %vm1422_vm3, %v1365_v54, %v3769_v18  ;;  %v1301_v46 = vsel %vm1292_vm1, %v4145_v7, %v3723_v28 }
  0xf9   : > { %1559 = vmatmul.f32.gmra.mxu0 %v1429_v1  ;;  %1768 = vmatmul.f32.gmra.mxu1 %v1429_v1  ;;  %v1366_v56 = vsel %vm1357_vm2, %v1301_v46, %v3779_v0  ;;  %v3724_v14 = vunpack.i.h.bf16 %v4717_v34  ;;  %v4075_v34 = vpack.i.bf16 %v4564_v57, %v5026_v62  ;;  %v639_v61 = vsel %vm541_vm0, %v636_v21, %v638_v48 }
  0xfa   : > { %4046 = vrot.lane.b32.xlu1 %v4045_v45, %s4321_s30  ;;  %4006 = vrot.lane.b32.xlu2 %v4005_v47, %s4323_s12  ;;  %v1431_v41 = vsel %vm1422_vm3, %v1366_v56, %v3784_v29  ;;  %v3733_v21 = vunpack.i.l.bf16 %v4764_v4  ;;  %v3804_v28 = vunpack.i.h.bf16 %v4911_v32  ;;  %v3809_v29 = vunpack.i.h.bf16 %v4906_v42 }
  0xfb   : > { %1646 = vmatmul.f32.gmra.mxu2 %v1458_v59  ;;  %1855 = vmatmul.f32.gmra.mxu3 %v1458_v59  ;;  %v640_v56 = vrot.slane %v4994_v39, 1 }
  0xfc   : > { %v4974_v35 = vpop.permute.xlu1 %3836  ;;  %4041 = vrot.lane.b32.xlu0 %v3990_v2, %s4322_s11  ;;  %v595_v2 = vsel %vm541_vm0, %v592_v27, %v594_v8  ;;  %v596_v27 = vrot.slane %v4960_v43, 1  ;;  %v3789_v43 = vunpack.i.h.bf16 %v4876_v6  ;;  %v3794_v6 = vunpack.i.h.bf16 %v4871_v52 }
  0xfd   : > { %v4978_v13 = vpop.permute.xlu0 %3831  ;;  %v3838_v33 = vunpack.i.l.bf16 %v4974_v35  ;;  %v4020_v53 = vpack.i.bf16 %v595_v2, %v637_v25  ;;  %v4147_v25 = vld [vmem:[%s4479_s10 + $0x110] sm:$0xff] }
  0xfe   : > { %v3833_v17 = vunpack.i.l.bf16 %v4978_v13  ;;  %v597_v26 = vsel %vm541_vm0, %v594_v8, %v596_v27  ;;  %v677_v2 = vsel %vm541_vm0, %v596_v27, 0.0  ;;  %v641_v27 = vrot.slane %v5026_v62, 1 }
  0xff   : > { %v1395_v31 = vsel %vm1357_vm2, %v1330_v23, %v3838_v33  ;;  %v5018_v59 = vpop.permute.xlu2 %3856  ;;  %v4035_v18 = vpack.i.bf16 %v597_v26, %v639_v61  ;;  %v5056_v33 = vld [vmem:[%s4479_s10 + $0x1d0] sm:$0xff]  ;;  %v683_v23 = vsel %vm541_vm0, %v638_v48, 0.0  ;;  %v3814_v61 = vunpack.i.h.bf16 %v4904_v55 }
 0x100   : > { %v1459_v30 = vsel %vm1422_vm3, %v1394_v22, %v3833_v17  ;;  %v1460_v3 = vsel %vm1422_vm3, %v1395_v31, %v3843_v63  ;;  %v3858_v22 = vunpack.i.l.bf16 %v5018_v59  ;;  %v4090_v32 = vpack.i.bf16 %v4147_v25, %v5056_v33  ;;  %v4148_v63 = vld [vmem:[%s4479_s10 + $0x50] sm:$0xff] }
 0x101   : > { %1562 = vmatmul.f32.gmra.mxu0 %v1430_v15  ;;  %1771 = vmatmul.f32.gmra.mxu1 %v1430_v15  ;;  %v1303_v7 = vsel %vm1292_vm1, %v4148_v63, %v3733_v21  ;;  %v642_v62 = vsel %vm541_vm0, %v640_v56, %v641_v27  ;;  %v4152_v63 = vld [vmem:[%s4479_s10 + $0x60] sm:$0xff] }
 0x102   : > { %4061 = vrot.lane.b32.xlu1 %v4060_v5, %s4321_s30  ;;  %4021 = vrot.lane.b32.xlu2 %v4020_v53, %s4323_s12 }
 0x103   : > { %1649 = vmatmul.f32.gmra.mxu2 %v1459_v30  ;;  %1858 = vmatmul.f32.gmra.mxu3 %v1459_v30 }
 0x104   : > { %4056 = vrot.lane.b32.xlu0 %v4005_v47, %s4322_s11  ;;  %v5008_v51 = vpop.permute.xlu1 %3851  ;;  %v4146_v47 = vld [vmem:[%s4479_s10 + $0x48] sm:$0xff] }
 0x105   : > { %v5013_v49 = vpop.permute.xlu0 %3846  ;;  %v3853_v60 = vunpack.i.l.bf16 %v5008_v51  ;;  %v1302_v54 = vsel %vm1292_vm1, %v4146_v47, %v3724_v14 }
 0x106   : > { %v3848_v1 = vunpack.i.l.bf16 %v5013_v49 }
 0x107   : > { %v5048_v17 = vpop.permute.xlu2 %3871 }
 0x108   : > { %v1331_v45 = vsel %vm1292_vm1, %v4590_v12, %v3848_v1  ;;  %v1367_v12 = vsel %vm1357_vm2, %v1302_v54, %v3789_v43  ;;  %v3873_v46 = vunpack.i.l.bf16 %v5048_v17 }
 0x109   : > { %1565 = vmatmul.f32.gmra.mxu0 %v1431_v41  ;;  %1774 = vmatmul.f32.gmra.mxu1 %v1431_v41  ;;  %v1396_v57 = vsel %vm1357_vm2, %v1331_v45, %v3853_v60  ;;  %v1432_v15 = vsel %vm1422_vm3, %v1367_v12, %v3794_v6  ;;  %v3734_v41 = vunpack.i.h.bf16 %v4764_v4  ;;  %v5087_v60 = vld [vmem:[%s4479_s10 + $0x1d8] sm:$0xff]  ;;  %v4065_v4 = vpack.i.bf16 %v4583_v9, %v642_v62 }
 0x10a   : > { %4076 = vrot.lane.b32.xlu1 %v4075_v34, %s4321_s30  ;;  %4036 = vrot.lane.b32.xlu2 %v4035_v18, %s4323_s12  ;;  %v1461_v30 = vsel %vm1422_vm3, %v1396_v57, %v3858_v22  ;;  %v4149_v45 = vld [vmem:[%s4479_s10 + $0x118] sm:$0xff] }
 0x10b   : > { %1652 = vmatmul.f32.gmra.mxu2 %v1460_v3  ;;  %1861 = vmatmul.f32.gmra.mxu3 %v1460_v3  ;;  %v4105_v34 = vpack.i.bf16 %v4149_v45, %v5087_v60  ;;  %v4150_v6 = vld [vmem:[%s4479_s10 + $0x58] sm:$0xff]  ;;  %v3844_v45 = vunpack.i.h.bf16 %v4984_v38  ;;  %v3854_v38 = vunpack.i.h.bf16 %v5008_v51 }
 0x10c   : > { %4071 = vrot.lane.b32.xlu0 %v4020_v53, %s4322_s11  ;;  %v5044_v58 = vpop.permute.xlu1 %3866  ;;  %v4050_v53 = vpack.i.bf16 %v677_v2, %v683_v23  ;;  %v1304_v47 = vsel %vm1292_vm1, %v4150_v6, %v3734_v41  ;;  %v4151_v23 = vld [vmem:[%s4479_s10 + $0x148] sm:$0xff] }
 0x10d   : > { %v5042_v8 = vpop.permute.xlu0 %3861  ;;  %v3868_v0 = vunpack.i.l.bf16 %v5044_v58  ;;  %v1369_v12 = vsel %vm1357_vm2, %v1304_v47, %v3814_v61  ;;  %v3849_v61 = vunpack.i.h.bf16 %v5013_v49  ;;  %v4155_v49 = vld [vmem:[%s4479_s10 + $0x70] sm:$0xff] }
 0x10e   : > { %v3863_v52 = vunpack.i.l.bf16 %v5042_v8 }
 0x10f   : > { %v5080_v14 = vpop.permute.xlu2 %3886 }
 0x110   : > { %v1332_v5 = vsel %vm1292_vm1, %v4611_v24, %v3863_v52  ;;  %v1368_v24 = vsel %vm1357_vm2, %v1303_v7, %v3804_v28  ;;  %v3888_v54 = vunpack.i.l.bf16 %v5080_v14  ;;  %v3758_v52 = vunpack.i.l.bf16 %v4814_v11 }
 0x111   : > { %1568 = vmatmul.f32.gmra.mxu0 %v1432_v15  ;;  %1777 = vmatmul.f32.gmra.mxu1 %v1432_v15  ;;  %v1397_v31 = vsel %vm1357_vm2, %v1332_v5, %v3868_v0  ;;  %v1433_v39 = vsel %vm1422_vm3, %v1368_v24, %v3809_v29  ;;  %v5119_v0 = vld [vmem:[%s4479_s10 + $0x1e0] sm:$0xff]  ;;  %v3834_v29 = vunpack.i.h.bf16 %v4978_v13 }
 0x112   : > { %4091 = vrot.lane.b32.xlu1 %v4090_v32, %s4321_s30  ;;  %4051 = vrot.lane.b32.xlu2 %v4050_v53, %s4323_s12  ;;  %v1462_v3 = vsel %vm1422_vm3, %v1397_v31, %v3873_v46  ;;  %v3829_v32 = vunpack.i.h.bf16 %v4940_v36  ;;  %v1305_v7 = vsel %vm1292_vm1, %v4152_v63, %v3758_v52  ;;  %v645_v36 = vrot.slane %v5087_v60, 1  ;;  %v4153_v60 = vld [vmem:[%s4479_s10 + $0x150] sm:$0xff] }
 0x113   : > { %1655 = vmatmul.f32.gmra.mxu2 %v1461_v30  ;;  %1864 = vmatmul.f32.gmra.mxu3 %v1461_v30  ;;  %v3759_v31 = vunpack.i.h.bf16 %v4814_v11 }
 0x114   : > { %4086 = vrot.lane.b32.xlu0 %v4035_v18, %s4322_s11  ;;  %v5076_v48 = vpop.permute.xlu1 %3881  ;;  %v3819_v18 = vunpack.i.h.bf16 %v4944_v44 }
 0x115   : > { %v5074_v42 = vpop.permute.xlu0 %3876  ;;  %v3883_v43 = vunpack.i.l.bf16 %v5076_v48 }
 0x116   : > { %v3878_v1 = vunpack.i.l.bf16 %v5074_v42  ;;  %v1434_v21 = vsel %vm1422_vm3, %v1369_v12, %v3819_v18 }
 0x117   : > { %v5111_v57 = vpop.permute.xlu2 %3901 }
 0x118   : > { %v1333_v26 = vsel %vm1292_vm1, %v4637_v40, %v3878_v1  ;;  %v643_v40 = vrot.slane %v5056_v33, 1  ;;  %v5122_v33 = vld [vmem:[%s4479_s10 + $0x1e8] sm:$0xff]  ;;  %v3903_v46 = vunpack.i.l.bf16 %v5111_v57 }
 0x119   : > { %1571 = vmatmul.f32.gmra.mxu0 %v1433_v39  ;;  %1780 = vmatmul.f32.gmra.mxu1 %v1433_v39  ;;  %v1398_v9 = vsel %vm1357_vm2, %v1333_v26, %v3883_v43  ;;  %v4120_v25 = vpack.i.bf16 %v5122_v33, %v5119_v0  ;;  %v3839_v39 = vunpack.i.h.bf16 %v4974_v35 }
 0x11a   : > { %4106 = vrot.lane.b32.xlu1 %v4105_v34, %s4321_s30  ;;  %4066 = vrot.lane.b32.xlu2 %v4065_v4, %s4323_s12  ;;  %v1463_v28 = vsel %vm1422_vm3, %v1398_v9, %v3888_v54  ;;  %v644_v30 = vsel %vm541_vm0, %v641_v27, %v643_v40  ;;  %v1370_v27 = vsel %vm1357_vm2, %v1305_v7, %v3829_v32  ;;  %v4154_v34 = vld [vmem:[%s4479_s10 + $0x68] sm:$0xff]  ;;  %v648_v7 = vrot.slane %v5122_v33, 1 }
 0x11b   : > { %1658 = vmatmul.f32.gmra.mxu2 %v1462_v3  ;;  %1867 = vmatmul.f32.gmra.mxu3 %v1462_v3  ;;  %v4115_v2 = vpack.i.bf16 %v644_v30, %v642_v62  ;;  %v1435_v1 = vsel %vm1422_vm3, %v1370_v27, %v3834_v29  ;;  %v646_v26 = vsel %vm541_vm0, %v643_v40, %v645_v36 }
 0x11c   : > { %4101 = vrot.lane.b32.xlu0 %v4050_v53, %s4322_s11  ;;  %v5108_v22 = vpop.permute.xlu1 %3896  ;;  %v4080_v53 = vpack.i.bf16 %v4586_v10, %v644_v30  ;;  %v4095_v11 = vpack.i.bf16 %v4599_v19, %v646_v26  ;;  %v1306_v35 = vsel %vm1292_vm1, %v4154_v34, %v3759_v31  ;;  %v5183_v30 = vld [vmem:[%s4479_s10 + $0x1f0] sm:$0xff]  ;;  %v4156_v31 = vld [vmem:[%s4479_s10 + $0x78] sm:$0xff] }
 0x11d   : > { %v5104_v55 = vpop.permute.xlu0 %3891  ;;  %v3898_v15 = vunpack.i.l.bf16 %v5108_v22  ;;  %v1371_v18 = vsel %vm1357_vm2, %v1306_v35, %v3839_v39 }
 0x11e   : > { %v3893_v44 = vunpack.i.l.bf16 %v5104_v55  ;;  %v1436_v40 = vsel %vm1422_vm3, %v1371_v18, %v3844_v45 }
 0x11f   : > { %v5150_v43 = vpop.permute.xlu2 %3916 }
 0x120   : > { %v1334_v5 = vsel %vm1292_vm1, %v4151_v23, %v3893_v44  ;;  %v3918_v4 = vunpack.i.l.bf16 %v5150_v43  ;;  %v1307_v44 = vsel %vm1292_vm1, %v4155_v49, %v3849_v61  ;;  %v3884_v61 = vunpack.i.h.bf16 %v5076_v48 }
 0x121   : > { %1574 = vmatmul.f32.gmra.mxu0 %v1434_v21  ;;  %1783 = vmatmul.f32.gmra.mxu1 %v1434_v21  ;;  %v1399_v24 = vsel %vm1357_vm2, %v1334_v5, %v3898_v15  ;;  %v684_v21 = vsel %vm541_vm0, %v645_v36, 0.0  ;;  %v5192_v5 = vld [vmem:[%s4479_s10 + $0x1f8] sm:$0xff]  ;;  %v3869_v36 = vunpack.i.h.bf16 %v5044_v58  ;;  %v3889_v48 = vunpack.i.h.bf16 %v5080_v14 }
 0x122   : > { %4121 = vrot.lane.b32.xlu1 %v4120_v25, %s4321_s30  ;;  %4081 = vrot.lane.b32.xlu2 %v4080_v53, %s4323_s12  ;;  %v1464_v41 = vsel %vm1422_vm3, %v1399_v24, %v3903_v46  ;;  %v4130_v15 = vpack.i.bf16 %v684_v21, %v646_v26  ;;  %v4135_v25 = vpack.i.bf16 %v5192_v5, %v5183_v30  ;;  %v3864_v53 = vunpack.i.h.bf16 %v5042_v8 }
 0x123   : > { %1661 = vmatmul.f32.gmra.mxu2 %v1463_v28  ;;  %1870 = vmatmul.f32.gmra.mxu3 %v1463_v28  ;;  %v3859_v28 = vunpack.i.h.bf16 %v5018_v59  ;;  %v647_v8 = vrot.slane %v5119_v0, 1  ;;  %v650_v24 = vrot.slane %v5183_v30, 1  ;;  %v3874_v0 = vunpack.i.h.bf16 %v5048_v17 }
 0x124   : > { %4116 = vrot.lane.b32.xlu0 %v4115_v2, %s4322_s11  ;;  %v5142_v13 = vpop.permute.xlu1 %3911  ;;  %v1372_v2 = vsel %vm1357_vm2, %v1307_v44, %v3854_v38  ;;  %v3879_v26 = vunpack.i.h.bf16 %v5074_v42  ;;  %v652_v45 = vrot.slane %v5192_v5, 1  ;;  %v5271_v44 = vld [vmem:[%s5261_s28] sm:$0xff]  ;;  %v3919_v30 = vunpack.i.h.bf16 %v5150_v43 }
 0x125   : > { %v5137_v56 = vpop.permute.xlu0 %3906  ;;  %v3913_v3 = vunpack.i.l.bf16 %v5142_v13  ;;  %v651_v39 = vsel %vm541_vm0, %v648_v7, %v650_v24 }
 0x126   : > { %v3908_v10 = vunpack.i.l.bf16 %v5137_v56 }
 0x127   : > { %v5176_v52 = vpop.permute.xlu2 %3931 }
 0x128   : > { %v1335_v62 = vsel %vm1292_vm1, %v4153_v60, %v3908_v10  ;;  %v3933_v23 = vunpack.i.l.bf16 %v5176_v52 }
 0x129   : > { %1577 = vmatmul.f32.gmra.mxu0 %v1435_v1  ;;  %1786 = vmatmul.f32.gmra.mxu1 %v1435_v1  ;;  %v1400_v6 = vsel %vm1357_vm2, %v1335_v62, %v3913_v3  ;;  %v1308_v1 = vsel %vm1292_vm1, %v4156_v31, %v3864_v53 }
 0x12a   : > { %4096 = vrot.lane.b32.xlu2 %v4095_v11, %s4323_s12  ;;  %v1465_v9 = vsel %vm1422_vm3, %v1400_v6, %v3918_v4  ;;  %4136 = vrot.lane.b32.xlu1 %v4135_v25, %s4321_s30  ;;  %v1373_v3 = vsel %vm1357_vm2, %v1308_v1, %v3869_v36  ;;  %v5246_v4 = vsel %vm541_vm0, %v652_v45, 0.0  ;;  %v4157_v6 = vld [vmem:[%s4479_s10 + $0x80] sm:$0xff]  ;;  %v3909_v1 = vunpack.i.h.bf16 %v5137_v56 }
 0x12b   : > { %1664 = vmatmul.f32.gmra.mxu2 %v1464_v41  ;;  %1873 = vmatmul.f32.gmra.mxu3 %v1464_v41  ;;  %v649_v41 = vsel %vm541_vm0, %v647_v8, %v648_v7  ;;  %v1438_v34 = vsel %vm1422_vm3, %v1373_v3, %v3874_v0  ;;  %v4159_v7 = vld [vmem:[%s4479_s10 + $0x170] sm:$0xff]  ;;  %v653_v3 = vsel %vm541_vm0, %v650_v24, %v652_v45 }
 0x12c   : > { %v5167_v54 = vpop.permute.xlu1 %3926  ;;  %4131 = vrot.lane.b32.xlu0 %v4130_v15, %s4322_s11  ;;  %v4125_v62 = vpack.i.bf16 %v651_v39, %v649_v41  ;;  %v690_v15 = vrot.slane %v5271_v44, 1 }
 0x12d   : > { %v5163_v47 = vpop.permute.xlu0 %3921  ;;  %v3928_v12 = vunpack.i.l.bf16 %v5167_v54 }
 0x12e   : > { %v3923_v19 = vunpack.i.l.bf16 %v5163_v47 }
 0x12f   : > { %v5218_v27 = vpop.permute.xlu2 %3946 }
 0x130   : > { %v1336_v51 = vsel %vm1292_vm1, %v4680_v37, %v3923_v19  ;;  %v4110_v37 = vpack.i.bf16 %v4602_v20, %v684_v21  ;;  %v1437_v20 = vsel %vm1422_vm3, %v1372_v2, %v3859_v28  ;;  %v3948_v58 = vunpack.i.l.bf16 %v5218_v27 }
 0x131   : > { %1580 = vmatmul.f32.gmra.mxu0 %v1436_v40  ;;  %1789 = vmatmul.f32.gmra.mxu1 %v1436_v40  ;;  %v1401_v59 = vsel %vm1357_vm2, %v1336_v51, %v3928_v12  ;;  %v1309_v19 = vsel %vm1292_vm1, %v4157_v6, %v3879_v26  ;;  %v5274_v12 = vld [vmem:[%s5261_s28 + $0x8] sm:$0xff]  ;;  %v3894_v21 = vunpack.i.h.bf16 %v5104_v55  ;;  %v4160_v26 = vld [vmem:[%s4479_s10 + $0x90] sm:$0xff] }
 0x132   : > { %4111 = vrot.lane.b32.xlu2 %v4110_v37, %s4323_s12  ;;  %v1466_v46 = vsel %vm1422_vm3, %v1401_v59, %v3933_v23  ;;  %4141 = vrot.lane.b32.xlu1 %v4125_v62, %s4322_s11  ;;  %v691_v2 = vrot.slane %v5274_v12, 1  ;;  %v3899_v59 = vunpack.i.h.bf16 %v5108_v22 }
 0x133   : > { %1667 = vmatmul.f32.gmra.mxu2 %v1465_v9  ;;  %1876 = vmatmul.f32.gmra.mxu3 %v1465_v9  ;;  %v1374_v9 = vsel %vm1357_vm2, %v1309_v19, %v3884_v61  ;;  %v3924_v61 = vunpack.i.h.bf16 %v5163_v47 }
 0x134   : > { %v5204_v63 = vpop.permute.xlu1 %3941  ;;  %1218 = vrot.lane.b32.xlu0 %v5246_v4, %s4323_s12  ;;  %v1439_v5 = vsel %vm1422_vm3, %v1374_v9, %v3889_v48  ;;  %v692_v55 = vsel %vm541_vm0, %v690_v15, %v691_v2  ;;  %v3929_v9 = vunpack.i.h.bf16 %v5167_v54  ;;  %v4162_v15 = vld [vmem:[%s4479_s10 + $0x98] sm:$0xff]  ;;  %v3934_v54 = vunpack.i.h.bf16 %v5176_v52 }
 0x135   : > { %v5199_v32 = vpop.permute.xlu0 %3936  ;;  %v3943_v10 = vunpack.i.l.bf16 %v5204_v63 }
 0x136   : > { %v3938_v29 = vunpack.i.l.bf16 %v5199_v32 }
 0x137   : > { %v5250_v18 = vpop.permute.xlu2 %3961 }
 0x138   : > { %v1337_v33 = vsel %vm1292_vm1, %v4691_v50, %v3938_v29  ;;  %v3963_v40 = vunpack.i.l.bf16 %v5250_v18  ;;  %v4158_v29 = vld [vmem:[%s4479_s10 + $0x88] sm:$0xff] }
 0x139   : > { %1583 = vmatmul.f32.gmra.mxu0 %v1437_v20  ;;  %1792 = vmatmul.f32.gmra.mxu1 %v1437_v20  ;;  %v1402_v60 = vsel %vm1357_vm2, %v1337_v33, %v3943_v10  ;;  %v1310_v20 = vsel %vm1292_vm1, %v4158_v29, %v3894_v21  ;;  %v1519_v21 = vld [vmem:[#allocation5] sm:$0x3]  ;;  %v3944_v29 = vunpack.i.h.bf16 %v5204_v63 }
 0x13a   : > { %4126 = vrot.lane.b32.xlu2 %v4125_v62, %s4323_s12  ;;  %v1467_v35 = vsel %vm1422_vm3, %v1402_v60, %v3948_v58  ;;  %v1375_v36 = vsel %vm1357_vm2, %v1310_v20, %v3899_v59  ;;  %1029 = vrot.lane.b32.xlu1 %v5274_v12, %s4321_s30  ;;  %v3914_v60 = vunpack.i.h.bf16 %v5142_v13  ;;  %v5372_v52 = vperm.slane %v1519_v21, 1 }
 0x13b   : > { %1670 = vmatmul.f32.gmra.mxu2 %v1466_v46  ;;  %1879 = vmatmul.f32.gmra.mxu3 %v1466_v46  ;;  %v3904_v46 = vunpack.i.h.bf16 %v5111_v57 }
 0x13c   : > { %v5239_v11 = vpop.permute.xlu1 %3956  ;;  %1220 = vrot.lane.b32.xlu0 %v692_v55, %s4323_s12 }
 0x13d   : > { %v5235_v50 = vpop.permute.xlu0 %3951  ;;  %v3958_v42 = vunpack.i.l.bf16 %v5239_v11  ;;  %v1440_v41 = vsel %vm1422_vm3, %v1375_v36, %v3904_v46 }
 0x13e   : > { %v3953_v17 = vunpack.i.l.bf16 %v5235_v50  ;;  %v3954_v63 = vunpack.i.h.bf16 %v5235_v50 }
 0x13f   : > { %v5293_v53 = vpop.permute.xlu2 %3976 }
 0x140   : > { %v1338_v38 = vsel %vm1292_vm1, %v4704_v16, %v3953_v17  ;;  %v3978_v22 = vunpack.i.l.bf16 %v5293_v53  ;;  %v1311_v17 = vsel %vm1292_vm1, %v4160_v26, %v3909_v1  ;;  %v3431_v26 = vld [vmem:[%s4465_s17 + $0x800] sm:$0xff] }
 0x141   : > { %1586 = vmatmul.f32.gmra.mxu0 %v1438_v34  ;;  %1795 = vmatmul.f32.gmra.mxu1 %v1438_v34  ;;  %v1403_v49 = vsel %vm1357_vm2, %v1338_v38, %v3958_v42  ;;  %v4161_v34 = vld [vmem:[%s4479_s10 + $0x178] sm:$0xff]  ;;  %v1376_v24 = vsel %vm1357_vm2, %v1311_v17, %v3914_v60 }
 0x142   : > { %v1468_v37 = vsel %vm1422_vm3, %v1403_v49, %v3963_v40  ;;  %1216 = vrot.lane.b32.xlu2 %v653_v3, %s4323_s12  ;;  %v1441_v38 = vsel %vm1422_vm3, %v1376_v24, %v3919_v30  ;;  %v1944_v30 = vld [vmem:[%s4465_s17 + $0x8] sm:$0xff] }
 0x143   : > { %1673 = vmatmul.f32.gmra.mxu2 %v1467_v35  ;;  %1882 = vmatmul.f32.gmra.mxu3 %v1467_v35 }
 0x144   : > { %v5284_v23 = vpop.permute.xlu1 %3971  ;;  %839 = vrot.lane.b32.xlu0 %v653_v3, %s4322_s11 }
 0x145   : > { %v5268_v16 = vpop.permute.xlu0 %3966  ;;  %v3973_v25 = vunpack.i.l.bf16 %v5284_v23 }
 0x146   : > { %v5277_v51 = vpop.f32.mrf.mxu0  ;;  %v5279_v14 = vpop.f32.mrf.mxu1  ;;  %v3968_v28 = vunpack.i.l.bf16 %v5268_v16 }
 0x147   : > { %v5323_v62 = vpop.permute.xlu2 %3991  ;;  %v1752_v17 = vadd.f32 %v5279_v14, %v5372_v52  ;;  %v4166_v14 = vld [vmem:[%s4479_s10 + $0xa8] sm:$0xff] }
 0x148   : > { %v1339_v8 = vsel %vm1292_vm1, %v4159_v7, %v3968_v28  ;;  %v3993_v13 = vunpack.i.l.bf16 %v5323_v62  ;;  %v3939_v28 = vunpack.i.h.bf16 %v5199_v32  ;;  %v5365_v32 = vperm.slane %v1519_v21, 0 }
 0x149   : > { %1589 = vmatmul.f32.gmra.mxu0 %v1439_v5  ;;  %1798 = vmatmul.f32.gmra.mxu1 %v1439_v5  ;;  %v1404_v10 = vsel %vm1357_vm2, %v1339_v8, %v3973_v25  ;;  %v1312_v5 = vsel %vm1292_vm1, %v4162_v15, %v3924_v61  ;;  %v5361_v25 = vld [vmem:[%s5261_s28 + $0x10] sm:$0xff] }
 0x14a   : > { %v1469_v39 = vsel %vm1422_vm3, %v1404_v10, %v3978_v22  ;;  %1027 = vrot.lane.b32.xlu2 %v5271_v44, %s4321_s30  ;;  %v1377_v20 = vsel %vm1357_vm2, %v1312_v5, %v3929_v9  ;;  %1031 = vrot.lane.b32.xlu1 %v5361_v25, %s4321_s30  ;;  %v3949_v10 = vunpack.i.h.bf16 %v5218_v27  ;;  %v1943_v27 = vld [vmem:[%s4465_s17] sm:$0xff]  ;;  %v1946_v9 = vld [vmem:[%s4465_s17 + $0x18] sm:$0xff] }
 0x14b   : > { %1676 = vmatmul.f32.gmra.mxu2 %v1468_v37  ;;  %1885 = vmatmul.f32.gmra.mxu3 %v1468_v37  ;;  %v4163_v37 = vld [vmem:[%s4479_s10 + $0x180] sm:$0xff]  ;;  %v1442_v1 = vsel %vm1422_vm3, %v1377_v20, %v3934_v54  ;;  %v5424_v54 = vld [vmem:[%s5261_s28 + $0x18] sm:$0xff]  ;;  %v3434_v20 = vld [vmem:[%s4465_s17 + $0x818] sm:$0xff] }
 0x14c   : > { %v5314_v58 = vpop.permute.xlu1 %3986  ;;  %841 = vrot.lane.b32.xlu0 %v5246_v4, %s4322_s11  ;;  %v4164_v4 = vld [vmem:[%s4479_s10 + $0xa0] sm:$0xff] }
 0x14d   : > { %v5304_v31 = vpop.permute.xlu0 %3981  ;;  %v3988_v56 = vunpack.i.l.bf16 %v5314_v58  ;;  %v1313_v46 = vsel %vm1292_vm1, %v4164_v4, %v3939_v28  ;;  %v3432_v5 = vld [vmem:[%s4465_s17 + $0x808] sm:$0xff]  ;;  %v693_v4 = vrot.slane %v5361_v25, 1 }
 0x14e   : > { %v5309_v33 = vpop.f32.mrf.mxu0  ;;  %v5311_v0 = vpop.f32.mrf.mxu1  ;;  %v3983_v57 = vunpack.i.l.bf16 %v5304_v31  ;;  %v1378_v50 = vsel %vm1357_vm2, %v1313_v46, %v3944_v29 }
 0x14f   : > { %v1546_v24 = vadd.f32 %v5309_v33, %v5365_v32  ;;  %v1755_v61 = vadd.f32 %v5311_v0, %v5372_v52  ;;  %v3974_v33 = vunpack.i.h.bf16 %v5284_v23  ;;  %v1443_v21 = vsel %vm1422_vm3, %v1378_v50, %v3949_v10 }
 0x150   : > { %v1340_v35 = vsel %vm1292_vm1, %v4161_v34, %v3983_v57  ;;  %v4165_v34 = vld [vmem:[%s4479_s10 + $0x188] sm:$0xff] }
 0x151   : > { %1592 = vmatmul.f32.gmra.mxu0 %v1440_v41  ;;  %1801 = vmatmul.f32.gmra.mxu1 %v1440_v41  ;;  %v1405_v45 = vsel %vm1357_vm2, %v1340_v35, %v3988_v56  ;;  %v3303_v56 = vld [vmem:[%s4465_s17 + $0x400] sm:$0xff] }
 0x152   : > { %v1470_v48 = vsel %vm1422_vm3, %v1405_v45, %v3993_v13  ;;  %v3304_v13 = vld [vmem:[%s4465_s17 + $0x408] sm:$0xff]  ;;  %v1945_v45 = vld [vmem:[%s4465_s17 + $0x10] sm:$0xff]  ;;  %1033 = vrot.lane.b32.xlu1 %v5424_v54, %s4321_s30 }
 0x153   : > { %1679 = vmatmul.f32.gmra.mxu2 %v1469_v39  ;;  %1888 = vmatmul.f32.gmra.mxu3 %v1469_v39  ;;  %v1543_v39 = vadd.f32 %v5277_v51, %v5365_v32  ;;  %v3959_v51 = vunpack.i.h.bf16 %v5239_v11  ;;  %v1314_v11 = vsel %vm1292_vm1, %v4166_v14, %v3954_v63  ;;  %v2467_v29 = vmul.f32 %v3304_v13, %v1752_v17  ;;  %v1948_v14 = vld [vmem:[%s4465_s17 + $0x28] sm:$0xff] }
 0x154   : > { %v5342_v43 = vpop.permute.xlu1 %4001  ;;  %v5349_v49 = vpop.permute.xlu2 %4006  ;;  %v2073_v46 = vmul.f32 %v1945_v45, %v1546_v24  ;;  %v3979_v13 = vunpack.i.h.bf16 %v5293_v53  ;;  %v3435_v45 = vld [vmem:[%s4465_s17 + $0x820] sm:$0xff]  ;;  %v694_v53 = vsel %vm541_vm0, %v691_v2, %v693_v4 }
 0x155   : > { %v4003_v47 = vunpack.i.l.bf16 %v5342_v43  ;;  %v4008_v59 = vunpack.i.l.bf16 %v5349_v49  ;;  %v2466_v28 = vmul.f32 %v3303_v56, %v1543_v39  ;;  %v2861_v15 = vmul.f32 %v3431_v26, %v1543_v39  ;;  %1222 = vrot.lane.b32.xlu2 %v694_v53, %s4323_s12 }
 0x156   : > { %v5336_v42 = vpop.f32.mrf.mxu0  ;;  %v5338_v6 = vpop.f32.mrf.mxu1 }
 0x157   : > { %v5340_v19 = vpop.permute.xlu0 %3996 }
 0x158   : > { %v3998_v40 = vunpack.i.l.bf16 %v5340_v19 }
 0x159   : > { %1595 = vmatmul.f32.gmra.mxu0 %v1441_v38  ;;  %1804 = vmatmul.f32.gmra.mxu1 %v1441_v38  ;;  %v3964_v38 = vunpack.i.h.bf16 %v5250_v18  ;;  %v2071_v18 = vmul.f32 %v1943_v27, %v1543_v39  ;;  %v2862_v39 = vmul.f32 %v3432_v5, %v1752_v17  ;;  %v3436_v5 = vld [vmem:[%s4465_s17 + $0x828] sm:$0xff] }
 0x15a   : > { %v1341_v55 = vsel %vm1292_vm1, %v4163_v37, %v3998_v40  ;;  %v3433_v40 = vld [vmem:[%s4465_s17 + $0x810] sm:$0xff]  ;;  %v3306_v37 = vld [vmem:[%s4465_s17 + $0x418] sm:$0xff] }
 0x15b   : > { %1682 = vmatmul.f32.gmra.mxu2 %v1470_v48  ;;  %1891 = vmatmul.f32.gmra.mxu3 %v1470_v48  ;;  %v1406_v7 = vsel %vm1357_vm2, %v1341_v55, %v4003_v47  ;;  %v3305_v48 = vld [vmem:[%s4465_s17 + $0x410] sm:$0xff]  ;;  %v3969_v47 = vunpack.i.h.bf16 %v5268_v16  ;;  %v2863_v10 = vmul.f32 %v3433_v40, %v1546_v24  ;;  %v2469_v50 = vmul.f32 %v3306_v37, %v1755_v61 }
 0x15c   : > { %v5383_v36 = vpop.permute.xlu1 %4016  ;;  %v1471_v57 = vsel %vm1422_vm3, %v1406_v7, %v4008_v59  ;;  %v5393_v60 = vpop.permute.xlu2 %4021  ;;  %v2072_v59 = vmul.f32 %v1944_v30, %v1752_v17  ;;  %v1379_v7 = vsel %vm1357_vm2, %v1314_v11, %v3959_v51  ;;  %v2468_v63 = vmul.f32 %v3305_v48, %v1546_v24  ;;  %v4167_v17 = vld [vmem:[%s4479_s10 + $0xb0] sm:$0xff] }
 0x15d   : > { %v4018_v3 = vunpack.i.l.bf16 %v5383_v36  ;;  %v4023_v0 = vunpack.i.l.bf16 %v5393_v60  ;;  %v2864_v51 = vmul.f32 %v3434_v20, %v1755_v61  ;;  %v1758_v30 = vadd.f32 %v5338_v6, %v5372_v52 }
 0x15e   : > { %v5374_v44 = vpop.f32.mrf.mxu0  ;;  %v5376_v8 = vpop.f32.mrf.mxu1  ;;  %v3989_v11 = vunpack.i.h.bf16 %v5314_v58  ;;  %v1444_v48 = vsel %vm1422_vm3, %v1379_v7, %v3964_v38  ;;  %v2199_v6 = vadd.f32 %v2073_v46, %v2071_v18  ;;  %v2594_v40 = vadd.f32 %v2468_v63, %v2466_v28 }
 0x15f   : > { %v5381_v22 = vpop.permute.xlu0 %4011  ;;  %v3058_v38 = vadd.f32 %v2864_v51, %v2862_v39  ;;  %v2076_v12 = vmul.f32 %v1948_v14, %v1758_v30  ;;  %v2866_v28 = vmul.f32 %v3436_v5, %v1758_v30  ;;  %v1552_v7 = vadd.f32 %v5374_v44, %v5365_v32  ;;  %v4169_v39 = vld [vmem:[%s4479_s10 + $0x190] sm:$0xff]  ;;  %v1949_v51 = vld [vmem:[%s4465_s17 + $0x30] sm:$0xff] }
 0x160   : > { %v4013_v41 = vunpack.i.l.bf16 %v5381_v22  ;;  %v3994_v46 = vunpack.i.h.bf16 %v5323_v62  ;;  %v4004_v44 = vunpack.i.h.bf16 %v5342_v43  ;;  %v3437_v43 = vld [vmem:[%s4465_s17 + $0x830] sm:$0xff]  ;;  %v1761_v53 = vadd.f32 %v5376_v8, %v5372_v52 }
 0x161   : > { %1598 = vmatmul.f32.gmra.mxu0 %v1442_v1  ;;  %1807 = vmatmul.f32.gmra.mxu1 %v1442_v1  ;;  %v2074_v1 = vmul.f32 %v1946_v9, %v1755_v61  ;;  %v3984_v61 = vunpack.i.h.bf16 %v5304_v31  ;;  %v2989_v9 = vadd.f32 %v2863_v10, %v2861_v15 }
 0x162   : > { %v1342_v35 = vsel %vm1292_vm1, %v4165_v34, %v4013_v41  ;;  %v1947_v34 = vld [vmem:[%s4465_s17 + $0x20] sm:$0xff] }
 0x163   : > { %1685 = vmatmul.f32.gmra.mxu2 %v1471_v57  ;;  %1894 = vmatmul.f32.gmra.mxu3 %v1471_v57  ;;  %v1407_v55 = vsel %vm1357_vm2, %v1342_v35, %v4018_v3  ;;  %v1549_v3 = vadd.f32 %v5336_v42, %v5365_v32  ;;  %v3307_v35 = vld [vmem:[%s4465_s17 + $0x420] sm:$0xff]  ;;  %v1315_v42 = vsel %vm1292_vm1, %v4167_v17, %v3969_v47 }
 0x164   : > { %v1472_v27 = vsel %vm1422_vm3, %v1407_v55, %v4023_v0  ;;  %v5444_v26 = vpop.permute.xlu1 %4031  ;;  %v5453_v24 = vpop.permute.xlu2 %4036  ;;  %v2268_v47 = vadd.f32 %v2074_v1, %v2072_v59  ;;  %v3308_v0 = vld [vmem:[%s4465_s17 + $0x428] sm:$0xff]  ;;  %v1380_v58 = vsel %vm1357_vm2, %v1315_v42, %v3974_v33 }
 0x165   : > { %v2075_v31 = vmul.f32 %v1947_v34, %v1549_v3  ;;  %v2470_v37 = vmul.f32 %v3307_v35, %v1549_v3  ;;  %v2865_v55 = vmul.f32 %v3435_v45, %v1549_v3  ;;  %v2471_v18 = vmul.f32 %v3308_v0, %v1758_v30  ;;  %v3309_v34 = vld [vmem:[%s4465_s17 + $0x430] sm:$0xff]  ;;  %v3438_v0 = vld [vmem:[%s4465_s17 + $0x838] sm:$0xff] }
 0x166   : > { %v5427_v16 = vpop.f32.mrf.mxu0  ;;  %v5429_v23 = vpop.f32.mrf.mxu1  ;;  %v4033_v20 = vunpack.i.l.bf16 %v5444_v26  ;;  %v5481_v63 = vsel %vm1422_vm3, %v1380_v58, %v3979_v13  ;;  %v3999_v35 = vunpack.i.h.bf16 %v5340_v19  ;;  %v2269_v17 = vadd.f32 %v2268_v47, %v2076_v12  ;;  %v3310_v47 = vld [vmem:[%s4465_s17 + $0x438] sm:$0xff]  ;;  %v4170_v58 = vld [vmem:[%s4479_s10 + $0xc0] sm:$0xff]  ;;  %v3311_v12 = vld [vmem:[%s4465_s17 + $0x440] sm:$0xff] }
 0x167   : > { %v5435_v57 = vpop.f32.mrf.mxu2  ;;  %v5437_v41 = vpop.f32.mrf.mxu3  ;;  %v2200_v3 = vadd.f32 %v2199_v6, %v2075_v31  ;;  %v2990_v13 = vadd.f32 %v2989_v9, %v2865_v55  ;;  %v4038_v45 = vunpack.i.l.bf16 %v5453_v24  ;;  %v1950_v9 = vld [vmem:[%s4465_s17 + $0x38] sm:$0xff]  ;;  %v1555_v5 = vadd.f32 %v5427_v16, %v5365_v32  ;;  %v1951_v31 = vld [vmem:[%s4465_s17 + $0x40] sm:$0xff] }
 0x168   : > { %v5442_v56 = vpop.permute.xlu0 %4026  ;;  %v1764_v8 = vadd.f32 %v5429_v23, %v5372_v52  ;;  %v2867_v55 = vmul.f32 %v3437_v43, %v1552_v7  ;;  %v4019_v16 = vunpack.i.h.bf16 %v5383_v36  ;;  %v2078_v23 = vmul.f32 %v1950_v9, %v1761_v53 }
 0x169   : > { %1601 = vmatmul.f32.gmra.mxu0 %v1443_v21  ;;  %1810 = vmatmul.f32.gmra.mxu1 %v1443_v21  ;;  %v2663_v21 = vadd.f32 %v2469_v50, %v2467_v29  ;;  %v4028_v2 = vunpack.i.l.bf16 %v5442_v56  ;;  %v4168_v29 = vld [vmem:[%s4479_s10 + $0xb8] sm:$0xff]  ;;  %v2474_v43 = vmul.f32 %v3311_v12, %v1555_v5 }
 0x16a   : > { %v1316_v33 = vsel %vm1292_vm1, %v4168_v29, %v3984_v61  ;;  %v3059_v61 = vadd.f32 %v3058_v38, %v2866_v28  ;;  %v1317_v38 = vsel %vm1292_vm1, %v4170_v58, %v3999_v35  ;;  %v2473_v29 = vmul.f32 %v3310_v47, %v1761_v53  ;;  %v3440_v35 = vld [vmem:[%s4465_s17 + $0x848] sm:$0xff] }
 0x16b   : > { %1688 = vmatmul.f32.gmra.mxu2 %v1472_v27  ;;  %1897 = vmatmul.f32.gmra.mxu3 %v1472_v27  ;;  %v1343_v50 = vsel %vm1292_vm1, %v4169_v39, %v4028_v2  ;;  %v2595_v27 = vadd.f32 %v2594_v40, %v2470_v37  ;;  %v1381_v42 = vsel %vm1357_vm2, %v1316_v33, %v3989_v11  ;;  %v695_v37 = vrot.slane %v5424_v54, 1  ;;  %v3439_v2 = vld [vmem:[%s4465_s17 + $0x840] sm:$0xff] }
 0x16c   : > { %v5495_v30 = vpop.permute.xlu1 %4046  ;;  %v5499_v14 = vpop.permute.xlu2 %4051  ;;  %v2664_v19 = vadd.f32 %v2663_v21, %v2471_v18  ;;  %v1408_v6 = vsel %vm1357_vm2, %v1343_v50, %v4033_v20  ;;  %v2077_v40 = vmul.f32 %v1949_v51, %v1552_v7  ;;  %v2472_v11 = vmul.f32 %v3309_v34, %v1552_v7  ;;  %v1952_v18 = vld [vmem:[%s4465_s17 + $0x48] sm:$0xff] }
 0x16d   : > { %v4009_v21 = vunpack.i.h.bf16 %v5349_v49  ;;  %v4014_v49 = vunpack.i.h.bf16 %v5381_v22  ;;  %v1473_v28 = vsel %vm1422_vm3, %v1408_v6, %v4038_v45  ;;  %v2868_v33 = vmul.f32 %v3438_v0, %v1761_v53  ;;  %v3312_v20 = vld [vmem:[%s4465_s17 + $0x448] sm:$0xff] }
 0x16e   : > { %v5470_v15 = vpop.f32.mrf.mxu0  ;;  %v5472_v59 = vpop.f32.mrf.mxu1  ;;  %v2201_v50 = vadd.f32 %v2200_v3, %v2077_v40  ;;  %v2596_v51 = vadd.f32 %v2595_v27, %v2472_v11  ;;  %v2079_v34 = vmul.f32 %v1951_v31, %v1555_v5  ;;  %v1382_v22 = vsel %vm1357_vm2, %v1317_v38, %v4004_v44  ;;  %v1953_v31 = vld [vmem:[%s4465_s17 + $0x50] sm:$0xff] }
 0x16f   : > { %v5483_v10 = vpop.f32.mrf.mxu2  ;;  %v5485_v1 = vpop.f32.mrf.mxu3  ;;  %v2869_v53 = vmul.f32 %v3439_v2, %v1555_v5  ;;  %v2080_v6 = vmul.f32 %v1952_v18, %v1764_v8  ;;  %v696_v3 = vsel %vm541_vm0, %v693_v4, %v695_v37  ;;  %v2991_v27 = vadd.f32 %v2990_v13, %v2867_v55  ;;  %v4171_v4 = vld [vmem:[%s4479_s10 + $0x198] sm:$0xff]  ;;  %v3313_v2 = vld [vmem:[%s4465_s17 + $0x450] sm:$0xff] }
 0x170   : > { %v5493_v62 = vpop.permute.xlu0 %4041  ;;  %v2475_v40 = vmul.f32 %v3312_v20, %v1764_v8  ;;  %v1558_v44 = vadd.f32 %v5470_v15, %v5365_v32  ;;  %v4048_v11 = vunpack.i.l.bf16 %v5495_v30  ;;  %v2270_v0 = vadd.f32 %v2269_v17, %v2078_v23  ;;  %1224 = vrot.lane.b32.xlu2 %v696_v3, %s4323_s12  ;;  %v3441_v18 = vld [vmem:[%s4465_s17 + $0x850] sm:$0xff]  ;;  %v1954_v23 = vld [vmem:[%s4465_s17 + $0x58] sm:$0xff]  ;;  %v3315_v3 = vld [vmem:[%s4465_s17 + $0x460] sm:$0xff] }
 0x171   : > { %1604 = vmatmul.f32.gmra.mxu0 %v1444_v48  ;;  %1813 = vmatmul.f32.gmra.mxu1 %v1444_v48  ;;  %v5515_v48 = vsel %vm1422_vm3, %v1381_v42, %v3994_v46  ;;  %v4043_v7 = vunpack.i.l.bf16 %v5493_v62  ;;  %v2870_v5 = vmul.f32 %v3440_v35, %v1764_v8  ;;  %v4053_v25 = vunpack.i.l.bf16 %v5499_v14  ;;  %v4172_v35 = vld [vmem:[%s4479_s10 + $0xc8] sm:$0xff] }
 0x172   : > { %v2665_v15 = vadd.f32 %v2664_v19, %v2473_v29  ;;  %v3060_v58 = vadd.f32 %v3059_v61, %v2868_v33  ;;  %v2202_v38 = vadd.f32 %v2201_v50, %v2079_v34  ;;  %v5553_v55 = vsel %vm1422_vm3, %v1382_v22, %v4009_v21  ;;  %v3314_v21 = vld [vmem:[%s4465_s17 + $0x458] sm:$0xff]  ;;  %v1955_v50 = vld [vmem:[%s4465_s17 + $0x60] sm:$0xff] }
 0x173   : > { %1691 = vmatmul.f32.gmra.mxu2 %v1473_v28  ;;  %1900 = vmatmul.f32.gmra.mxu3 %v1473_v28  ;;  %v1344_v13 = vsel %vm1292_vm1, %v4171_v4, %v4043_v7  ;;  %v2992_v8 = vadd.f32 %v2991_v27, %v2869_v53  ;;  %v2271_v12 = vadd.f32 %v2270_v0, %v2080_v6  ;;  %v3442_v29 = vld [vmem:[%s4465_s17 + $0x858] sm:$0xff]  ;;  %v3443_v27 = vld [vmem:[%s4465_s17 + $0x860] sm:$0xff] }
 0x174   : > { %v5545_v47 = vpop.permute.xlu1 %4061  ;;  %v5556_v17 = vpop.permute.xlu2 %4066  ;;  %v1767_v19 = vadd.f32 %v5472_v59, %v5372_v52  ;;  %v2666_v28 = vadd.f32 %v2665_v15, %v2475_v40  ;;  %v2081_v61 = vmul.f32 %v1953_v31, %v1558_v44  ;;  %v1409_v20 = vsel %vm1357_vm2, %v1344_v13, %v4048_v11 }
 0x175   : > { %v3061_v7 = vadd.f32 %v3060_v58, %v2870_v5  ;;  %v1318_v22 = vsel %vm1292_vm1, %v4172_v35, %v4014_v49  ;;  %v1474_v59 = vsel %vm1422_vm3, %v1409_v20, %v4053_v25  ;;  %v2476_v53 = vmul.f32 %v3313_v2, %v1558_v44  ;;  %v1956_v25 = vld [vmem:[%s4465_s17 + $0x68] sm:$0xff]  ;;  %v1957_v35 = vld [vmem:[%s4465_s17 + $0x70] sm:$0xff] }
 0x176   : > { %v1560_v46 = vpop.f32.mrf.mxu0  ;;  %v1769_v39 = vpop.f32.mrf.mxu1  ;;  %v2871_v6 = vmul.f32 %v3441_v18, %v1558_v44  ;;  %v4024_v40 = vunpack.i.h.bf16 %v5393_v60  ;;  %v2082_v0 = vmul.f32 %v1954_v23, %v1767_v19  ;;  %v2477_v5 = vmul.f32 %v3314_v21, %v1767_v19  ;;  %v3316_v18 = vld [vmem:[%s4465_s17 + $0x468] sm:$0xff] }
 0x177   : > { %v5530_v42 = vpop.f32.mrf.mxu2  ;;  %v5532_v45 = vpop.f32.mrf.mxu3  ;;  %v1561_v33 = vadd.f32 %v1560_v46, %v5365_v32  ;;  %v1770_v46 = vadd.f32 %v1769_v39, %v5372_v52  ;;  %v2872_v31 = vmul.f32 %v3442_v29, %v1767_v19  ;;  %v4029_v44 = vunpack.i.h.bf16 %v5442_v56  ;;  %v3444_v19 = vld [vmem:[%s4465_s17 + $0x868] sm:$0xff]  ;;  %v1961_v56 = vld [vmem:[%s4465_s17 + $0x90] sm:$0xff] }
 0x178   : > { %v5534_v9 = vpop.permute.xlu0 %4056  ;;  %v2203_v4 = vadd.f32 %v2202_v38, %v2081_v61  ;;  %v1383_v60 = vsel %vm1357_vm2, %v1318_v22, %v4019_v16  ;;  %v4063_v39 = vunpack.i.l.bf16 %v5545_v47  ;;  %v4068_v38 = vunpack.i.l.bf16 %v5556_v17  ;;  %v4173_v61 = vld [vmem:[%s4479_s10 + $0x1a0] sm:$0xff] }
 0x179   : > { %1607 = vmatmul.f32.gmra.mxu0 %v5481_v63  ;;  %1816 = vmatmul.f32.gmra.mxu1 %v5481_v63  ;;  %v2597_v63 = vadd.f32 %v2596_v51, %v2474_v43  ;;  %v4058_v43 = vunpack.i.l.bf16 %v5534_v9  ;;  %v2083_v13 = vmul.f32 %v1955_v50, %v1561_v33  ;;  %v2478_v58 = vmul.f32 %v3315_v3, %v1561_v33 }
 0x17a   : > { %v2873_v2 = vmul.f32 %v3443_v27, %v1561_v33  ;;  %v2993_v16 = vadd.f32 %v2992_v8, %v2871_v6  ;;  %v2084_v21 = vmul.f32 %v1956_v25, %v1770_v46  ;;  %v2272_v33 = vadd.f32 %v2271_v12, %v2082_v0  ;;  %v3318_v27 = vld [vmem:[%s4465_s17 + $0x478] sm:$0xff] }
 0x17b   : > { %1694 = vmatmul.f32.gmra.mxu2 %v1474_v59  ;;  %1903 = vmatmul.f32.gmra.mxu3 %v1474_v59  ;;  %v1345_v36 = vsel %vm1292_vm1, %v4173_v61, %v4058_v43  ;;  %v2598_v23 = vadd.f32 %v2597_v63, %v2476_v53  ;;  %v2667_v50 = vadd.f32 %v2666_v28, %v2477_v5  ;;  %v3317_v43 = vld [vmem:[%s4465_s17 + $0x470] sm:$0xff]  ;;  %v3446_v0 = vld [vmem:[%s4465_s17 + $0x878] sm:$0xff]  ;;  %v698_v61 = vsel %vm541_vm0, %v695_v37, 0.0  ;;  %v3448_v37 = vld [vmem:[%s4465_s17 + $0x888] sm:$0xff] }
 0x17c   : > { %v5596_v20 = vpop.permute.xlu1 %4076  ;;  %v5600_v22 = vsel %vm1422_vm3, %v1383_v60, %v4024_v40  ;;  %v2479_v59 = vmul.f32 %v3316_v18, %v1770_v46  ;;  %v2874_v3 = vmul.f32 %v3444_v19, %v1770_v46  ;;  %v3445_v63 = vld [vmem:[%s4465_s17 + $0x870] sm:$0xff]  ;;  %v5606_v53 = vpop.permute.xlu2 %4081  ;;  %v2204_v12 = vadd.f32 %v2203_v4, %v2083_v13  ;;  %v3319_v4 = vld [vmem:[%s4465_s17 + $0x480] sm:$0xff]  ;;  %1226 = vrot.lane.b32.xlu2 %v698_v61, %s4323_s12 }
 0x17d   : > { %v2599_v28 = vadd.f32 %v2598_v23, %v2478_v58  ;;  %v2994_v6 = vadd.f32 %v2993_v16, %v2873_v2  ;;  %v3447_v19 = vld [vmem:[%s4465_s17 + $0x880] sm:$0xff] }
 0x17e   : > { %v1563_v51 = vpop.f32.mrf.mxu0  ;;  %v1772_v34 = vpop.f32.mrf.mxu1 }
 0x17f   : > { %v5576_v11 = vpop.f32.mrf.mxu2  ;;  %v5578_v49 = vpop.f32.mrf.mxu3  ;;  %v1564_v29 = vadd.f32 %v1563_v51, %v5365_v32  ;;  %v1773_v8 = vadd.f32 %v1772_v34, %v5372_v52  ;;  %v1410_v51 = vsel %vm1357_vm2, %v1345_v36, %v4063_v39  ;;  %v4034_v34 = vunpack.i.h.bf16 %v5444_v26  ;;  %v1959_v39 = vld [vmem:[%s4465_s17 + $0x80] sm:$0xff] }
 0x180   : > { %v5587_v15 = vpop.permute.xlu0 %4071  ;;  %v1475_v46 = vsel %vm1422_vm3, %v1410_v51, %v4068_v38  ;;  %v2668_v36 = vadd.f32 %v2667_v50, %v2479_v59  ;;  %v4078_v59 = vunpack.i.l.bf16 %v5596_v20 }
 0x181   : > { %1610 = vmatmul.f32.gmra.mxu0 %v5515_v48  ;;  %1819 = vmatmul.f32.gmra.mxu1 %v5515_v48  ;;  %v3062_v48 = vadd.f32 %v3061_v7, %v2872_v31  ;;  %v1958_v7 = vld [vmem:[%s4465_s17 + $0x78] sm:$0xff]  ;;  %v2273_v31 = vadd.f32 %v2272_v33, %v2084_v21  ;;  %v2085_v25 = vmul.f32 %v1957_v35, %v1564_v29  ;;  %v1960_v33 = vld [vmem:[%s4465_s17 + $0x88] sm:$0xff] }
 0x182   : > { %v2480_v2 = vmul.f32 %v3317_v43, %v1564_v29  ;;  %v2875_v18 = vmul.f32 %v3445_v63, %v1564_v29  ;;  %v2086_v23 = vmul.f32 %v1958_v7, %v1773_v8  ;;  %v2481_v16 = vmul.f32 %v3318_v27, %v1773_v8  ;;  %v3320_v35 = vld [vmem:[%s4465_s17 + $0x488] sm:$0xff] }
 0x183   : > { %1697 = vmatmul.f32.gmra.mxu2 %v1475_v46  ;;  %1906 = vmatmul.f32.gmra.mxu3 %v1475_v46  ;;  %v2876_v21 = vmul.f32 %v3446_v0, %v1773_v8  ;;  %v3063_v51 = vadd.f32 %v3062_v48, %v2874_v3  ;;  %v4073_v63 = vunpack.i.l.bf16 %v5587_v15  ;;  %v2205_v54 = vadd.f32 %v2204_v12, %v2085_v25 }
 0x184   : > { %v2995_v3 = vadd.f32 %v2994_v6, %v2875_v18  ;;  %v2274_v7 = vadd.f32 %v2273_v31, %v2086_v23  ;;  %v2669_v27 = vadd.f32 %v2668_v36, %v2481_v16  ;;  %v5641_v46 = vpop.permute.xlu1 %4091  ;;  %v3449_v6 = vld [vmem:[%s4465_s17 + $0x890] sm:$0xff]  ;;  %v1962_v18 = vld [vmem:[%s4465_s17 + $0x98] sm:$0xff] }
 0x185   : > { %v3064_v0 = vadd.f32 %v3063_v51, %v2876_v21  ;;  %v3322_v16 = vld [vmem:[%s4465_s17 + $0x498] sm:$0xff] }
 0x186   : > { %v1566_v40 = vpop.f32.mrf.mxu0  ;;  %v1775_v5 = vpop.f32.mrf.mxu1  ;;  %v3450_v21 = vld [vmem:[%s4465_s17 + $0x898] sm:$0xff] }
 0x187   : > { %v1567_v60 = vadd.f32 %v1566_v40, %v5365_v32  ;;  %v5616_v13 = vpop.f32.mrf.mxu2  ;;  %v5618_v58 = vpop.f32.mrf.mxu3  ;;  %v1776_v38 = vadd.f32 %v1775_v5, %v5372_v52  ;;  %v4174_v5 = vld [vmem:[%s4479_s10 + $0xd0] sm:$0xff] }
 0x188   : > { %v1319_v50 = vsel %vm1292_vm1, %v4174_v5, %v4029_v44  ;;  %v5637_v48 = vpop.permute.xlu0 %4086  ;;  %v4083_v44 = vunpack.i.l.bf16 %v5606_v53 }
 0x189   : > { %1613 = vmatmul.f32.gmra.mxu0 %v5553_v55  ;;  %v2087_v43 = vmul.f32 %v1959_v39, %v1567_v60  ;;  %v2482_v29 = vmul.f32 %v3319_v4, %v1567_v60  ;;  %1822 = vmatmul.f32.gmra.mxu1 %v5553_v55  ;;  %v2877_v40 = vmul.f32 %v3447_v19, %v1567_v60  ;;  %v4175_v19 = vld [vmem:[%s4479_s10 + $0x1a8] sm:$0xff] }
 0x18a   : > { %v2600_v55 = vadd.f32 %v2599_v28, %v2480_v2  ;;  %v2088_v8 = vmul.f32 %v1960_v33, %v1776_v38  ;;  %v2483_v12 = vmul.f32 %v3320_v35, %v1776_v38  ;;  %v2878_v39 = vmul.f32 %v3448_v37, %v1776_v38  ;;  %v3321_v28 = vld [vmem:[%s4465_s17 + $0x490] sm:$0xff] }
 0x18b   : > { %v2206_v25 = vadd.f32 %v2205_v54, %v2087_v43  ;;  %v1346_v31 = vsel %vm1292_vm1, %v4175_v19, %v4073_v63  ;;  %v2996_v61 = vadd.f32 %v2995_v3, %v2877_v40  ;;  %v4088_v54 = vunpack.i.l.bf16 %v5637_v48 }
 0x18c   : > { %v2601_v60 = vadd.f32 %v2600_v55, %v2482_v29  ;;  %v1411_v33 = vsel %vm1357_vm2, %v1346_v31, %v4078_v59  ;;  %v2275_v51 = vadd.f32 %v2274_v7, %v2088_v8  ;;  %v2670_v43 = vadd.f32 %v2669_v27, %v2483_v12  ;;  %v5660_v55 = vpop.permute.xlu2 %4096  ;;  %v3451_v31 = vld [vmem:[%s4465_s17 + $0x8a0] sm:$0xff] }
 0x18d   : > { %v1476_v29 = vsel %vm1422_vm3, %v1411_v33, %v4083_v44  ;;  %v3065_v59 = vadd.f32 %v3064_v0, %v2878_v39  ;;  %v4093_v8 = vunpack.i.l.bf16 %v5641_v46  ;;  %v4039_v44 = vunpack.i.h.bf16 %v5453_v24  ;;  %v1963_v39 = vld [vmem:[%s4465_s17 + $0xa0] sm:$0xff] }
 0x18e   : > { %v1569_v4 = vpop.f32.mrf.mxu0  ;;  %v1778_v2 = vpop.f32.mrf.mxu1  ;;  %1700 = vmatmul.f32.gmra.mxu2 %v1476_v29  ;;  %1909 = vmatmul.f32.gmra.mxu3 %v1476_v29  ;;  %v3323_v24 = vld [vmem:[%s4465_s17 + $0x4a0] sm:$0xff] }
 0x18f   : > { %v1570_v36 = vadd.f32 %v1569_v4, %v5365_v32  ;;  %v1779_v23 = vadd.f32 %v1778_v2, %v5372_v52  ;;  %v5653_v35 = vpop.f32.mrf.mxu2  ;;  %v5655_v38 = vpop.f32.mrf.mxu3 }
 0x190   : > { %v5672_v2 = vpop.permute.xlu0 %4101 }
 0x191   : > { %v2089_v63 = vmul.f32 %v1961_v56, %v1570_v36  ;;  %v2484_v40 = vmul.f32 %v3321_v28, %v1570_v36  ;;  %v2879_v37 = vmul.f32 %v3449_v6, %v1570_v36  ;;  %v2090_v5 = vmul.f32 %v1962_v18, %v1779_v23  ;;  %1616 = vmatmul.f32.gmra.mxu0 %v5600_v22  ;;  %v4176_v6 = vld [vmem:[%s4479_s10 + $0x1b0] sm:$0xff]  ;;  %v1964_v36 = vld [vmem:[%s4465_s17 + $0xa8] sm:$0xff] }
 0x192   : > { %v2485_v3 = vmul.f32 %v3322_v16, %v1779_v23  ;;  %v2880_v4 = vmul.f32 %v3450_v21, %v1779_v23  ;;  %1825 = vmatmul.f32.gmra.mxu1 %v5600_v22  ;;  %v1384_v22 = vsel %vm1357_vm2, %v1319_v50, %v4034_v34  ;;  %v4044_v18 = vunpack.i.h.bf16 %v5493_v62  ;;  %v3324_v50 = vld [vmem:[%s4465_s17 + $0x4a8] sm:$0xff] }
 0x193   : > { %v2207_v12 = vadd.f32 %v2206_v25, %v2089_v63  ;;  %v2602_v7 = vadd.f32 %v2601_v60, %v2484_v40  ;;  %v2997_v27 = vadd.f32 %v2996_v61, %v2879_v37  ;;  %v2276_v56 = vadd.f32 %v2275_v51, %v2090_v5  ;;  %v3452_v16 = vld [vmem:[%s4465_s17 + $0x8a8] sm:$0xff]  ;;  %v5690_v37 = vpop.permute.xlu1 %4106 }
 0x194   : > { %v2671_v28 = vadd.f32 %v2670_v43, %v2485_v3  ;;  %v3066_v0 = vadd.f32 %v3065_v59, %v2880_v4  ;;  %v4098_v25 = vunpack.i.l.bf16 %v5660_v55  ;;  %v1347_v60 = vsel %vm1292_vm1, %v4176_v6, %v4088_v54  ;;  %v4177_v3 = vld [vmem:[%s4479_s10 + $0xd8] sm:$0xff] }
 0x195   : > { %v1412_v23 = vsel %vm1357_vm2, %v1347_v60, %v4093_v8  ;;  %v4049_v62 = vunpack.i.h.bf16 %v5495_v30  ;;  %v1449_v51 = vsel %vm1422_vm3, %v1384_v22, %v4039_v44  ;;  %v1320_v4 = vsel %vm1292_vm1, %v4177_v3, %v4044_v18 }
 0x196   : > { %v1572_v19 = vpop.f32.mrf.mxu0  ;;  %v1781_v61 = vpop.f32.mrf.mxu1  ;;  %v1477_v43 = vsel %vm1422_vm3, %v1412_v23, %v4098_v25  ;;  %v4103_v30 = vunpack.i.l.bf16 %v5672_v2  ;;  %v4054_v6 = vunpack.i.h.bf16 %v5499_v14  ;;  %v4108_v18 = vunpack.i.l.bf16 %v5690_v37 }
 0x197   : > { %v1573_v26 = vadd.f32 %v1572_v19, %v5365_v32  ;;  %v1782_v34 = vadd.f32 %v1781_v61, %v5372_v52  ;;  %v5683_v21 = vpop.f32.mrf.mxu2  ;;  %v5685_v33 = vpop.f32.mrf.mxu3  ;;  %1703 = vmatmul.f32.gmra.mxu2 %v1477_v43  ;;  %1912 = vmatmul.f32.gmra.mxu3 %v1477_v43 }
 0x198   : > { %v5695_v25 = vpop.permute.xlu2 %4111 }
 0x199   : > { %v2091_v29 = vmul.f32 %v1963_v39, %v1573_v26  ;;  %v2486_v54 = vmul.f32 %v3323_v24, %v1573_v26  ;;  %v2881_v63 = vmul.f32 %v3451_v31, %v1573_v26  ;;  %v2092_v40 = vmul.f32 %v1964_v36, %v1782_v34  ;;  %1619 = vmatmul.f32.gmra.mxu0 %v1449_v51  ;;  %v1965_v24 = vld [vmem:[%s4465_s17 + $0xb0] sm:$0xff]  ;;  %v1966_v36 = vld [vmem:[%s4465_s17 + $0xb8] sm:$0xff]  ;;  %v4178_v26 = vld [vmem:[%s4479_s10 + $0x1b8] sm:$0xff] }
 0x19a   : > { %v2487_v5 = vmul.f32 %v3324_v50, %v1782_v34  ;;  %v2882_v59 = vmul.f32 %v3452_v16, %v1782_v34  ;;  %1828 = vmatmul.f32.gmra.mxu1 %v1449_v51  ;;  %v1385_v31 = vsel %vm1357_vm2, %v1320_v4, %v4049_v62  ;;  %v4113_v23 = vunpack.i.l.bf16 %v5695_v25  ;;  %v3326_v34 = vld [vmem:[%s4465_s17 + $0x4b8] sm:$0xff] }
 0x19b   : > { %v2208_v8 = vadd.f32 %v2207_v12, %v2091_v29  ;;  %v2603_v44 = vadd.f32 %v2602_v7, %v2486_v54  ;;  %v2998_v39 = vadd.f32 %v2997_v27, %v2881_v63  ;;  %v2277_v22 = vadd.f32 %v2276_v56, %v2092_v40  ;;  %v3325_v27 = vld [vmem:[%s4465_s17 + $0x4b0] sm:$0xff]  ;;  %v3454_v50 = vld [vmem:[%s4465_s17 + $0x8b8] sm:$0xff] }
 0x19c   : > { %v2672_v60 = vadd.f32 %v2671_v28, %v2487_v5  ;;  %v3067_v19 = vadd.f32 %v3066_v0, %v2882_v59  ;;  %v4059_v12 = vunpack.i.h.bf16 %v5534_v9  ;;  %v3453_v56 = vld [vmem:[%s4465_s17 + $0x8b0] sm:$0xff]  ;;  %v1348_v14 = vsel %vm1292_vm1, %v4178_v26, %v4103_v30  ;;  %v5720_v59 = vpop.permute.xlu0 %4116  ;;  %v3455_v26 = vld [vmem:[%s4465_s17 + $0x8c0] sm:$0xff] }
 0x19d   : > { %v4064_v62 = vunpack.i.h.bf16 %v5545_v47  ;;  %v4069_v51 = vunpack.i.h.bf16 %v5556_v17  ;;  %v1450_v43 = vsel %vm1422_vm3, %v1385_v31, %v4054_v6  ;;  %v1413_v29 = vsel %vm1357_vm2, %v1348_v14, %v4108_v18  ;;  %v4179_v30 = vld [vmem:[%s4479_s10 + $0xe0] sm:$0xff]  ;;  %v5725_v31 = vpop.permute.xlu1 %4121 }
 0x19e   : > { %v1575_v7 = vpop.f32.mrf.mxu0  ;;  %v1784_v61 = vpop.f32.mrf.mxu1  ;;  %v1321_v47 = vsel %vm1292_vm1, %v4179_v30, %v4059_v12  ;;  %v1478_v17 = vsel %vm1422_vm3, %v1413_v29, %v4113_v23  ;;  %v4118_v12 = vunpack.i.l.bf16 %v5720_v59  ;;  %v3327_v23 = vld [vmem:[%s4465_s17 + $0x4c0] sm:$0xff]  ;;  %v4084_v14 = vunpack.i.h.bf16 %v5606_v53  ;;  %v4181_v53 = vld [vmem:[%s4479_s10 + $0x1c0] sm:$0xff] }
 0x19f   : > { %v1576_v28 = vadd.f32 %v1575_v7, %v5365_v32  ;;  %v1785_v0 = vadd.f32 %v1784_v61, %v5372_v52  ;;  %v5712_v16 = vpop.f32.mrf.mxu2  ;;  %v5714_v9 = vpop.f32.mrf.mxu3  ;;  %1706 = vmatmul.f32.gmra.mxu2 %v1478_v17  ;;  %1915 = vmatmul.f32.gmra.mxu3 %v1478_v17 }
 0x1a1   : > { %v2093_v54 = vmul.f32 %v1965_v24, %v1576_v28  ;;  %v2488_v63 = vmul.f32 %v3325_v27, %v1576_v28  ;;  %v2883_v40 = vmul.f32 %v3453_v56, %v1576_v28  ;;  %v2094_v5 = vmul.f32 %v1966_v36, %v1785_v0  ;;  %1622 = vmatmul.f32.gmra.mxu0 %v1450_v43  ;;  %v1967_v36 = vld [vmem:[%s4465_s17 + $0xc0] sm:$0xff] }
 0x1a2   : > { %v2489_v3 = vmul.f32 %v3326_v34, %v1785_v0  ;;  %v2884_v4 = vmul.f32 %v3454_v50, %v1785_v0  ;;  %1831 = vmatmul.f32.gmra.mxu1 %v1450_v43  ;;  %v4074_v27 = vunpack.i.h.bf16 %v5587_v15  ;;  %v4089_v28 = vunpack.i.h.bf16 %v5637_v48  ;;  %v3328_v50 = vld [vmem:[%s4465_s17 + $0x4c8] sm:$0xff] }
 0x1a3   : > { %v2209_v7 = vadd.f32 %v2208_v8, %v2093_v54  ;;  %v2604_v6 = vadd.f32 %v2603_v44, %v2488_v63  ;;  %v2999_v18 = vadd.f32 %v2998_v39, %v2883_v40  ;;  %v2278_v24 = vadd.f32 %v2277_v22, %v2094_v5  ;;  %v5731_v44 = vpop.permute.xlu2 %4126  ;;  %v4180_v54 = vld [vmem:[%s4479_s10 + $0xe8] sm:$0xff] }
 0x1a4   : > { %v2673_v56 = vadd.f32 %v2672_v60, %v2489_v3  ;;  %v3068_v61 = vadd.f32 %v3067_v19, %v2884_v4  ;;  %v1386_v8 = vsel %vm1357_vm2, %v1321_v47, %v4064_v62  ;;  %v4079_v39 = vunpack.i.h.bf16 %v5596_v20  ;;  %v1968_v60 = vld [vmem:[%s4465_s17 + $0xc8] sm:$0xff] }
 0x1a5   : > { %v4123_v19 = vunpack.i.l.bf16 %v5725_v31  ;;  %v3456_v62 = vld [vmem:[%s4465_s17 + $0x8c8] sm:$0xff]  ;;  %v1451_v29 = vsel %vm1422_vm3, %v1386_v8, %v4069_v51  ;;  %v1322_v63 = vsel %vm1292_vm1, %v4180_v54, %v4074_v27  ;;  %v4128_v40 = vunpack.i.l.bf16 %v5731_v44  ;;  %v3330_v54 = vld [vmem:[%s4465_s17 + $0x4d8] sm:$0xff] }
 0x1a6   : > { %v1578_v22 = vpop.f32.mrf.mxu0  ;;  %v1787_v15 = vpop.f32.mrf.mxu1  ;;  %v1349_v48 = vsel %vm1292_vm1, %v4181_v53, %v4118_v12 }
 0x1a7   : > { %v1579_v0 = vadd.f32 %v1578_v22, %v5365_v32  ;;  %v1788_v34 = vadd.f32 %v1787_v15, %v5372_v52  ;;  %v5744_v20 = vpop.f32.mrf.mxu2  ;;  %v5746_v43 = vpop.f32.mrf.mxu3  ;;  %v4119_v22 = vunpack.i.h.bf16 %v5720_v59  ;;  %v1414_v51 = vsel %vm1357_vm2, %v1349_v48, %v4123_v19  ;;  %v4182_v19 = vld [vmem:[%s4479_s10 + $0x1c8] sm:$0xff] }
 0x1a8   : > { %v5760_v59 = vpop.permute.xlu0 %4131 }
 0x1a9   : > { %v2095_v5 = vmul.f32 %v1967_v36, %v1579_v0  ;;  %v2490_v3 = vmul.f32 %v3327_v23, %v1579_v0  ;;  %v2885_v4 = vmul.f32 %v3455_v26, %v1579_v0  ;;  %v2096_v30 = vmul.f32 %v1968_v60, %v1788_v34  ;;  %1625 = vmatmul.f32.gmra.mxu0 %v1451_v29  ;;  %v1969_v0 = vld [vmem:[%s4465_s17 + $0xd0] sm:$0xff] }
 0x1aa   : > { %v2491_v47 = vmul.f32 %v3328_v50, %v1788_v34  ;;  %v2886_v17 = vmul.f32 %v3456_v62, %v1788_v34  ;;  %1834 = vmatmul.f32.gmra.mxu1 %v1451_v29  ;;  %v4124_v26 = vunpack.i.h.bf16 %v5725_v31  ;;  %v1479_v60 = vsel %vm1422_vm3, %v1414_v51, %v4128_v40 }
 0x1ab   : > { %v2210_v27 = vadd.f32 %v2209_v7, %v2095_v5  ;;  %v2605_v8 = vadd.f32 %v2604_v6, %v2490_v3  ;;  %v3000_v15 = vadd.f32 %v2999_v18, %v2885_v4  ;;  %v2279_v12 = vadd.f32 %v2278_v24, %v2096_v30  ;;  %1709 = vmatmul.f32.gmra.mxu2 %v1479_v60  ;;  %v5762_v7 = vpop.permute.xlu1 %4136  ;;  %v3329_v18 = vld [vmem:[%s4465_s17 + $0x4d0] sm:$0xff]  ;;  %v4183_v5 = vld [vmem:[%s4479_s10 + $0xf0] sm:$0xff] }
 0x1ac   : > { %v2674_v36 = vadd.f32 %v2673_v56, %v2491_v47  ;;  %v3069_v23 = vadd.f32 %v3068_v61, %v2886_v17  ;;  %v1387_v34 = vsel %vm1357_vm2, %v1322_v63, %v4079_v39  ;;  %1918 = vmatmul.f32.gmra.mxu3 %v1479_v60  ;;  %v3457_v24 = vld [vmem:[%s4465_s17 + $0x8d0] sm:$0xff]  ;;  %v1970_v61 = vld [vmem:[%s4465_s17 + $0xd8] sm:$0xff]  ;;  %v4129_v31 = vunpack.i.h.bf16 %v5731_v44 }
 0x1ad   : > { %v1350_v50 = vsel %vm1292_vm1, %v4182_v19, %v4119_v22  ;;  %v4094_v39 = vunpack.i.h.bf16 %v5641_v46  ;;  %v3458_v63 = vld [vmem:[%s4465_s17 + $0x8d8] sm:$0xff]  ;;  %v1452_v48 = vsel %vm1422_vm3, %v1387_v34, %v4084_v14  ;;  %v1323_v44 = vsel %vm1292_vm1, %v4183_v5, %v4089_v28 }
 0x1ae   : > { %v1581_v6 = vpop.f32.mrf.mxu0  ;;  %v1790_v56 = vpop.f32.mrf.mxu1  ;;  %v1415_v3 = vsel %vm1357_vm2, %v1350_v50, %v4124_v26  ;;  %v4133_v4 = vunpack.i.l.bf16 %v5760_v59  ;;  %v4138_v14 = vunpack.i.l.bf16 %v5762_v7  ;;  %v4184_v19 = vld [vmem:[%s4479_s10 + $0x1d0] sm:$0xff] }
 0x1af   : > { %v1582_v62 = vadd.f32 %v1581_v6, %v5365_v32  ;;  %v1791_v29 = vadd.f32 %v1790_v56, %v5372_v52  ;;  %v5775_v40 = vpop.f32.mrf.mxu2  ;;  %v5777_v53 = vpop.f32.mrf.mxu3  ;;  %v1480_v60 = vsel %vm1422_vm3, %v1415_v3, %v4129_v31  ;;  %v1388_v31 = vsel %vm1357_vm2, %v1323_v44, %v4094_v39  ;;  %v3459_v50 = vld [vmem:[%s4465_s17 + $0x8e0] sm:$0xff] }
 0x1b0   : > { %v4185_v44 = vld [vmem:[%s4479_s10 + $0xf8] sm:$0xff] }
 0x1b1   : > { %v2097_v46 = vmul.f32 %v1969_v0, %v1582_v62  ;;  %v2492_v30 = vmul.f32 %v3329_v18, %v1582_v62  ;;  %v2887_v47 = vmul.f32 %v3457_v24, %v1582_v62  ;;  %v2098_v17 = vmul.f32 %v1970_v61, %v1791_v29  ;;  %1628 = vmatmul.f32.gmra.mxu0 %v1452_v48  ;;  %v1971_v61 = vld [vmem:[%s4465_s17 + $0xe0] sm:$0xff]  ;;  %v1972_v62 = vld [vmem:[%s4465_s17 + $0xe8] sm:$0xff] }
 0x1b2   : > { %v2493_v22 = vmul.f32 %v3330_v54, %v1791_v29  ;;  %v2888_v51 = vmul.f32 %v3458_v63, %v1791_v29  ;;  %1837 = vmatmul.f32.gmra.mxu1 %v1452_v48  ;;  %v4099_v0 = vunpack.i.h.bf16 %v5660_v55  ;;  %v4104_v18 = vunpack.i.h.bf16 %v5672_v2  ;;  %v3460_v29 = vld [vmem:[%s4465_s17 + $0x8e8] sm:$0xff] }
 0x1b3   : > { %v2211_v34 = vadd.f32 %v2210_v27, %v2097_v46  ;;  %v2606_v28 = vadd.f32 %v2605_v8, %v2492_v30  ;;  %v3001_v26 = vadd.f32 %v3000_v15, %v2887_v47  ;;  %v2280_v6 = vadd.f32 %v2279_v12, %v2098_v17  ;;  %1712 = vmatmul.f32.gmra.mxu2 %v1480_v60  ;;  %v1217_v27 = vpop.permute.xlu2 %1216  ;;  %v3331_v12 = vld [vmem:[%s4465_s17 + $0x4e0] sm:$0xff] }
 0x1b4   : > { %v2675_v24 = vadd.f32 %v2674_v36, %v2493_v22  ;;  %v3070_v56 = vadd.f32 %v3069_v23, %v2888_v51  ;;  %1921 = vmatmul.f32.gmra.mxu3 %v1480_v60  ;;  %v1351_v8 = vsel %vm1292_vm1, %v4184_v19, %v4133_v4  ;;  %v3332_v23 = vld [vmem:[%s4465_s17 + $0x4e8] sm:$0xff]  ;;  %v4109_v48 = vunpack.i.h.bf16 %v5690_v37 }
 0x1b5   : > { %v1416_v39 = vsel %vm1357_vm2, %v1351_v8, %v4138_v14  ;;  %v1453_v5 = vsel %vm1422_vm3, %v1388_v31, %v4099_v0  ;;  %v1324_v3 = vsel %vm1292_vm1, %v4185_v44, %v4104_v18  ;;  %v4134_v4 = vunpack.i.h.bf16 %v5760_v59  ;;  %v1219_v8 = vpop.permute.xlu0 %1218 }
 0x1b6   : > { %v1584_v15 = vpop.f32.mrf.mxu0  ;;  %v1793_v55 = vpop.f32.mrf.mxu1  ;;  %v4139_v60 = vunpack.i.h.bf16 %v5762_v7  ;;  %v1481_v37 = vsel %vm1422_vm3, %v1416_v39, %v1217_v27  ;;  %v1973_v7 = vld [vmem:[%s4465_s17 + $0xf0] sm:$0xff]  ;;  %v1389_v27 = vsel %vm1357_vm2, %v1324_v3, %v4109_v48 }
 0x1b7   : > { %v1585_v2 = vadd.f32 %v1584_v15, %v5365_v32  ;;  %v1794_v36 = vadd.f32 %v1793_v55, %v5372_v52  ;;  %v5800_v54 = vpop.f32.mrf.mxu2  ;;  %v5802_v63 = vpop.f32.mrf.mxu3  ;;  %v4186_v15 = vld [vmem:[%s4479_s10 + $0x1d8] sm:$0xff]  ;;  %v3334_v55 = vld [vmem:[%s4465_s17 + $0x4f8] sm:$0xff] }
 0x1b9   : > { %v2099_v46 = vmul.f32 %v1971_v61, %v1585_v2  ;;  %v2494_v30 = vmul.f32 %v3331_v12, %v1585_v2  ;;  %v2889_v47 = vmul.f32 %v3459_v50, %v1585_v2  ;;  %v2100_v17 = vmul.f32 %v1972_v62, %v1794_v36  ;;  %1631 = vmatmul.f32.gmra.mxu0 %v1453_v5  ;;  %v3462_v62 = vld [vmem:[%s4465_s17 + $0x8f8] sm:$0xff] }
 0x1ba   : > { %v2495_v22 = vmul.f32 %v3332_v23, %v1794_v36  ;;  %v2890_v51 = vmul.f32 %v3460_v29, %v1794_v36  ;;  %1840 = vmatmul.f32.gmra.mxu1 %v1453_v5  ;;  %v4114_v61 = vunpack.i.h.bf16 %v5695_v25  ;;  %v1352_v12 = vsel %vm1292_vm1, %v4186_v15, %v4134_v4  ;;  %v1974_v25 = vld [vmem:[%s4465_s17 + $0xf8] sm:$0xff]  ;;  %v4187_v15 = vld [vmem:[%s4479_s10 + $0x1e0] sm:$0xff] }
 0x1bb   : > { %v2212_v14 = vadd.f32 %v2211_v34, %v2099_v46  ;;  %v2607_v0 = vadd.f32 %v2606_v28, %v2494_v30  ;;  %v3002_v18 = vadd.f32 %v3001_v26, %v2889_v47  ;;  %v2281_v59 = vadd.f32 %v2280_v6, %v2100_v17  ;;  %1715 = vmatmul.f32.gmra.mxu2 %v1481_v37  ;;  %v5816_v34 = vpop.permute.xlu1 %4141  ;;  %v3333_v26 = vld [vmem:[%s4465_s17 + $0x4f0] sm:$0xff] }
 0x1bc   : > { %v2676_v31 = vadd.f32 %v2675_v24, %v2495_v22  ;;  %v3071_v19 = vadd.f32 %v3070_v56, %v2890_v51  ;;  %1924 = vmatmul.f32.gmra.mxu3 %v1481_v37  ;;  %v3461_v6 = vld [vmem:[%s4465_s17 + $0x8f0] sm:$0xff]  ;;  %v1417_v2 = vsel %vm1357_vm2, %v1352_v12, %v4139_v60  ;;  %v1454_v29 = vsel %vm1422_vm3, %v1389_v27, %v4114_v61  ;;  %v1028_v61 = vpop.permute.xlu2 %1027  ;;  %v1975_v27 = vld [vmem:[%s4465_s17 + $0x100] sm:$0xff] }
 0x1bd   : > { %v4143_v39 = vunpack.i.l.bf16 %v5816_v34  ;;  %v1482_v30 = vsel %vm1422_vm3, %v1417_v2, %v1219_v8  ;;  %v1221_v8 = vpop.permute.xlu0 %1220 }
 0x1be   : > { %v1587_v28 = vpop.f32.mrf.mxu0  ;;  %v1796_v50 = vpop.f32.mrf.mxu1 }
 0x1bf   : > { %v1588_v24 = vadd.f32 %v1587_v28, %v5365_v32  ;;  %v1797_v56 = vadd.f32 %v1796_v50, %v5372_v52  ;;  %v5826_v36 = vpop.f32.mrf.mxu2  ;;  %v5828_v23 = vpop.f32.mrf.mxu3  ;;  %v1353_v12 = vsel %vm1292_vm1, %v4187_v15, %v4143_v39  ;;  %v3335_v28 = vld [vmem:[%s4465_s17 + $0x500] sm:$0xff] }
 0x1c1   : > { %v2101_v48 = vmul.f32 %v1973_v7, %v1588_v24  ;;  %v2496_v5 = vmul.f32 %v3333_v26, %v1588_v24  ;;  %v2891_v44 = vmul.f32 %v3461_v6, %v1588_v24  ;;  %v2102_v3 = vmul.f32 %v1974_v25, %v1797_v56  ;;  %1634 = vmatmul.f32.gmra.mxu0 %v1454_v29  ;;  %v3463_v26 = vld [vmem:[%s4465_s17 + $0x900] sm:$0xff]  ;;  %v3464_v6 = vld [vmem:[%s4465_s17 + $0x908] sm:$0xff] }
 0x1c2   : > { %v2497_v4 = vmul.f32 %v3334_v55, %v1797_v56  ;;  %v2892_v46 = vmul.f32 %v3462_v62, %v1797_v56  ;;  %1843 = vmatmul.f32.gmra.mxu1 %v1454_v29  ;;  %v4144_v25 = vunpack.i.h.bf16 %v5816_v34 }
 0x1c3   : > { %v2213_v47 = vadd.f32 %v2212_v14, %v2101_v48  ;;  %v2608_v17 = vadd.f32 %v2607_v0, %v2496_v5  ;;  %v3003_v22 = vadd.f32 %v3002_v18, %v2891_v44  ;;  %v2282_v51 = vadd.f32 %v2281_v59, %v2102_v3  ;;  %1718 = vmatmul.f32.gmra.mxu2 %v1482_v30  ;;  %v1976_v18 = vld [vmem:[%s4465_s17 + $0x108] sm:$0xff] }
 0x1c4   : > { %v2677_v60 = vadd.f32 %v2676_v31, %v2497_v4  ;;  %v3072_v37 = vadd.f32 %v3071_v19, %v2892_v46  ;;  %1927 = vmatmul.f32.gmra.mxu3 %v1482_v30  ;;  %v3336_v59 = vld [vmem:[%s4465_s17 + $0x508] sm:$0xff]  ;;  %v1418_v31 = vsel %vm1357_vm2, %v1353_v12, %v1028_v61  ;;  %v1030_v30 = vpop.permute.xlu1 %1029  ;;  %v4188_v61 = vld [vmem:[%s4479_s10 + $0x1e8] sm:$0xff] }
 0x1c5   : > { %v1483_v48 = vsel %vm1422_vm3, %v1418_v31, %v1221_v8  ;;  %v1354_v15 = vsel %vm1292_vm1, %v4188_v61, %v4144_v25  ;;  %v3466_v8 = vld [vmem:[%s4465_s17 + $0x918] sm:$0xff] }
 0x1c6   : > { %v1590_v7 = vpop.f32.mrf.mxu0  ;;  %v1799_v0 = vpop.f32.mrf.mxu1 }
 0x1c7   : > { %v1591_v14 = vadd.f32 %v1590_v7, %v5365_v32  ;;  %v5843_v19 = vpop.f32.mrf.mxu2  ;;  %v1800_v50 = vadd.f32 %v1799_v0, %v5372_v52  ;;  %v5847_v24 = vpop.f32.mrf.mxu3  ;;  %v1977_v7 = vld [vmem:[%s4465_s17 + $0x110] sm:$0xff] }
 0x1c9   : > { %v2103_v56 = vmul.f32 %v1975_v27, %v1591_v14  ;;  %v2498_v55 = vmul.f32 %v3335_v28, %v1591_v14  ;;  %v2893_v62 = vmul.f32 %v3463_v26, %v1591_v14  ;;  %v2104_v2 = vmul.f32 %v1976_v18, %v1800_v50  ;;  %v3337_v27 = vld [vmem:[%s4465_s17 + $0x510] sm:$0xff]  ;;  %v1223_v26 = vpop.permute.xlu2 %1222 }
 0x1ca   : > { %v2499_v29 = vmul.f32 %v3336_v59, %v1800_v50  ;;  %v2894_v39 = vmul.f32 %v3464_v6, %v1800_v50  ;;  %v3465_v28 = vld [vmem:[%s4465_s17 + $0x910] sm:$0xff] }
 0x1cb   : > { %v2214_v5 = vadd.f32 %v2213_v47, %v2103_v56  ;;  %v2609_v44 = vadd.f32 %v2608_v17, %v2498_v55  ;;  %v3004_v3 = vadd.f32 %v3003_v22, %v2893_v62  ;;  %v2283_v4 = vadd.f32 %v2282_v51, %v2104_v2  ;;  %1721 = vmatmul.f32.gmra.mxu2 %v1483_v48  ;;  %v1978_v22 = vld [vmem:[%s4465_s17 + $0x118] sm:$0xff] }
 0x1cc   : > { %v2678_v34 = vadd.f32 %v2677_v60, %v2499_v29  ;;  %v3073_v46 = vadd.f32 %v3072_v37, %v2894_v39  ;;  %1930 = vmatmul.f32.gmra.mxu3 %v1483_v48  ;;  %v3338_v51 = vld [vmem:[%s4465_s17 + $0x518] sm:$0xff]  ;;  %v1419_v60 = vsel %vm1357_vm2, %v1354_v15, %v1030_v30  ;;  %v840_v29 = vpop.permute.xlu0 %839  ;;  %v1032_v61 = vpop.permute.xlu1 %1031 }
 0x1cd   : > { %v1484_v56 = vsel %vm1422_vm3, %v1419_v60, %v1223_v26 }
 0x1ce   : > { %v1593_v12 = vpop.f32.mrf.mxu0  ;;  %v1802_v17 = vpop.f32.mrf.mxu1 }
 0x1cf   : > { %v1594_v47 = vadd.f32 %v1593_v12, %v5365_v32  ;;  %v5860_v37 = vpop.f32.mrf.mxu2  ;;  %v1803_v14 = vadd.f32 %v1802_v17, %v5372_v52  ;;  %v5863_v0 = vpop.f32.mrf.mxu3  ;;  %v1979_v12 = vld [vmem:[%s4465_s17 + $0x120] sm:$0xff]  ;;  %v3468_v17 = vld [vmem:[%s4465_s17 + $0x928] sm:$0xff] }
 0x1d1   : > { %v2105_v18 = vmul.f32 %v1977_v7, %v1594_v47  ;;  %v2500_v59 = vmul.f32 %v3337_v27, %v1594_v47  ;;  %v2895_v6 = vmul.f32 %v3465_v28, %v1594_v47  ;;  %v2106_v31 = vmul.f32 %v1978_v22, %v1803_v14  ;;  %v3339_v7 = vld [vmem:[%s4465_s17 + $0x520] sm:$0xff]  ;;  %v1980_v47 = vld [vmem:[%s4465_s17 + $0x128] sm:$0xff] }
 0x1d2   : > { %v2501_v50 = vmul.f32 %v3338_v51, %v1803_v14  ;;  %v2896_v25 = vmul.f32 %v3466_v8, %v1803_v14  ;;  %v3467_v27 = vld [vmem:[%s4465_s17 + $0x920] sm:$0xff] }
 0x1d3   : > { %v2215_v55 = vadd.f32 %v2214_v5, %v2105_v18  ;;  %v2610_v62 = vadd.f32 %v2609_v44, %v2500_v59  ;;  %v3005_v2 = vadd.f32 %v3004_v3, %v2895_v6  ;;  %v2284_v39 = vadd.f32 %v2283_v4, %v2106_v31  ;;  %1724 = vmatmul.f32.gmra.mxu2 %v1484_v56  ;;  %v4189_v28 = vld [vmem:[%s4479_s10 + $0x1f0] sm:$0xff]  ;;  %v1225_v5 = vpop.permute.xlu2 %1224  ;;  %v3340_v4 = vld [vmem:[%s4465_s17 + $0x528] sm:$0xff] }
 0x1d4   : > { %v2679_v48 = vadd.f32 %v2678_v34, %v2501_v50  ;;  %v3074_v30 = vadd.f32 %v3073_v46, %v2896_v25  ;;  %1933 = vmatmul.f32.gmra.mxu3 %v1484_v56  ;;  %v1355_v26 = vsel %vm1292_vm1, %v4189_v28, %v840_v29  ;;  %v3341_v28 = vld [vmem:[%s4465_s17 + $0x530] sm:$0xff] }
 0x1d5   : > { %v1420_v46 = vsel %vm1357_vm2, %v1355_v26, %v1032_v61  ;;  %v3469_v26 = vld [vmem:[%s4465_s17 + $0x930] sm:$0xff] }
 0x1d6   : > { %v1596_v15 = vpop.f32.mrf.mxu0  ;;  %v1805_v3 = vpop.f32.mrf.mxu1  ;;  %v1485_v31 = vsel %vm1422_vm3, %v1420_v46, %v1225_v5 }
 0x1d7   : > { %v1597_v44 = vadd.f32 %v1596_v15, %v5365_v32  ;;  %v5875_v34 = vpop.f32.mrf.mxu2  ;;  %v1806_v22 = vadd.f32 %v1805_v3, %v5372_v52  ;;  %v5879_v51 = vpop.f32.mrf.mxu3  ;;  %v1982_v3 = vld [vmem:[%s4465_s17 + $0x138] sm:$0xff] }
 0x1d9   : > { %v2107_v8 = vmul.f32 %v1979_v12, %v1597_v44  ;;  %v2502_v60 = vmul.f32 %v3339_v7, %v1597_v44  ;;  %v2897_v14 = vmul.f32 %v3467_v27, %v1597_v44  ;;  %v2108_v18 = vmul.f32 %v1980_v47, %v1806_v22  ;;  %v842_v12 = vpop.permute.xlu0 %841  ;;  %v1981_v27 = vld [vmem:[%s4465_s17 + $0x130] sm:$0xff]  ;;  %v3470_v47 = vld [vmem:[%s4465_s17 + $0x938] sm:$0xff] }
 0x1da   : > { %v2503_v59 = vmul.f32 %v3340_v4, %v1806_v22  ;;  %v2898_v6 = vmul.f32 %v3468_v17, %v1806_v22  ;;  %v1034_v4 = vpop.permute.xlu1 %1033 }
 0x1db   : > { %v2216_v50 = vadd.f32 %v2215_v55, %v2107_v8  ;;  %v2611_v25 = vadd.f32 %v2610_v62, %v2502_v60  ;;  %v3006_v56 = vadd.f32 %v3005_v2, %v2897_v14  ;;  %v2285_v29 = vadd.f32 %v2284_v39, %v2108_v18  ;;  %1727 = vmatmul.f32.gmra.mxu2 %v1485_v31  ;;  %v3342_v55 = vld [vmem:[%s4465_s17 + $0x538] sm:$0xff] }
 0x1dc   : > { %v2680_v61 = vadd.f32 %v2679_v48, %v2503_v59  ;;  %v3075_v15 = vadd.f32 %v3074_v30, %v2898_v6  ;;  %1936 = vmatmul.f32.gmra.mxu3 %v1485_v31  ;;  %v4190_v48 = vld [vmem:[%s4479_s10 + $0x1f8] sm:$0xff] }
 0x1dd   : > { %v1356_v30 = vsel %vm1292_vm1, %v4190_v48, %v842_v12  ;;  %v1227_v48 = vpop.permute.xlu2 %1226 }
 0x1de   : > { %v1599_v7 = vpop.f32.mrf.mxu0  ;;  %v1808_v5 = vpop.f32.mrf.mxu1  ;;  %v1421_v31 = vsel %vm1357_vm2, %v1356_v30, %v1034_v4  ;;  %v1639_v30 = vadd.f32 %v5435_v57, %v5365_v32  ;;  %v3495_v57 = vld [vmem:[%s4465_s17 + $0xa00] sm:$0xff] }
 0x1df   : > { %v1600_v44 = vadd.f32 %v1599_v7, %v5365_v32  ;;  %v5889_v62 = vpop.f32.mrf.mxu2  ;;  %v1809_v2 = vadd.f32 %v1808_v5, %v5372_v52  ;;  %v5892_v39 = vpop.f32.mrf.mxu3 }
 0x1e0   : > { %6976 = vst [vmem:[#allocation14_spill] sm:$0xff] %v5889_v62  ;;  %v3471_v62 = vld [vmem:[%s4465_s17 + $0x940] sm:$0xff] }
 0x1e1   : > { %6977 = vst [vmem:[#allocation15_spill] sm:$0xff] %v5892_v39  ;;  %v2109_v17 = vmul.f32 %v1981_v27, %v1600_v44  ;;  %v2504_v46 = vmul.f32 %v3341_v28, %v1600_v44  ;;  %v2899_v22 = vmul.f32 %v3469_v26, %v1600_v44  ;;  %v2110_v8 = vmul.f32 %v1982_v3, %v1809_v2  ;;  %v1983_v39 = vld [vmem:[%s4465_s17 + $0x140] sm:$0xff] }
 0x1e2   : > { %v2505_v60 = vmul.f32 %v3342_v55, %v1809_v2  ;;  %v2900_v14 = vmul.f32 %v3470_v47, %v1809_v2  ;;  %v3343_v28 = vld [vmem:[%s4465_s17 + $0x540] sm:$0xff]  ;;  %v1486_v26 = vsel %vm1422_vm3, %v1421_v31, %v1227_v48  ;;  %v2008_v31 = vld [vmem:[%s4465_s17 + $0x208] sm:$0xff] }
 0x1e3   : > { %v2217_v18 = vadd.f32 %v2216_v50, %v2109_v17  ;;  %v2612_v59 = vadd.f32 %v2611_v25, %v2504_v46  ;;  %v3007_v6 = vadd.f32 %v3006_v56, %v2899_v22  ;;  %v2286_v7 = vadd.f32 %v2285_v29, %v2110_v8  ;;  %v1984_v50 = vld [vmem:[%s4465_s17 + $0x148] sm:$0xff]  ;;  %1730 = vmatmul.f32.gmra.mxu2 %v1486_v26  ;;  %v2007_v22 = vld [vmem:[%s4465_s17 + $0x200] sm:$0xff] }
 0x1e4   : > { %v2681_v12 = vadd.f32 %v2680_v61, %v2505_v60  ;;  %v3076_v5 = vadd.f32 %v3075_v15, %v2900_v14  ;;  %v3344_v25 = vld [vmem:[%s4465_s17 + $0x548] sm:$0xff]  ;;  %1939 = vmatmul.f32.gmra.mxu3 %v1486_v26  ;;  %v3367_v8 = vld [vmem:[%s4465_s17 + $0x600] sm:$0xff]  ;;  %v1848_v60 = vadd.f32 %v5437_v41, %v5372_v52 }
 0x1e5   : > { %v3472_v56 = vld [vmem:[%s4465_s17 + $0x948] sm:$0xff] }
 0x1e6   : > { %v1602_v27 = vpop.f32.mrf.mxu0  ;;  %v1811_v3 = vpop.f32.mrf.mxu1  ;;  %v3368_v48 = vld [vmem:[%s4465_s17 + $0x608] sm:$0xff] }
 0x1e7   : > { %v1603_v44 = vadd.f32 %v1602_v27, %v5365_v32  ;;  %v5905_v29 = vpop.f32.mrf.mxu2  ;;  %v1812_v61 = vadd.f32 %v1811_v3, %v5372_v52  ;;  %v5908_v15 = vpop.f32.mrf.mxu3  ;;  %v1642_v27 = vadd.f32 %v5483_v10, %v5365_v32  ;;  %v5938_v3 = vmul.f32 %v2007_v22, %v1639_v30  ;;  %v3497_v10 = vld [vmem:[%s4465_s17 + $0xa10] sm:$0xff] }
 0x1e9   : > { %v2111_v55 = vmul.f32 %v1983_v39, %v1603_v44  ;;  %v2506_v47 = vmul.f32 %v3343_v28, %v1603_v44  ;;  %v2901_v2 = vmul.f32 %v3471_v62, %v1603_v44  ;;  %v2112_v4 = vmul.f32 %v1984_v50, %v1812_v61 }
 0x1ea   : > { %v2507_v17 = vmul.f32 %v3344_v25, %v1812_v61  ;;  %v2902_v46 = vmul.f32 %v3472_v56, %v1812_v61  ;;  %v1851_v44 = vadd.f32 %v5485_v1, %v5372_v52  ;;  %v5940_v50 = vmul.f32 %v3367_v8, %v1639_v30  ;;  %v3499_v8 = vld [vmem:[%s4465_s17 + $0xa20] sm:$0xff] }
 0x1eb   : > { %v5916_v14 = vadd.f32 %v2217_v18, %v2111_v55  ;;  %v5918_v39 = vadd.f32 %v2612_v59, %v2506_v47  ;;  %v5920_v62 = vadd.f32 %v3007_v6, %v2901_v2  ;;  %v5927_v28 = vadd.f32 %v2286_v7, %v2112_v4  ;;  %v3496_v18 = vld [vmem:[%s4465_s17 + $0xa08] sm:$0xff]  ;;  %v2009_v59 = vld [vmem:[%s4465_s17 + $0x210] sm:$0xff]  ;;  %v2010_v7 = vld [vmem:[%s4465_s17 + $0x218] sm:$0xff] }
 0x1ec   : > { %v5929_v26 = vadd.f32 %v2681_v12, %v2507_v17  ;;  %v5931_v41 = vadd.f32 %v3076_v5, %v2902_v46  ;;  %v3369_v6 = vld [vmem:[%s4465_s17 + $0x610] sm:$0xff]  ;;  %v3370_v12 = vld [vmem:[%s4465_s17 + $0x618] sm:$0xff]  ;;  %v1645_v5 = vadd.f32 %v5530_v42, %v5365_v32  ;;  %v5949_v56 = vmul.f32 %v3495_v57, %v1639_v30  ;;  %v2011_v47 = vld [vmem:[%s4465_s17 + $0x220] sm:$0xff] }
 0x1ed   : > { %v5951_v61 = vmul.f32 %v2008_v31, %v1848_v60  ;;  %v5953_v1 = vmul.f32 %v3368_v48, %v1848_v60  ;;  %v3498_v55 = vld [vmem:[%s4465_s17 + $0xa18] sm:$0xff]  ;;  %v3371_v2 = vld [vmem:[%s4465_s17 + $0x620] sm:$0xff]  ;;  %v1854_v4 = vadd.f32 %v5532_v45, %v5372_v52  ;;  %v5964_v46 = vmul.f32 %v3496_v18, %v1848_v60  ;;  %v2012_v57 = vld [vmem:[%s4465_s17 + $0x228] sm:$0xff] }
 0x1ee   : > { %v5947_v25 = vpop.f32.mrf.mxu0  ;;  %v5960_v17 = vpop.f32.mrf.mxu1  ;;  %v5966_v30 = vmul.f32 %v2009_v59, %v1642_v27  ;;  %v5968_v22 = vmul.f32 %v3369_v6, %v1642_v27  ;;  %v3372_v31 = vld [vmem:[%s4465_s17 + $0x628] sm:$0xff]  ;;  %v1648_v45 = vadd.f32 %v5576_v11, %v5365_v32  ;;  %v5981_v60 = vmul.f32 %v3370_v12, %v1851_v44  ;;  %v2013_v59 = vld [vmem:[%s4465_s17 + $0x230] sm:$0xff]  ;;  %v3374_v12 = vld [vmem:[%s4465_s17 + $0x638] sm:$0xff] }
 0x1ef   : > { %6978 = vst [vmem:[#allocation16_spill] sm:$0xff] %v5951_v61  ;;  %v5962_v42 = vpop.f32.mrf.mxu2  ;;  %v5975_v48 = vpop.f32.mrf.mxu3  ;;  %v5979_v61 = vmul.f32 %v2010_v7, %v1851_v44  ;;  %v3500_v18 = vld [vmem:[%s4465_s17 + $0xa28] sm:$0xff]  ;;  %v3373_v6 = vld [vmem:[%s4465_s17 + $0x630] sm:$0xff]  ;;  %v5990_v11 = vmul.f32 %v2011_v47, %v1645_v5  ;;  %v2014_v7 = vld [vmem:[%s4465_s17 + $0x238] sm:$0xff] }
 0x1f0   : > { %6979 = vst [vmem:[#allocation17_spill] sm:$0xff] %v5953_v1  ;;  %v5977_v1 = vmul.f32 %v3497_v10, %v1642_v27  ;;  %v5992_v27 = vmul.f32 %v3371_v2, %v1645_v5  ;;  %v3501_v10 = vld [vmem:[%s4465_s17 + $0xa30] sm:$0xff]  ;;  %v3375_v47 = vld [vmem:[%s4465_s17 + $0x640] sm:$0xff]  ;;  %v1860_v2 = vadd.f32 %v5618_v58, %v5372_v52 }
 0x1f1   : > { %6980 = vst [vmem:[#allocation18_spill] sm:$0xff] %v5966_v30  ;;  %v5988_v30 = vmul.f32 %v3498_v55, %v1851_v44  ;;  %v3502_v44 = vld [vmem:[%s4465_s17 + $0xa38] sm:$0xff]  ;;  %v2015_v55 = vld [vmem:[%s4465_s17 + $0x240] sm:$0xff] }
 0x1f2   : > { %6981 = vst [vmem:[#allocation19_spill] sm:$0xff] %v5968_v22  ;;  %v1857_v22 = vadd.f32 %v5578_v49, %v5372_v52  ;;  %v6003_v49 = vmul.f32 %v3372_v31, %v1854_v4  ;;  %v1654_v31 = vadd.f32 %v5653_v35, %v5365_v32 }
 0x1f3   : > { %6982 = vst [vmem:[#allocation20_spill] sm:$0xff] %v5977_v1  ;;  %v6001_v1 = vmul.f32 %v2012_v57, %v1854_v4  ;;  %v3376_v57 = vld [vmem:[%s4465_s17 + $0x648] sm:$0xff] }
 0x1f4   : > { %6983 = vst [vmem:[#allocation21_spill] sm:$0xff] %v5979_v61  ;;  %v5999_v61 = vmul.f32 %v3499_v8, %v1645_v5  ;;  %v3503_v5 = vld [vmem:[%s4465_s17 + $0xa40] sm:$0xff]  ;;  %v2016_v8 = vld [vmem:[%s4465_s17 + $0x248] sm:$0xff]  ;;  %v6025_v58 = vmul.f32 %v3374_v12, %v1857_v22  ;;  %v1657_v12 = vadd.f32 %v5683_v21, %v5365_v32 }
 0x1f5   : > { %6984 = vst [vmem:[#allocation22_spill] sm:$0xff] %v5981_v60  ;;  %v1651_v60 = vadd.f32 %v5616_v13, %v5365_v32  ;;  %v6014_v13 = vmul.f32 %v3373_v6, %v1648_v45  ;;  %v1863_v6 = vadd.f32 %v5655_v38, %v5372_v52  ;;  %v6047_v38 = vmul.f32 %v2016_v8, %v1860_v2  ;;  %v2020_v8 = vld [vmem:[%s4465_s17 + $0x268] sm:$0xff] }
 0x1f6   : > { %6985 = vst [vmem:[#allocation23_spill] sm:$0xff] %v5990_v11  ;;  %v6012_v11 = vmul.f32 %v2013_v59, %v1648_v45  ;;  %v3377_v59 = vld [vmem:[%s4465_s17 + $0x650] sm:$0xff] }
 0x1f7   : > { %6986 = vst [vmem:[#allocation24_spill] sm:$0xff] %v5992_v27  ;;  %v6010_v27 = vmul.f32 %v3500_v18, %v1854_v4  ;;  %v3504_v4 = vld [vmem:[%s4465_s17 + $0xa48] sm:$0xff]  ;;  %v2017_v18 = vld [vmem:[%s4465_s17 + $0x250] sm:$0xff]  ;;  %v6036_v35 = vmul.f32 %v3375_v47, %v1651_v60  ;;  %v3379_v47 = vld [vmem:[%s4465_s17 + $0x660] sm:$0xff] }
 0x1f8   : > { %6987 = vst [vmem:[#allocation25_spill] sm:$0xff] %v6001_v1  ;;  %v6023_v1 = vmul.f32 %v2014_v7, %v1857_v22  ;;  %v3378_v7 = vld [vmem:[%s4465_s17 + $0x658] sm:$0xff]  ;;  %v6058_v21 = vmul.f32 %v3504_v4, %v1860_v2  ;;  %v2021_v4 = vld [vmem:[%s4465_s17 + $0x270] sm:$0xff] }
 0x1f9   : > { %6988 = vst [vmem:[#allocation26_spill] sm:$0xff] %v6003_v49  ;;  %v6021_v49 = vmul.f32 %v3501_v10, %v1648_v45  ;;  %v3505_v45 = vld [vmem:[%s4465_s17 + $0xa50] sm:$0xff]  ;;  %v2018_v10 = vld [vmem:[%s4465_s17 + $0x258] sm:$0xff] }
 0x1fa   : > { %6989 = vst [vmem:[#allocation27_spill] sm:$0xff] %v6012_v11  ;;  %v6034_v11 = vmul.f32 %v2015_v55, %v1651_v60  ;;  %v2019_v55 = vld [vmem:[%s4465_s17 + $0x260] sm:$0xff] }
 0x1fb   : > { %6990 = vst [vmem:[#allocation28_spill] sm:$0xff] %v6014_v13  ;;  %v6032_v13 = vmul.f32 %v3502_v44, %v1857_v22  ;;  %v6049_v22 = vmul.f32 %v3376_v57, %v1860_v2  ;;  %v3506_v44 = vld [vmem:[%s4465_s17 + $0xa58] sm:$0xff]  ;;  %v3380_v57 = vld [vmem:[%s4465_s17 + $0x668] sm:$0xff] }
 0x1fc   : > { %6991 = vst [vmem:[#allocation29_spill] sm:$0xff] %v6023_v1  ;;  %v6045_v1 = vmul.f32 %v3503_v5, %v1651_v60  ;;  %v6062_v60 = vmul.f32 %v3377_v59, %v1654_v31  ;;  %v3507_v5 = vld [vmem:[%s4465_s17 + $0xa60] sm:$0xff]  ;;  %v3508_v2 = vld [vmem:[%s4465_s17 + $0xa68] sm:$0xff]  ;;  %v1869_v59 = vadd.f32 %v5714_v9, %v5372_v52 }
 0x1fd   : > { %6992 = vst [vmem:[#allocation30_spill] sm:$0xff] %v6025_v58  ;;  %v6043_v58 = vpop.f32.mrf.mxu0  ;;  %v6095_v9 = vmul.f32 %v3507_v5, %v1657_v12  ;;  %v2024_v5 = vld [vmem:[%s4465_s17 + $0x288] sm:$0xff] }
 0x1fe   : > { %6993 = vst [vmem:[#allocation31_spill] sm:$0xff] %v6032_v13  ;;  %v6060_v13 = vmul.f32 %v2017_v18, %v1654_v31  ;;  %v3381_v18 = vld [vmem:[%s4465_s17 + $0x670] sm:$0xff] }
 0x1ff   : > { %6994 = vst [vmem:[#allocation32_spill] sm:$0xff] %v6034_v11  ;;  %v6056_v11 = vpop.f32.mrf.mxu1 }
 0x200   : > { %6995 = vst [vmem:[#allocation33_spill] sm:$0xff] %v6036_v35  ;;  %v1866_v35 = vadd.f32 %v5685_v33, %v5372_v52  ;;  %v6071_v33 = vmul.f32 %v2018_v10, %v1863_v6  ;;  %v3509_v10 = vld [vmem:[%s4465_s17 + $0xa70] sm:$0xff] }
 0x201   : > { %6996 = vst [vmem:[#allocation34_spill] sm:$0xff] %v6045_v1  ;;  %v6073_v1 = vmul.f32 %v3378_v7, %v1863_v6  ;;  %v2022_v7 = vld [vmem:[%s4465_s17 + $0x278] sm:$0xff] }
 0x202   : > { %6997 = vst [vmem:[#allocation35_spill] sm:$0xff] %v6047_v38  ;;  %v6069_v38 = vmul.f32 %v3505_v45, %v1654_v31  ;;  %v6086_v31 = vmul.f32 %v2019_v55, %v1657_v12  ;;  %v6088_v45 = vmul.f32 %v3379_v47, %v1657_v12  ;;  %v2023_v55 = vld [vmem:[%s4465_s17 + $0x280] sm:$0xff] }
 0x203   : > { %6998 = vst [vmem:[#allocation36_spill] sm:$0xff] %v6049_v22  ;;  %v1660_v22 = vadd.f32 %v5712_v16, %v5365_v32  ;;  %v6084_v16 = vmul.f32 %v3506_v44, %v1863_v6  ;;  %v6099_v6 = vmul.f32 %v3380_v57, %v1866_v35  ;;  %v3510_v44 = vld [vmem:[%s4465_s17 + $0xa78] sm:$0xff]  ;;  %v3383_v47 = vld [vmem:[%s4465_s17 + $0x680] sm:$0xff]  ;;  %v1666_v57 = vadd.f32 %v5775_v40, %v5365_v32 }
 0x204   : > { %6999 = vst [vmem:[#allocation37_spill] sm:$0xff] %v6060_v13  ;;  %v6082_v13 = vpop.f32.mrf.mxu3  ;;  %v3511_v12 = vld [vmem:[%s4465_s17 + $0xa80] sm:$0xff] }
 0x205   : > { %7000 = vst [vmem:[#allocation38_spill] sm:$0xff] %v6062_v60  ;;  %v6080_v60 = vpop.f32.mrf.mxu2 }
 0x206   : > { %7001 = vst [vmem:[#allocation39_spill] sm:$0xff] %v6069_v38  ;;  %v6097_v38 = vmul.f32 %v2020_v8, %v1866_v35  ;;  %v3384_v8 = vld [vmem:[%s4465_s17 + $0x688] sm:$0xff] }
 0x207   : > { %7002 = vst [vmem:[#allocation40_spill] sm:$0xff] %v6071_v33  ;;  %v1663_v33 = vadd.f32 %v5744_v20, %v5365_v32  ;;  %v6110_v20 = vmul.f32 %v3381_v18, %v1660_v22  ;;  %v1875_v18 = vadd.f32 %v5777_v53, %v5372_v52 }
 0x208   : > { %7003 = vst [vmem:[#allocation41_spill] sm:$0xff] %v6073_v1  ;;  %v3382_v1 = vld [vmem:[%s4465_s17 + $0x678] sm:$0xff] }
 0x209   : > { %7004 = vst [vmem:[#allocation42_spill] sm:$0xff] %v6084_v16  ;;  %v6108_v16 = vmul.f32 %v2021_v4, %v1660_v22  ;;  %v3385_v4 = vld [vmem:[%s4465_s17 + $0x690] sm:$0xff]  ;;  %v6132_v40 = vmul.f32 %v3383_v47, %v1663_v33  ;;  %v3387_v47 = vld [vmem:[%s4465_s17 + $0x6a0] sm:$0xff] }
 0x20a   : > { %7005 = vst [vmem:[#allocation43_spill] sm:$0xff] %v6086_v31  ;;  %v6106_v31 = vmul.f32 %v3508_v2, %v1866_v35  ;;  %v3512_v35 = vld [vmem:[%s4465_s17 + $0xa88] sm:$0xff]  ;;  %v2025_v2 = vld [vmem:[%s4465_s17 + $0x290] sm:$0xff] }
 0x20b   : > { %7006 = vst [vmem:[#allocation44_spill] sm:$0xff] %v6088_v45  ;;  %v1872_v45 = vadd.f32 %v5746_v43, %v5372_v52  ;;  %v6121_v43 = vmul.f32 %v3382_v1, %v1869_v59  ;;  %v3386_v1 = vld [vmem:[%s4465_s17 + $0x698] sm:$0xff] }
 0x20c   : > { %7007 = vst [vmem:[#allocation45_spill] sm:$0xff] %v6097_v38  ;;  %v6119_v38 = vmul.f32 %v2022_v7, %v1869_v59  ;;  %v1669_v7 = vadd.f32 %v5800_v54, %v5365_v32 }
 0x20d   : > { %7008 = vst [vmem:[#allocation46_spill] sm:$0xff] %v6099_v6  ;;  %v6117_v6 = vmul.f32 %v3509_v10, %v1660_v22  ;;  %v3513_v22 = vld [vmem:[%s4465_s17 + $0xa90] sm:$0xff]  ;;  %v2026_v10 = vld [vmem:[%s4465_s17 + $0x298] sm:$0xff]  ;;  %v6143_v53 = vmul.f32 %v2024_v5, %v1872_v45  ;;  %v6154_v54 = vmul.f32 %v3512_v35, %v1872_v45  ;;  %v2028_v5 = vld [vmem:[%s4465_s17 + $0x2a8] sm:$0xff] }
 0x20e   : > { %7009 = vst [vmem:[#allocation47_spill] sm:$0xff] %v6108_v16  ;;  %v6130_v16 = vmul.f32 %v2023_v55, %v1663_v33  ;;  %v2027_v55 = vld [vmem:[%s4465_s17 + $0x2a0] sm:$0xff]  ;;  %v2029_v35 = vld [vmem:[%s4465_s17 + $0x2b0] sm:$0xff] }
 0x20f   : > { %7010 = vst [vmem:[#allocation48_spill] sm:$0xff] %v6110_v20  ;;  %v6128_v20 = vmul.f32 %v3510_v44, %v1869_v59  ;;  %v6145_v59 = vmul.f32 %v3384_v8, %v1872_v45  ;;  %v3514_v44 = vld [vmem:[%s4465_s17 + $0xa98] sm:$0xff]  ;;  %v3388_v8 = vld [vmem:[%s4465_s17 + $0x6a8] sm:$0xff] }
 0x210   : > { %7011 = vst [vmem:[#allocation49_spill] sm:$0xff] %v6119_v38  ;;  %v6141_v38 = vmul.f32 %v3511_v12, %v1663_v33  ;;  %v6158_v33 = vmul.f32 %v3385_v4, %v1666_v57  ;;  %v3515_v12 = vld [vmem:[%s4465_s17 + $0xaa0] sm:$0xff]  ;;  %v3516_v45 = vld [vmem:[%s4465_s17 + $0xaa8] sm:$0xff]  ;;  %v1881_v4 = vadd.f32 %v5828_v23, %v5372_v52 }
 0x211   : > { %7012 = vst [vmem:[#allocation50_spill] sm:$0xff] %v6121_v43  ;;  %v6139_v43 = vpop.f32.mrf.mxu0  ;;  %v6191_v23 = vmul.f32 %v3515_v12, %v1669_v7  ;;  %v3519_v12 = vld [vmem:[%s4465_s17 + $0xac0] sm:$0xff] }
 0x212   : > { %7013 = vst [vmem:[#allocation51_spill] sm:$0xff] %v6128_v20  ;;  %v6156_v20 = vmul.f32 %v2025_v2, %v1666_v57  ;;  %v3389_v2 = vld [vmem:[%s4465_s17 + $0x6b0] sm:$0xff] }
 0x213   : > { %7014 = vst [vmem:[#allocation52_spill] sm:$0xff] %v6130_v16  ;;  %v6152_v16 = vpop.f32.mrf.mxu1 }
 0x214   : > { %7015 = vst [vmem:[#allocation53_spill] sm:$0xff] %v6132_v40  ;;  %v1878_v40 = vadd.f32 %v5802_v63, %v5372_v52  ;;  %v6167_v63 = vmul.f32 %v2026_v10, %v1875_v18  ;;  %v3390_v10 = vld [vmem:[%s4465_s17 + $0x6b8] sm:$0xff] }
 0x215   : > { %7016 = vst [vmem:[#allocation54_spill] sm:$0xff] %v6141_v38  ;;  %v6169_v38 = vmul.f32 %v3386_v1, %v1875_v18  ;;  %v1675_v1 = vadd.f32 %v5843_v19, %v5365_v32 }
 0x216   : > { %7017 = vst [vmem:[#allocation55_spill] sm:$0xff] %v6143_v53  ;;  %v6165_v53 = vmul.f32 %v3513_v22, %v1666_v57  ;;  %v3517_v57 = vld [vmem:[%s4465_s17 + $0xab0] sm:$0xff]  ;;  %v2030_v22 = vld [vmem:[%s4465_s17 + $0x2b8] sm:$0xff]  ;;  %v6202_v19 = vmul.f32 %v3516_v45, %v1878_v40 }
 0x217   : > { %7018 = vst [vmem:[#allocation56_spill] sm:$0xff] %v6145_v59  ;;  %v1672_v59 = vadd.f32 %v5826_v36, %v5365_v32  ;;  %v6180_v36 = vmul.f32 %v3387_v47, %v1669_v7  ;;  %v2031_v47 = vld [vmem:[%s4465_s17 + $0x2c0] sm:$0xff]  ;;  %v2033_v45 = vld [vmem:[%s4465_s17 + $0x2d0] sm:$0xff] }
 0x218   : > { %7019 = vst [vmem:[#allocation57_spill] sm:$0xff] %v6154_v54 }
 0x219   : > { %7020 = vst [vmem:[#allocation58_spill] sm:$0xff] %v6156_v20  ;;  %v6178_v20 = vmul.f32 %v2027_v55, %v1669_v7  ;;  %v3518_v55 = vld [vmem:[%s4465_s17 + $0xab8] sm:$0xff]  ;;  %v6206_v7 = vmul.f32 %v3389_v2, %v1672_v59  ;;  %v1887_v2 = vadd.f32 %v5863_v0, %v5372_v52 }
 0x21a   : > { %7021 = vst [vmem:[#allocation59_spill] sm:$0xff] %v6158_v33  ;;  %v6176_v33 = vmul.f32 %v3514_v44, %v1875_v18  ;;  %v6193_v18 = vmul.f32 %v2028_v5, %v1878_v40  ;;  %v6195_v44 = vmul.f32 %v3388_v8, %v1878_v40  ;;  %v2032_v5 = vld [vmem:[%s4465_s17 + $0x2c8] sm:$0xff] }
 0x21b   : > { %7022 = vst [vmem:[#allocation60_spill] sm:$0xff] %v6165_v53  ;;  %v3392_v8 = vld [vmem:[%s4465_s17 + $0x6c8] sm:$0xff] }
 0x21c   : > { %7023 = vst [vmem:[#allocation61_spill] sm:$0xff] %v6167_v63  ;;  %v6189_v63 = vpop.f32.mrf.mxu3  ;;  %v3520_v40 = vld [vmem:[%s4465_s17 + $0xac8] sm:$0xff] }
 0x21d   : > { %7024 = vst [vmem:[#allocation62_spill] sm:$0xff] %v6169_v38  ;;  %v6187_v38 = vpop.f32.mrf.mxu2  ;;  %v3400_v53 = vld [vmem:[%s4465_s17 + $0x708] sm:$0xff] }
 0x21e   : > { %7025 = vst [vmem:[#allocation63_spill] sm:$0xff] %v6176_v33  ;;  %v6204_v33 = vmul.f32 %v2029_v35, %v1672_v59  ;;  %v3393_v35 = vld [vmem:[%s4465_s17 + $0x6d0] sm:$0xff] }
 0x21f   : > { %7026 = vst [vmem:[#allocation64_spill] sm:$0xff] %v6178_v20  ;;  %v1884_v20 = vadd.f32 %v5847_v24, %v5372_v52  ;;  %v6217_v24 = vmul.f32 %v3390_v10, %v1881_v4  ;;  %v1681_v10 = vadd.f32 %v5875_v34, %v5365_v32 }
 0x220   : > { %7027 = vst [vmem:[#allocation65_spill] sm:$0xff] %v6180_v36  ;;  %v3391_v36 = vld [vmem:[%s4465_s17 + $0x6c0] sm:$0xff] }
 0x221   : > { %7028 = vst [vmem:[#allocation66_spill] sm:$0xff] %v6191_v23  ;;  %v6215_v23 = vmul.f32 %v2030_v22, %v1881_v4  ;;  %v3394_v22 = vld [vmem:[%s4465_s17 + $0x6d8] sm:$0xff]  ;;  %v6239_v0 = vmul.f32 %v2032_v5, %v1884_v20  ;;  %v6250_v34 = vmul.f32 %v3520_v40, %v1884_v20  ;;  %v3523_v5 = vld [vmem:[%s4465_s17 + $0xae0] sm:$0xff]  ;;  %v1985_v40 = vld [vmem:[%s4465_s17 + $0x150] sm:$0xff] }
 0x222   : > { %7029 = vst [vmem:[#allocation67_spill] sm:$0xff] %v6193_v18  ;;  %v6213_v18 = vmul.f32 %v3517_v57, %v1672_v59  ;;  %v3521_v59 = vld [vmem:[%s4465_s17 + $0xad0] sm:$0xff]  ;;  %v2034_v57 = vld [vmem:[%s4465_s17 + $0x2d8] sm:$0xff] }
 0x223   : > { %7030 = vst [vmem:[#allocation68_spill] sm:$0xff] %v6195_v44  ;;  %v1678_v44 = vadd.f32 %v5860_v37, %v5365_v32  ;;  %v6228_v37 = vmul.f32 %v3391_v36, %v1675_v1  ;;  %v3522_v36 = vld [vmem:[%s4465_s17 + $0xad8] sm:$0xff] }
 0x224   : > { %7031 = vst [vmem:[#allocation69_spill] sm:$0xff] %v6202_v19  ;;  %v6286_v19 = vmul.f32 %v3523_v5, %v1681_v10  ;;  %v3399_v5 = vld [vmem:[%s4465_s17 + $0x700] sm:$0xff] }
 0x225   : > { %7032 = vst [vmem:[#allocation70_spill] sm:$0xff] %v6204_v33  ;;  %v6226_v33 = vmul.f32 %v2031_v47, %v1675_v1  ;;  %v3395_v47 = vld [vmem:[%s4465_s17 + $0x6e0] sm:$0xff] }
 0x226   : > { %7033 = vst [vmem:[#allocation71_spill] sm:$0xff] %v6206_v7  ;;  %v6224_v7 = vmul.f32 %v3518_v55, %v1881_v4  ;;  %v6241_v4 = vmul.f32 %v3392_v8, %v1884_v20  ;;  %v2035_v55 = vld [vmem:[%s4465_s17 + $0x2e0] sm:$0xff]  ;;  %v2036_v8 = vld [vmem:[%s4465_s17 + $0x2e8] sm:$0xff]  ;;  %v6265_v20 = vmul.f32 %v3394_v22, %v1887_v2  ;;  %v3525_v22 = vld [vmem:[%s4465_s17 + $0xaf0] sm:$0xff] }
 0x227   : > { %7034 = vst [vmem:[#allocation72_spill] sm:$0xff] %v6213_v18  ;;  %v6273_v18 = vmul.f32 %v3522_v36, %v1887_v2 }
 0x228   : > { %7035 = vst [vmem:[#allocation73_spill] sm:$0xff] %v6215_v23  ;;  %v6237_v23 = vmul.f32 %v3519_v12, %v1675_v1  ;;  %v6252_v1 = vmul.f32 %v2033_v45, %v1678_v44  ;;  %v6254_v12 = vmul.f32 %v3393_v35, %v1678_v44  ;;  %v3524_v45 = vld [vmem:[%s4465_s17 + $0xae8] sm:$0xff]  ;;  %v2037_v35 = vld [vmem:[%s4465_s17 + $0x2f0] sm:$0xff] }
 0x229   : > { %7036 = vst [vmem:[#allocation74_spill] sm:$0xff] %v6217_v24  ;;  %v6235_v24 = vpop.f32.mrf.mxu0 }
 0x22a   : > { %7037 = vst [vmem:[#allocation75_spill] sm:$0xff] %v6224_v7  ;;  %v6261_v7 = vmul.f32 %v3521_v59, %v1678_v44  ;;  %v1606_v44 = vadd.f32 %v5947_v25, %v5365_v32  ;;  %v6277_v59 = vmul.f32 %v2035_v55, %v1681_v10  ;;  %v1687_v25 = vadd.f32 %v5905_v29, %v5365_v32  ;;  %v6295_v55 = vpop.f32.mrf.mxu2  ;;  %v6308_v29 = vpop.f32.mrf.mxu3 }
 0x22b   : > { %7038 = vst [vmem:[#allocation76_spill] sm:$0xff] %v6226_v33  ;;  %v6248_v33 = vpop.f32.mrf.mxu1 }
 0x22c   : > { %7039 = vst [vmem:[#allocation77_spill] sm:$0xff] %v6228_v37  ;;  %v1890_v37 = vadd.f32 %v5879_v51, %v5372_v52  ;;  %v6263_v51 = vmul.f32 %v2034_v57, %v1887_v2  ;;  %v6279_v57 = vmul.f32 %v3395_v47, %v1681_v10  ;;  %v1815_v47 = vadd.f32 %v5960_v17, %v5372_v52 }
 0x22d   : > { %7040 = vst [vmem:[#allocation78_spill] sm:$0xff] %v6237_v23 }
 0x22e   : > { %7041 = vst [vmem:[#allocation79_spill] sm:$0xff] %v6239_v0  ;;  %v7046_v0 = vld [vmem:[#allocation14_spill] sm:$0xff]  ;;  %v6288_v2 = vmul.f32 %v2036_v8, %v1890_v37  ;;  %v1896_v8 = vadd.f32 %v5908_v15, %v5372_v52 }
 0x22f   : > { %7042 = vst [vmem:[#allocation80_spill] sm:$0xff] %v6241_v4  ;;  %v3396_v4 = vld [vmem:[%s4465_s17 + $0x6e8] sm:$0xff]  ;;  %v1684_v23 = vadd.f32 %v7046_v0, %v5365_v32  ;;  %v2038_v0 = vld [vmem:[%s4465_s17 + $0x2f8] sm:$0xff] }
 0x230   : > { %7043 = vst [vmem:[#allocation81_spill] sm:$0xff] %v6250_v34  ;;  %v6290_v36 = vmul.f32 %v3396_v4, %v1890_v37  ;;  %v2039_v4 = vld [vmem:[%s4465_s17 + $0x300] sm:$0xff] }
 0x231   : > { %7044 = vst [vmem:[#allocation82_spill] sm:$0xff] %v6252_v1  ;;  %v7050_v1 = vld [vmem:[#allocation15_spill] sm:$0xff]  ;;  %v6302_v10 = vmul.f32 %v2037_v35, %v1684_v23 }
 0x232   : > { %7045 = vst [vmem:[#allocation83_spill] sm:$0xff] %v6254_v12  ;;  %v3397_v12 = vld [vmem:[%s4465_s17 + $0x6f0] sm:$0xff]  ;;  %v1893_v34 = vadd.f32 %v7050_v1, %v5372_v52  ;;  %v3526_v1 = vld [vmem:[%s4465_s17 + $0xaf8] sm:$0xff]  ;;  %v2040_v35 = vld [vmem:[%s4465_s17 + $0x308] sm:$0xff] }
 0x233   : > { %7047 = vst [vmem:[#allocation14_spill] sm:$0xff] %v6261_v7  ;;  %v3473_v7 = vld [vmem:[%s4465_s17 + $0x950] sm:$0xff] }
 0x234   : > { %7048 = vst [vmem:[#allocation84_spill] sm:$0xff] %v6263_v51  ;;  %v3345_v51 = vld [vmem:[%s4465_s17 + $0x550] sm:$0xff]  ;;  %v6315_v17 = vmul.f32 %v2038_v0, %v1893_v34  ;;  %v6322_v15 = vmul.f32 %v3526_v1, %v1893_v34  ;;  %v1609_v0 = vadd.f32 %v6043_v58, %v5365_v32  ;;  %v6337_v1 = vpop.f32.mrf.mxu1 }
 0x235   : > { %7049 = vst [vmem:[#allocation85_spill] sm:$0xff] %v6265_v20  ;;  %v3398_v20 = vld [vmem:[%s4465_s17 + $0x6f8] sm:$0xff]  ;;  %v3401_v58 = vld [vmem:[%s4465_s17 + $0x710] sm:$0xff] }
 0x236   : > { %7051 = vst [vmem:[#allocation15_spill] sm:$0xff] %v6273_v18  ;;  %v3474_v18 = vld [vmem:[%s4465_s17 + $0x958] sm:$0xff] }
 0x237   : > { %7052 = vst [vmem:[#allocation86_spill] sm:$0xff] %v6277_v59  ;;  %v6300_v59 = vmul.f32 %v3524_v45, %v1890_v37  ;;  %v6317_v37 = vmul.f32 %v3398_v20, %v1893_v34  ;;  %v3527_v45 = vld [vmem:[%s4465_s17 + $0xb00] sm:$0xff]  ;;  %v2903_v20 = vmul.f32 %v3473_v7, %v1606_v44  ;;  %v2041_v34 = vld [vmem:[%s4465_s17 + $0x310] sm:$0xff] }
 0x238   : > { %7053 = vst [vmem:[#allocation87_spill] sm:$0xff] %v6279_v57  ;;  %v1986_v57 = vld [vmem:[%s4465_s17 + $0x158] sm:$0xff]  ;;  %v6343_v7 = vmul.f32 %v3527_v45, %v1687_v25 }
 0x239   : > { %7054 = vst [vmem:[#allocation88_spill] sm:$0xff] %v6286_v19  ;;  %v6313_v19 = vmul.f32 %v3525_v22, %v1684_v23  ;;  %v6328_v22 = vpop.f32.mrf.mxu0 }
 0x23a   : > { %7055 = vst [vmem:[#allocation89_spill] sm:$0xff] %v6288_v2  ;;  %v6311_v2 = vmul.f32 %v3397_v12, %v1684_v23  ;;  %v3528_v12 = vld [vmem:[%s4465_s17 + $0xb08] sm:$0xff]  ;;  %v1690_v23 = vadd.f32 %v5962_v42, %v5365_v32  ;;  %v3347_v42 = vld [vmem:[%s4465_s17 + $0x560] sm:$0xff] }
 0x23b   : > { %7056 = vst [vmem:[#allocation90_spill] sm:$0xff] %v6290_v36  ;;  %v3346_v36 = vld [vmem:[%s4465_s17 + $0x558] sm:$0xff] }
 0x23c   : > { %7057 = vst [vmem:[#allocation91_spill] sm:$0xff] %v6300_v59  ;;  %v2508_v59 = vmul.f32 %v3345_v51, %v1606_v44  ;;  %v6334_v51 = vmul.f32 %v3399_v5, %v1687_v25  ;;  %v3475_v5 = vld [vmem:[%s4465_s17 + $0x960] sm:$0xff]  ;;  %v6358_v45 = vmul.f32 %v2041_v34, %v1690_v23  ;;  %v3402_v34 = vld [vmem:[%s4465_s17 + $0x718] sm:$0xff] }
 0x23d   : > { %7058 = vst [vmem:[#allocation92_spill] sm:$0xff] %v6302_v10  ;;  %v2113_v10 = vmul.f32 %v1985_v40, %v1606_v44  ;;  %v6332_v40 = vmul.f32 %v2039_v4, %v1687_v25  ;;  %v6345_v44 = vmul.f32 %v2040_v35, %v1896_v8  ;;  %v2904_v4 = vmul.f32 %v3474_v18, %v1815_v47  ;;  %v3476_v25 = vld [vmem:[%s4465_s17 + $0x968] sm:$0xff]  ;;  %v3529_v35 = vld [vmem:[%s4465_s17 + $0xb10] sm:$0xff] }
 0x23e   : > { %7059 = vst [vmem:[#allocation93_spill] sm:$0xff] %v6311_v2  ;;  %v6351_v2 = vmul.f32 %v3400_v53, %v1896_v8  ;;  %v1899_v18 = vadd.f32 %v5975_v48, %v5372_v52  ;;  %v2510_v53 = vmul.f32 %v3347_v42, %v1609_v0  ;;  %v6374_v42 = vpop.f32.mrf.mxu2 }
 0x23f   : > { %7060 = vst [vmem:[#allocation94_spill] sm:$0xff] %v6313_v19  ;;  %v2509_v19 = vmul.f32 %v3346_v36, %v1815_v47  ;;  %v2219_v54 = vadd.f32 %v5916_v14, %v2113_v10  ;;  %v3009_v36 = vadd.f32 %v5920_v62, %v2903_v20  ;;  %v2042_v14 = vld [vmem:[%s4465_s17 + $0x318] sm:$0xff]  ;;  %v3078_v62 = vadd.f32 %v5931_v41, %v2904_v4 }
 0x240   : > { %7061 = vst [vmem:[#allocation95_spill] sm:$0xff] %v6315_v17  ;;  %v1818_v17 = vadd.f32 %v6056_v11, %v5372_v52  ;;  %v2614_v11 = vadd.f32 %v5918_v39, %v2508_v59  ;;  %v2905_v39 = vmul.f32 %v3475_v5, %v1609_v0  ;;  %v1612_v20 = vadd.f32 %v6139_v43, %v5365_v32  ;;  %v1990_v4 = vld [vmem:[%s4465_s17 + $0x178] sm:$0xff] }
 0x241   : > { %7062 = vst [vmem:[#allocation96_spill] sm:$0xff] %v6317_v37  ;;  %v1987_v37 = vld [vmem:[%s4465_s17 + $0x160] sm:$0xff]  ;;  %v2683_v48 = vadd.f32 %v5929_v26, %v2509_v19  ;;  %v6383_v26 = vmul.f32 %v2042_v14, %v1899_v18  ;;  %v1693_v41 = vadd.f32 %v6080_v60, %v5365_v32  ;;  %v6387_v43 = vpop.f32.mrf.mxu0  ;;  %v6389_v19 = vpop.f32.mrf.mxu3  ;;  %v3350_v5 = vld [vmem:[%s4465_s17 + $0x578] sm:$0xff] }
 0x242   : > { %7063 = vst [vmem:[#allocation97_spill] sm:$0xff] %v6322_v15  ;;  %v2114_v15 = vmul.f32 %v1986_v57, %v1815_v47  ;;  %v6353_v57 = vmul.f32 %v3528_v12, %v1896_v8  ;;  %v2115_v47 = vmul.f32 %v1987_v37, %v1609_v0  ;;  %v6363_v8 = vmul.f32 %v3401_v58, %v1690_v23  ;;  %v1989_v58 = vld [vmem:[%s4465_s17 + $0x170] sm:$0xff] }
 0x243   : > { %7064 = vst [vmem:[#allocation98_spill] sm:$0xff] %v6332_v40  ;;  %v3348_v40 = vld [vmem:[%s4465_s17 + $0x568] sm:$0xff]  ;;  %v2906_v37 = vmul.f32 %v3476_v25, %v1818_v17  ;;  %v1821_v0 = vadd.f32 %v6152_v16, %v5372_v52  ;;  %v6393_v16 = vmul.f32 %v3402_v34, %v1899_v18  ;;  %v2043_v25 = vld [vmem:[%s4465_s17 + $0x320] sm:$0xff]  ;;  %v3010_v60 = vadd.f32 %v3009_v36, %v2905_v39 }
 0x244   : > { %7065 = vst [vmem:[#allocation99_spill] sm:$0xff] %v6334_v51  ;;  %v1988_v51 = vld [vmem:[%s4465_s17 + $0x168] sm:$0xff]  ;;  %v2288_v10 = vadd.f32 %v5927_v28, %v2114_v15  ;;  %v2511_v12 = vmul.f32 %v3348_v40, %v1818_v17  ;;  %v3349_v28 = vld [vmem:[%s4465_s17 + $0x570] sm:$0xff]  ;;  %v6381_v40 = vmul.f32 %v3529_v35, %v1690_v23  ;;  %v6398_v35 = vpop.f32.mrf.mxu1 }
 0x245   : > { %7066 = vst [vmem:[#allocation100_spill] sm:$0xff] %v6358_v45  ;;  %v2116_v59 = vmul.f32 %v1988_v51, %v1818_v17  ;;  %v3530_v45 = vld [vmem:[%s4465_s17 + $0xb18] sm:$0xff]  ;;  %v3477_v15 = vld [vmem:[%s4465_s17 + $0x970] sm:$0xff]  ;;  %v2220_v17 = vadd.f32 %v2219_v54, %v2115_v47  ;;  %v2615_v51 = vadd.f32 %v2614_v11, %v2510_v53  ;;  %v3531_v54 = vld [vmem:[%s4465_s17 + $0xb20] sm:$0xff]  ;;  %v1902_v11 = vadd.f32 %v6082_v13, %v5372_v52 }
 0x246   : > { %7067 = vst [vmem:[#allocation101_spill] sm:$0xff] %v6363_v8  ;;  %v6395_v23 = vmul.f32 %v3530_v45, %v1899_v18  ;;  %v3403_v8 = vld [vmem:[%s4465_s17 + $0x720] sm:$0xff]  ;;  %v3079_v47 = vadd.f32 %v3078_v62, %v2906_v37  ;;  %v2117_v53 = vmul.f32 %v1989_v58, %v1612_v20  ;;  %v2512_v45 = vmul.f32 %v3349_v28, %v1612_v20  ;;  %v2044_v34 = vld [vmem:[%s4465_s17 + $0x328] sm:$0xff] }
 0x247   : > { %7068 = vst [vmem:[#allocation102_spill] sm:$0xff] %v6381_v40  ;;  %v2289_v14 = vadd.f32 %v2288_v10, %v2116_v59  ;;  %v3478_v40 = vld [vmem:[%s4465_s17 + $0x978] sm:$0xff]  ;;  %v2907_v18 = vmul.f32 %v3477_v15, %v1612_v20  ;;  %v3532_v36 = vld [vmem:[%s4465_s17 + $0xb28] sm:$0xff]  ;;  %v2118_v10 = vmul.f32 %v1990_v4, %v1821_v0  ;;  %v2513_v39 = vmul.f32 %v3350_v5, %v1821_v0  ;;  %v1991_v13 = vld [vmem:[%s4465_s17 + $0x180] sm:$0xff] }
 0x248   : > { %7069 = vst [vmem:[#allocation103_spill] sm:$0xff] %v6383_v26  ;;  %v2684_v26 = vadd.f32 %v2683_v48, %v2511_v12  ;;  %v1615_v59 = vadd.f32 %v6235_v24, %v5365_v32  ;;  %v6410_v12 = vmul.f32 %v2043_v25, %v1693_v41  ;;  %v2908_v48 = vmul.f32 %v3478_v40, %v1821_v0  ;;  %v3351_v62 = vld [vmem:[%s4465_s17 + $0x580] sm:$0xff]  ;;  %v1992_v15 = vld [vmem:[%s4465_s17 + $0x188] sm:$0xff] }
 0x249   : > { %7070 = vst [vmem:[#allocation104_spill] sm:$0xff] %v6395_v23  ;;  %v3404_v23 = vld [vmem:[%s4465_s17 + $0x728] sm:$0xff]  ;;  %v1824_v37 = vadd.f32 %v6248_v33, %v5372_v52  ;;  %v6416_v20 = vmul.f32 %v3403_v8, %v1693_v41  ;;  %v6418_v58 = vmul.f32 %v3531_v54, %v1693_v41  ;;  %v3479_v28 = vld [vmem:[%s4465_s17 + $0x980] sm:$0xff]  ;;  %v6423_v5 = vmul.f32 %v2044_v34, %v1902_v11  ;;  %v2045_v41 = vld [vmem:[%s4465_s17 + $0x330] sm:$0xff] }
 0x24a   : > { %v3352_v4 = vld [vmem:[%s4465_s17 + $0x588] sm:$0xff]  ;;  %v6425_v24 = vmul.f32 %v3404_v23, %v1902_v11  ;;  %v6427_v0 = vmul.f32 %v3532_v36, %v1902_v11  ;;  %v1696_v40 = vadd.f32 %v6187_v38, %v5365_v32  ;;  %v2221_v25 = vadd.f32 %v2220_v17, %v2117_v53  ;;  %v3405_v54 = vld [vmem:[%s4465_s17 + $0x730] sm:$0xff]  ;;  %v2046_v38 = vld [vmem:[%s4465_s17 + $0x338] sm:$0xff]  ;;  %v6440_v17 = vpop.f32.mrf.mxu0 }
 0x24b   : > { %7071 = vst [vmem:[#allocation105_spill] sm:$0xff] %v6416_v20  ;;  %v2616_v33 = vadd.f32 %v2615_v51, %v2512_v45  ;;  %v3011_v8 = vadd.f32 %v3010_v60, %v2907_v18  ;;  %v3480_v20 = vld [vmem:[%s4465_s17 + $0x988] sm:$0xff]  ;;  %v1905_v34 = vadd.f32 %v6189_v63, %v5372_v52  ;;  %v2290_v23 = vadd.f32 %v2289_v14, %v2118_v10  ;;  %v3406_v18 = vld [vmem:[%s4465_s17 + $0x738] sm:$0xff] }
 0x24c   : > { %7072 = vst [vmem:[#allocation106_spill] sm:$0xff] %v6418_v58  ;;  %v2119_v11 = vmul.f32 %v1991_v13, %v1615_v59  ;;  %v2514_v36 = vmul.f32 %v3351_v62, %v1615_v59  ;;  %v3080_v51 = vadd.f32 %v3079_v47, %v2908_v48  ;;  %v2909_v60 = vmul.f32 %v3479_v28, %v1615_v59  ;;  %v3534_v58 = vld [vmem:[%s4465_s17 + $0xb38] sm:$0xff]  ;;  %v6444_v63 = vpop.f32.mrf.mxu1  ;;  %v1993_v47 = vld [vmem:[%s4465_s17 + $0x190] sm:$0xff] }
 0x24d   : > { %7073 = vst [vmem:[#allocation107_spill] sm:$0xff] %v6423_v5  ;;  %v6436_v5 = vpop.f32.mrf.mxu2  ;;  %v2120_v53 = vmul.f32 %v1992_v15, %v1824_v37  ;;  %v2515_v45 = vmul.f32 %v3352_v4, %v1824_v37  ;;  %v2910_v14 = vmul.f32 %v3480_v20, %v1824_v37  ;;  %v1618_v10 = vadd.f32 %v6328_v22, %v5365_v32  ;;  %v3353_v59 = vld [vmem:[%s4465_s17 + $0x590] sm:$0xff]  ;;  %v1994_v4 = vld [vmem:[%s4465_s17 + $0x198] sm:$0xff] }
 0x24e   : > { %7074 = vst [vmem:[#allocation108_spill] sm:$0xff] %v6425_v24  ;;  %v2685_v24 = vadd.f32 %v2684_v26, %v2513_v39  ;;  %v6446_v26 = vpop.f32.mrf.mxu3  ;;  %v6450_v39 = vmul.f32 %v2045_v41, %v1696_v40  ;;  %v6452_v13 = vmul.f32 %v3405_v54, %v1696_v40  ;;  %v3481_v48 = vld [vmem:[%s4465_s17 + $0x990] sm:$0xff]  ;;  %v1827_v62 = vadd.f32 %v6337_v1, %v5372_v52  ;;  %v3354_v41 = vld [vmem:[%s4465_s17 + $0x598] sm:$0xff]  ;;  %v2047_v1 = vld [vmem:[%s4465_s17 + $0x340] sm:$0xff] }
 0x24f   : > { %7075 = vst [vmem:[#allocation109_spill] sm:$0xff] %v6427_v0  ;;  %v3533_v0 = vld [vmem:[%s4465_s17 + $0xb30] sm:$0xff]  ;;  %v6461_v37 = vmul.f32 %v2046_v38, %v1905_v34  ;;  %v1699_v22 = vadd.f32 %v6295_v55, %v5365_v32  ;;  %v2222_v20 = vadd.f32 %v2221_v25, %v2119_v11  ;;  %v2617_v15 = vadd.f32 %v2616_v33, %v2514_v36  ;;  %v3482_v38 = vld [vmem:[%s4465_s17 + $0x998] sm:$0xff]  ;;  %v3535_v55 = vld [vmem:[%s4465_s17 + $0xb40] sm:$0xff] }
 0x250   : > { %7076 = vst [vmem:[#allocation110_spill] sm:$0xff] %v6450_v39  ;;  %v6459_v28 = vmul.f32 %v3533_v0, %v1696_v40  ;;  %v6467_v54 = vmul.f32 %v3406_v18, %v1905_v34  ;;  %v3012_v39 = vadd.f32 %v3011_v8, %v2909_v60  ;;  %v2291_v0 = vadd.f32 %v2290_v23, %v2120_v53  ;;  %v3536_v8 = vld [vmem:[%s4465_s17 + $0xb48] sm:$0xff] }
 0x251   : > { %7077 = vst [vmem:[#allocation111_spill] sm:$0xff] %v6452_v13  ;;  %v6469_v13 = vmul.f32 %v3534_v58, %v1905_v34  ;;  %v2686_v40 = vadd.f32 %v2685_v24, %v2515_v45  ;;  %v1908_v25 = vadd.f32 %v6308_v29, %v5372_v52  ;;  %v3081_v33 = vadd.f32 %v3080_v51, %v2910_v14  ;;  %v3408_v58 = vld [vmem:[%s4465_s17 + $0x748] sm:$0xff]  ;;  %v1995_v45 = vld [vmem:[%s4465_s17 + $0x1a0] sm:$0xff] }
 0x252   : > { %7078 = vst [vmem:[#allocation112_spill] sm:$0xff] %v6461_v37  ;;  %v3407_v37 = vld [vmem:[%s4465_s17 + $0x740] sm:$0xff]  ;;  %v2121_v11 = vmul.f32 %v1993_v47, %v1618_v10  ;;  %v2516_v36 = vmul.f32 %v3353_v59, %v1618_v10  ;;  %v2911_v18 = vmul.f32 %v3481_v48, %v1618_v10  ;;  %v2122_v34 = vmul.f32 %v1994_v4, %v1827_v62  ;;  %v1626_v47 = vpop.f32.mrf.mxu0  ;;  %v3356_v4 = vld [vmem:[%s4465_s17 + $0x5a8] sm:$0xff] }
 0x253   : > { %7079 = vst [vmem:[#allocation113_spill] sm:$0xff] %v6467_v54  ;;  %v2048_v54 = vld [vmem:[%s4465_s17 + $0x348] sm:$0xff]  ;;  %v2517_v24 = vmul.f32 %v3354_v41, %v1827_v62  ;;  %v1621_v23 = vadd.f32 %v6387_v43, %v5365_v32  ;;  %v6482_v60 = vmul.f32 %v2047_v1, %v1699_v22  ;;  %v2912_v53 = vmul.f32 %v3482_v38, %v1827_v62  ;;  %v3355_v29 = vld [vmem:[%s4465_s17 + $0x5a0] sm:$0xff] }
 0x254   : > { %v1830_v51 = vadd.f32 %v6398_v35, %v5372_v52  ;;  %v6488_v14 = vmul.f32 %v3407_v37, %v1699_v22  ;;  %v6490_v10 = vmul.f32 %v3535_v55, %v1699_v22  ;;  %v3483_v48 = vld [vmem:[%s4465_s17 + $0x9a0] sm:$0xff]  ;;  %v1996_v43 = vld [vmem:[%s4465_s17 + $0x1a8] sm:$0xff]  ;;  %v6497_v41 = vmul.f32 %v2048_v54, %v1908_v25  ;;  %v1835_v22 = vpop.f32.mrf.mxu1 }
 0x255   : > { %7080 = vst [vmem:[#allocation114_spill] sm:$0xff] %v6482_v60  ;;  %v6492_v59 = vpop.f32.mrf.mxu2  ;;  %v6499_v62 = vmul.f32 %v3408_v58, %v1908_v25  ;;  %v6501_v35 = vmul.f32 %v3536_v8, %v1908_v25  ;;  %v1702_v37 = vadd.f32 %v6374_v42, %v5365_v32  ;;  %v2223_v1 = vadd.f32 %v2222_v20, %v2121_v11  ;;  %v3537_v60 = vld [vmem:[%s4465_s17 + $0xb50] sm:$0xff]  ;;  %v2050_v42 = vld [vmem:[%s4465_s17 + $0x358] sm:$0xff] }
 0x256   : > { %7081 = vst [vmem:[#allocation115_spill] sm:$0xff] %v6488_v14  ;;  %v2618_v38 = vadd.f32 %v2617_v15, %v2516_v36  ;;  %v3013_v55 = vadd.f32 %v3012_v39, %v2911_v18  ;;  %v3409_v14 = vld [vmem:[%s4465_s17 + $0x750] sm:$0xff]  ;;  %v1911_v54 = vadd.f32 %v6389_v19, %v5372_v52  ;;  %v2292_v58 = vadd.f32 %v2291_v0, %v2122_v34  ;;  %v6512_v20 = vpop.f32.mrf.mxu3  ;;  %v3410_v18 = vld [vmem:[%s4465_s17 + $0x758] sm:$0xff] }
 0x257   : > { %7082 = vst [vmem:[#allocation116_spill] sm:$0xff] %v6490_v10  ;;  %v2049_v10 = vld [vmem:[%s4465_s17 + $0x350] sm:$0xff]  ;;  %v2123_v25 = vmul.f32 %v1995_v45, %v1621_v23  ;;  %v2518_v8 = vmul.f32 %v3355_v29, %v1621_v23  ;;  %v3082_v39 = vadd.f32 %v3081_v33, %v2912_v53  ;;  %v2913_v15 = vmul.f32 %v3483_v48, %v1621_v23  ;;  %v3538_v45 = vld [vmem:[%s4465_s17 + $0xb58] sm:$0xff] }
 0x258   : > { %7083 = vst [vmem:[#allocation117_spill] sm:$0xff] %v6499_v62  ;;  %v2687_v62 = vadd.f32 %v2686_v40, %v2517_v24  ;;  %v2124_v11 = vmul.f32 %v1996_v43, %v1830_v51  ;;  %v1624_v36 = vadd.f32 %v6440_v17, %v5365_v32  ;;  %v2519_v19 = vmul.f32 %v3356_v4, %v1830_v51  ;;  %v1997_v0 = vld [vmem:[%s4465_s17 + $0x1b0] sm:$0xff]  ;;  %v1998_v43 = vld [vmem:[%s4465_s17 + $0x1b8] sm:$0xff] }
 0x259   : > { %7084 = vst [vmem:[#allocation118_spill] sm:$0xff] %v6501_v35  ;;  %v3484_v35 = vld [vmem:[%s4465_s17 + $0x9a8] sm:$0xff]  ;;  %v6518_v40 = vmul.f32 %v2049_v10, %v1702_v37  ;;  %v6520_v34 = vmul.f32 %v3409_v14, %v1702_v37  ;;  %v6522_v24 = vmul.f32 %v3537_v60, %v1702_v37  ;;  %v3357_v33 = vld [vmem:[%s4465_s17 + $0x5b0] sm:$0xff]  ;;  %v1833_v17 = vadd.f32 %v6444_v63, %v5372_v52  ;;  %v3358_v60 = vld [vmem:[%s4465_s17 + $0x5b8] sm:$0xff] }
 0x25a   : > { %v2914_v29 = vmul.f32 %v3484_v35, %v1830_v51  ;;  %v3485_v23 = vld [vmem:[%s4465_s17 + $0x9b0] sm:$0xff]  ;;  %v6529_v53 = vmul.f32 %v2050_v42, %v1911_v54  ;;  %v1705_v10 = vadd.f32 %v6436_v5, %v5365_v32  ;;  %v2224_v48 = vadd.f32 %v2223_v1, %v2123_v25  ;;  %v2051_v51 = vld [vmem:[%s4465_s17 + $0x360] sm:$0xff]  ;;  %v1629_v5 = vpop.f32.mrf.mxu0  ;;  %v2052_v25 = vld [vmem:[%s4465_s17 + $0x368] sm:$0xff] }
 0x25b   : > { %7085 = vst [vmem:[#allocation119_spill] sm:$0xff] %v6518_v40  ;;  %v2619_v14 = vadd.f32 %v2618_v38, %v2518_v8  ;;  %v6535_v4 = vmul.f32 %v3410_v18, %v1911_v54  ;;  %v1914_v35 = vadd.f32 %v6446_v26, %v5372_v52  ;;  %v3014_v63 = vadd.f32 %v3013_v55, %v2913_v15  ;;  %v3411_v1 = vld [vmem:[%s4465_s17 + $0x760] sm:$0xff]  ;;  %v3412_v55 = vld [vmem:[%s4465_s17 + $0x768] sm:$0xff] }
 0x25c   : > { %7086 = vst [vmem:[#allocation120_spill] sm:$0xff] %v6520_v34  ;;  %v2293_v37 = vadd.f32 %v2292_v58, %v2124_v11  ;;  %v2125_v42 = vmul.f32 %v1997_v0, %v1624_v36  ;;  %v3539_v38 = vld [vmem:[%s4465_s17 + $0xb60] sm:$0xff]  ;;  %v2688_v8 = vadd.f32 %v2687_v62, %v2519_v19  ;;  %v2520_v18 = vmul.f32 %v3357_v33, %v1624_v36  ;;  %v1838_v26 = vpop.f32.mrf.mxu1  ;;  %v2000_v33 = vld [vmem:[%s4465_s17 + $0x1c8] sm:$0xff] }
 0x25d   : > { %7087 = vst [vmem:[#allocation121_spill] sm:$0xff] %v6522_v24  ;;  %v3486_v24 = vld [vmem:[%s4465_s17 + $0x9b8] sm:$0xff]  ;;  %v1627_v34 = vadd.f32 %v1626_v47, %v5365_v32  ;;  %v3083_v58 = vadd.f32 %v3082_v39, %v2914_v29  ;;  %v2126_v15 = vmul.f32 %v1998_v43, %v1833_v17  ;;  %v3359_v11 = vld [vmem:[%s4465_s17 + $0x5c0] sm:$0xff]  ;;  %v1836_v0 = vadd.f32 %v1835_v22, %v5372_v52  ;;  %v6553_v62 = vpop.f32.mrf.mxu2  ;;  %v3540_v29 = vld [vmem:[%s4465_s17 + $0xb68] sm:$0xff] }
 0x25e   : > { %7088 = vst [vmem:[#allocation122_spill] sm:$0xff] %v6529_v53  ;;  %v6540_v53 = vmul.f32 %v3538_v45, %v1911_v54  ;;  %v1999_v54 = vld [vmem:[%s4465_s17 + $0x1c0] sm:$0xff]  ;;  %v6551_v45 = vmul.f32 %v2051_v51, %v1705_v10  ;;  %v2521_v19 = vmul.f32 %v3358_v60, %v1833_v17  ;;  %v6557_v47 = vmul.f32 %v3411_v1, %v1705_v10  ;;  %v3360_v40 = vld [vmem:[%s4465_s17 + $0x5c8] sm:$0xff] }
 0x25f   : > { %7089 = vst [vmem:[#allocation123_spill] sm:$0xff] %v6535_v4  ;;  %v2915_v4 = vmul.f32 %v3485_v23, %v1624_v36  ;;  %v3487_v36 = vld [vmem:[%s4465_s17 + $0x9c0] sm:$0xff]  ;;  %v6559_v23 = vmul.f32 %v3539_v38, %v1705_v10  ;;  %v6561_v39 = vmul.f32 %v2052_v25, %v1914_v35  ;;  %v2225_v43 = vadd.f32 %v2224_v48, %v2125_v42  ;;  %v3488_v22 = vld [vmem:[%s4465_s17 + $0x9c8] sm:$0xff]  ;;  %v2053_v38 = vld [vmem:[%s4465_s17 + $0x370] sm:$0xff]  ;;  %v1919_v25 = vpop.f32.mrf.mxu3 }
 0x260   : > { %7090 = vst [vmem:[#allocation124_spill] sm:$0xff] %v6540_v53  ;;  %v2916_v53 = vmul.f32 %v3486_v24, %v1833_v17  ;;  %v6566_v51 = vmul.f32 %v3412_v55, %v1914_v35  ;;  %v1708_v60 = vadd.f32 %v6492_v59, %v5365_v32  ;;  %v2522_v10 = vmul.f32 %v3359_v11, %v1627_v34  ;;  %v3413_v55 = vld [vmem:[%s4465_s17 + $0x770] sm:$0xff] }
 0x261   : > { %7091 = vst [vmem:[#allocation125_spill] sm:$0xff] %v6551_v45  ;;  %v2620_v45 = vadd.f32 %v2619_v14, %v2520_v18  ;;  %v3015_v1 = vadd.f32 %v3014_v63, %v2915_v4  ;;  %v2294_v48 = vadd.f32 %v2293_v37, %v2126_v15  ;;  %v2917_v24 = vmul.f32 %v3487_v36, %v1627_v34  ;;  %v2001_v63 = vld [vmem:[%s4465_s17 + $0x1d0] sm:$0xff]  ;;  %v2054_v36 = vld [vmem:[%s4465_s17 + $0x378] sm:$0xff] }
 0x262   : > { %7092 = vst [vmem:[#allocation126_spill] sm:$0xff] %v6557_v47  ;;  %v2127_v47 = vmul.f32 %v1999_v54, %v1627_v34  ;;  %v2128_v17 = vmul.f32 %v2000_v33, %v1836_v0  ;;  %v6571_v42 = vmul.f32 %v3540_v29, %v1914_v35  ;;  %v2523_v59 = vmul.f32 %v3360_v40, %v1836_v0  ;;  %v3541_v18 = vld [vmem:[%s4465_s17 + $0xb70] sm:$0xff]  ;;  %v2002_v35 = vld [vmem:[%s4465_s17 + $0x1d8] sm:$0xff]  ;;  %v1632_v37 = vpop.f32.mrf.mxu0 }
 0x263   : > { %7093 = vst [vmem:[#allocation127_spill] sm:$0xff] %v6559_v23  ;;  %v2918_v14 = vmul.f32 %v3488_v22, %v1836_v0  ;;  %v1630_v4 = vadd.f32 %v1629_v5, %v5365_v32  ;;  %v3084_v54 = vadd.f32 %v3083_v58, %v2916_v53  ;;  %v3361_v11 = vld [vmem:[%s4465_s17 + $0x5d0] sm:$0xff]  ;;  %v1839_v34 = vadd.f32 %v1838_v26, %v5372_v52  ;;  %v3362_v0 = vld [vmem:[%s4465_s17 + $0x5d8] sm:$0xff]  ;;  %v2003_v22 = vld [vmem:[%s4465_s17 + $0x1e0] sm:$0xff] }
 0x264   : > { %7094 = vst [vmem:[#allocation128_spill] sm:$0xff] %v6561_v39  ;;  %v3489_v39 = vld [vmem:[%s4465_s17 + $0x9d0] sm:$0xff]  ;;  %v6581_v15 = vmul.f32 %v2053_v38, %v1708_v60  ;;  %v1917_v40 = vadd.f32 %v6512_v20, %v5372_v52  ;;  %v2621_v5 = vadd.f32 %v2620_v45, %v2522_v10  ;;  %v1633_v53 = vadd.f32 %v1632_v37, %v5365_v32  ;;  %v1841_v26 = vpop.f32.mrf.mxu1  ;;  %v3363_v38 = vld [vmem:[%s4465_s17 + $0x5e0] sm:$0xff]  ;;  %v3414_v45 = vld [vmem:[%s4465_s17 + $0x778] sm:$0xff] }
 0x265   : > { %7095 = vst [vmem:[#allocation129_spill] sm:$0xff] %v6566_v51  ;;  %v2689_v51 = vadd.f32 %v2688_v8, %v2521_v19  ;;  %v2226_v8 = vadd.f32 %v2225_v43, %v2127_v47  ;;  %v3490_v19 = vld [vmem:[%s4465_s17 + $0x9d8] sm:$0xff]  ;;  %v6588_v58 = vmul.f32 %v3413_v55, %v1708_v60  ;;  %v3016_v33 = vadd.f32 %v3015_v1, %v2917_v24  ;;  %v3491_v37 = vld [vmem:[%s4465_s17 + $0x9e0] sm:$0xff]  ;;  %v3364_v24 = vld [vmem:[%s4465_s17 + $0x5e8] sm:$0xff] }
 0x266   : > { %7096 = vst [vmem:[#allocation130_spill] sm:$0xff] %v6571_v42  ;;  %v2295_v29 = vadd.f32 %v2294_v48, %v2128_v17  ;;  %v1842_v20 = vadd.f32 %v1841_v26, %v5372_v52  ;;  %v3085_v43 = vadd.f32 %v3084_v54, %v2918_v14  ;;  %v2129_v10 = vmul.f32 %v2001_v63, %v1630_v4  ;;  %v3542_v42 = vld [vmem:[%s4465_s17 + $0xb78] sm:$0xff]  ;;  %v6605_v17 = vpop.f32.mrf.mxu2  ;;  %v3492_v14 = vld [vmem:[%s4465_s17 + $0x9e8] sm:$0xff]  ;;  %v2055_v54 = vld [vmem:[%s4465_s17 + $0x380] sm:$0xff] }
 0x267   : > { %7097 = vst [vmem:[#allocation131_spill] sm:$0xff] %v6581_v15  ;;  %v6593_v15 = vmul.f32 %v3541_v18, %v1708_v60  ;;  %v2690_v47 = vadd.f32 %v2689_v51, %v2523_v59  ;;  %v2524_v55 = vmul.f32 %v3361_v11, %v1630_v4  ;;  %v2919_v23 = vmul.f32 %v3489_v39, %v1630_v4 }
 0x268   : > { %7098 = vst [vmem:[#allocation132_spill] sm:$0xff] %v6588_v58  ;;  %v2004_v58 = vld [vmem:[%s4465_s17 + $0x1e8] sm:$0xff]  ;;  %v2130_v1 = vmul.f32 %v2002_v35, %v1839_v34  ;;  %v6601_v48 = vmul.f32 %v2054_v36, %v1917_v40  ;;  %v1711_v60 = vadd.f32 %v6553_v62, %v5365_v32  ;;  %v2525_v18 = vmul.f32 %v3362_v0, %v1839_v34 }
 0x269   : > { %v2920_v51 = vmul.f32 %v3490_v19, %v1839_v34  ;;  %v2131_v59 = vmul.f32 %v2003_v22, %v1633_v53  ;;  %v6608_v63 = vmul.f32 %v3414_v45, %v1917_v40  ;;  %v2526_v39 = vmul.f32 %v3363_v38, %v1633_v53  ;;  %v6614_v34 = vpop.f32.mrf.mxu3  ;;  %v2005_v38 = vld [vmem:[%s4465_s17 + $0x1f0] sm:$0xff] }
 0x26a   : > { %7099 = vst [vmem:[#allocation133_spill] sm:$0xff] %v6601_v48  ;;  %v2921_v4 = vmul.f32 %v3491_v37, %v1633_v53  ;;  %v2132_v11 = vmul.f32 %v2004_v58, %v1842_v20  ;;  %v6611_v35 = vmul.f32 %v3542_v42, %v1917_v40  ;;  %v2227_v26 = vadd.f32 %v2226_v8, %v2129_v10  ;;  %v3365_v53 = vld [vmem:[%s4465_s17 + $0x5f0] sm:$0xff]  ;;  %v3366_v37 = vld [vmem:[%s4465_s17 + $0x5f8] sm:$0xff] }
 0x26b   : > { %7100 = vst [vmem:[#allocation134_spill] sm:$0xff] %v6608_v63  ;;  %v2622_v36 = vadd.f32 %v2621_v5, %v2524_v55  ;;  %v2527_v62 = vmul.f32 %v3364_v24, %v1842_v20  ;;  %v1920_v0 = vadd.f32 %v1919_v25, %v5372_v52  ;;  %v3017_v19 = vadd.f32 %v3016_v33, %v2919_v23  ;;  %v1635_v63 = vpop.f32.mrf.mxu0  ;;  %v3493_v58 = vld [vmem:[%s4465_s17 + $0x9f0] sm:$0xff]  ;;  %v2006_v55 = vld [vmem:[%s4465_s17 + $0x1f8] sm:$0xff] }
 0x26c   : > { %7101 = vst [vmem:[#allocation135_spill] sm:$0xff] %v6611_v35  ;;  %v2296_v22 = vadd.f32 %v2295_v29, %v2130_v1  ;;  %v2922_v45 = vmul.f32 %v3492_v14, %v1842_v20  ;;  %v6619_v42 = vmul.f32 %v2055_v54, %v1711_v60  ;;  %v2691_v40 = vadd.f32 %v2690_v47, %v2525_v18  ;;  %v1844_v10 = vpop.f32.mrf.mxu1  ;;  %v3494_v23 = vld [vmem:[%s4465_s17 + $0x9f8] sm:$0xff]  ;;  %v3415_v1 = vld [vmem:[%s4465_s17 + $0x780] sm:$0xff] }
 0x26d   : > { %v3086_v8 = vadd.f32 %v3085_v43, %v2920_v51  ;;  %v2228_v5 = vadd.f32 %v2227_v26, %v2131_v59  ;;  %v1636_v25 = vadd.f32 %v1635_v63, %v5365_v32  ;;  %v2623_v33 = vadd.f32 %v2622_v36, %v2526_v39  ;;  %v3543_v43 = vld [vmem:[%s4465_s17 + $0xb80] sm:$0xff]  ;;  %v2056_v26 = vld [vmem:[%s4465_s17 + $0x388] sm:$0xff] }
 0x26e   : > { %7102 = vst [vmem:[#allocation136_spill] sm:$0xff] %v6619_v42  ;;  %v3018_v29 = vadd.f32 %v3017_v19, %v2921_v4  ;;  %v2297_v20 = vadd.f32 %v2296_v22, %v2132_v11  ;;  %v1845_v24 = vadd.f32 %v1844_v10, %v5372_v52  ;;  %v2692_v14 = vadd.f32 %v2691_v40, %v2527_v62  ;;  %v3416_v22 = vld [vmem:[%s4465_s17 + $0x788] sm:$0xff] }
 0x26f   : > { %v2133_v54 = vmul.f32 %v2005_v38, %v1636_v25  ;;  %v2528_v42 = vmul.f32 %v3365_v53, %v1636_v25  ;;  %v2923_v47 = vmul.f32 %v3493_v58, %v1636_v25  ;;  %v3087_v18 = vadd.f32 %v3086_v8, %v2922_v45  ;;  %v1716_v38 = vpop.f32.mrf.mxu2  ;;  %v7103_v8 = vld [vmem:[#allocation16_spill] sm:$0xff] }
 0x270   : > { %v2134_v51 = vmul.f32 %v2006_v55, %v1845_v24  ;;  %v2529_v59 = vmul.f32 %v3366_v37, %v1845_v24  ;;  %v2924_v63 = vmul.f32 %v3494_v23, %v1845_v24  ;;  %v6629_v4 = vmul.f32 %v3415_v1, %v1711_v60  ;;  %v7105_v37 = vld [vmem:[#allocation18_spill] sm:$0xff] }
 0x271   : > { %v2229_v35 = vadd.f32 %v2228_v5, %v2133_v54  ;;  %v2624_v48 = vadd.f32 %v2623_v33, %v2528_v42  ;;  %v3019_v39 = vadd.f32 %v3018_v29, %v2923_v47  ;;  %v6631_v11 = vmul.f32 %v3543_v43, %v1711_v60  ;;  %v3544_v42 = vld [vmem:[%s4465_s17 + $0xb88] sm:$0xff]  ;;  %v7104_v60 = vld [vmem:[#allocation17_spill] sm:$0xff]  ;;  %v2057_v33 = vld [vmem:[%s4465_s17 + $0x390] sm:$0xff]  ;;  %v1925_v29 = vpop.f32.mrf.mxu3 }
 0x272   : > { %v2298_v36 = vadd.f32 %v2297_v20, %v2134_v51  ;;  %v2693_v62 = vadd.f32 %v2692_v14, %v2529_v59  ;;  %v3088_v19 = vadd.f32 %v3087_v18, %v2924_v63  ;;  %v6637_v40 = vmul.f32 %v2056_v26, %v1920_v0  ;;  %v7108_v20 = vld [vmem:[#allocation21_spill] sm:$0xff]  ;;  %v7109_v24 = vld [vmem:[#allocation22_spill] sm:$0xff]  ;;  %v7110_v47 = vld [vmem:[#allocation23_spill] sm:$0xff] }
 0x273   : > { %v2230_v45 = vadd.f32 %v2229_v35, %v5938_v3  ;;  %v2625_v53 = vadd.f32 %v2624_v48, %v5940_v50  ;;  %v3020_v58 = vadd.f32 %v3019_v39, %v5949_v56  ;;  %v1714_v55 = vadd.f32 %v6605_v17, %v5365_v32  ;;  %v7106_v35 = vld [vmem:[#allocation19_spill] sm:$0xff]  ;;  %v7107_v48 = vld [vmem:[#allocation20_spill] sm:$0xff]  ;;  %v7112_v39 = vld [vmem:[#allocation25_spill] sm:$0xff] }
 0x274   : > { %v2299_v5 = vadd.f32 %v2298_v36, %v7103_v8  ;;  %v2694_v25 = vadd.f32 %v2693_v62, %v7104_v60  ;;  %v3089_v10 = vadd.f32 %v3088_v19, %v5964_v46  ;;  %v6648_v23 = vmul.f32 %v3416_v22, %v1920_v0  ;;  %v3417_v17 = vld [vmem:[%s4465_s17 + $0x790] sm:$0xff]  ;;  %v7113_v62 = vld [vmem:[#allocation26_spill] sm:$0xff]  ;;  %v2058_v22 = vld [vmem:[%s4465_s17 + $0x398] sm:$0xff] }
 0x275   : > { %v2231_v3 = vadd.f32 %v2230_v45, %v7105_v37  ;;  %v2626_v50 = vadd.f32 %v2625_v53, %v7106_v35  ;;  %v3021_v56 = vadd.f32 %v3020_v58, %v7107_v48  ;;  %v6654_v54 = vmul.f32 %v3544_v42, %v1920_v0  ;;  %v7111_v18 = vld [vmem:[#allocation24_spill] sm:$0xff]  ;;  %v7114_v45 = vld [vmem:[#allocation27_spill] sm:$0xff]  ;;  %v7117_v60 = vld [vmem:[#allocation30_spill] sm:$0xff] }
 0x276   : > { %v2300_v1 = vadd.f32 %v2299_v5, %v7108_v20  ;;  %v2695_v14 = vadd.f32 %v2694_v25, %v7109_v24  ;;  %v3090_v46 = vadd.f32 %v3089_v10, %v5988_v30  ;;  %v3545_v63 = vld [vmem:[%s4465_s17 + $0xb90] sm:$0xff]  ;;  %v1923_v26 = vadd.f32 %v6614_v34, %v5372_v52  ;;  %v7116_v5 = vld [vmem:[#allocation29_spill] sm:$0xff]  ;;  %v7118_v10 = vld [vmem:[#allocation31_spill] sm:$0xff] }
 0x277   : > { %v2232_v43 = vadd.f32 %v2231_v3, %v7110_v47  ;;  %v2627_v51 = vadd.f32 %v2626_v50, %v7111_v18  ;;  %v3022_v59 = vadd.f32 %v3021_v56, %v5999_v61  ;;  %v6666_v0 = vmul.f32 %v2057_v33, %v1714_v55  ;;  %v7115_v58 = vld [vmem:[#allocation28_spill] sm:$0xff]  ;;  %v7120_v48 = vld [vmem:[#allocation33_spill] sm:$0xff]  ;;  %v7121_v33 = vld [vmem:[#allocation34_spill] sm:$0xff] }
 0x278   : > { %v2301_v36 = vadd.f32 %v2300_v1, %v7112_v39  ;;  %v2696_v19 = vadd.f32 %v2695_v14, %v7113_v62  ;;  %v3091_v30 = vadd.f32 %v3090_v46, %v6010_v27  ;;  %v6672_v8 = vmul.f32 %v3417_v17, %v1714_v55  ;;  %v3418_v27 = vld [vmem:[%s4465_s17 + $0x798] sm:$0xff]  ;;  %v7119_v35 = vld [vmem:[#allocation32_spill] sm:$0xff]  ;;  %v7122_v24 = vld [vmem:[#allocation35_spill] sm:$0xff] }
 0x279   : > { %v2233_v53 = vadd.f32 %v2232_v43, %v7114_v45  ;;  %v2628_v42 = vadd.f32 %v2627_v51, %v7115_v58  ;;  %v3023_v61 = vadd.f32 %v3022_v59, %v6021_v49  ;;  %v6677_v3 = vmul.f32 %v3545_v63, %v1714_v55  ;;  %v3546_v49 = vld [vmem:[%s4465_s17 + $0xb98] sm:$0xff]  ;;  %v7123_v46 = vld [vmem:[#allocation36_spill] sm:$0xff]  ;;  %v1719_v43 = vpop.f32.mrf.mxu2  ;;  %v7125_v59 = vld [vmem:[#allocation38_spill] sm:$0xff] }
 0x27a   : > { %v2302_v34 = vadd.f32 %v2301_v36, %v7116_v5  ;;  %v2697_v25 = vadd.f32 %v2696_v19, %v7117_v60  ;;  %v3092_v37 = vadd.f32 %v3091_v30, %v7118_v10  ;;  %v6683_v1 = vmul.f32 %v2058_v22, %v1923_v26  ;;  %v7124_v18 = vld [vmem:[#allocation37_spill] sm:$0xff]  ;;  %v7126_v39 = vld [vmem:[#allocation39_spill] sm:$0xff]  ;;  %v2059_v19 = vld [vmem:[%s4465_s17 + $0x3a0] sm:$0xff] }
 0x27b   : > { %v2234_v50 = vadd.f32 %v2233_v53, %v7119_v35  ;;  %v2629_v56 = vadd.f32 %v2628_v42, %v7120_v48  ;;  %v3024_v20 = vadd.f32 %v3023_v61, %v7121_v33  ;;  %v1717_v55 = vadd.f32 %v1716_v38, %v5365_v32  ;;  %v7127_v30 = vld [vmem:[#allocation40_spill] sm:$0xff]  ;;  %v7128_v45 = vld [vmem:[#allocation41_spill] sm:$0xff]  ;;  %v7129_v58 = vld [vmem:[#allocation42_spill] sm:$0xff] }
 0x27c   : > { %v2303_v14 = vadd.f32 %v2302_v34, %v7122_v24  ;;  %v2698_v17 = vadd.f32 %v2697_v25, %v7123_v46  ;;  %v3093_v47 = vadd.f32 %v3092_v37, %v6058_v21  ;;  %v6693_v62 = vmul.f32 %v3418_v27, %v1923_v26  ;;  %v3419_v38 = vld [vmem:[%s4465_s17 + $0x7a0] sm:$0xff]  ;;  %v7130_v61 = vld [vmem:[#allocation43_spill] sm:$0xff]  ;;  %v7131_v34 = vld [vmem:[#allocation44_spill] sm:$0xff]  ;;  %v1928_v27 = vpop.f32.mrf.mxu3 }
 0x27d   : > { %v2235_v51 = vadd.f32 %v2234_v50, %v7124_v18  ;;  %v2630_v63 = vadd.f32 %v2629_v56, %v7125_v59  ;;  %v3025_v36 = vadd.f32 %v3024_v20, %v7126_v39  ;;  %v6699_v42 = vmul.f32 %v3546_v49, %v1923_v26  ;;  %v3547_v10 = vld [vmem:[%s4465_s17 + $0xba0] sm:$0xff]  ;;  %v7132_v35 = vld [vmem:[#allocation45_spill] sm:$0xff]  ;;  %v2060_v20 = vld [vmem:[%s4465_s17 + $0x3a8] sm:$0xff] }
 0x27e   : > { %v2304_v22 = vadd.f32 %v2303_v14, %v7127_v30  ;;  %v2699_v53 = vadd.f32 %v2698_v17, %v7128_v45  ;;  %v3094_v21 = vadd.f32 %v3093_v47, %v7129_v58  ;;  %v1926_v37 = vadd.f32 %v1925_v29, %v5372_v52  ;;  %v7133_v48 = vld [vmem:[#allocation46_spill] sm:$0xff]  ;;  %v7134_v49 = vld [vmem:[#allocation47_spill] sm:$0xff]  ;;  %v7135_v14 = vld [vmem:[#allocation48_spill] sm:$0xff] }
 0x27f   : > { %v2236_v5 = vadd.f32 %v2235_v51, %v7130_v61  ;;  %v2631_v60 = vadd.f32 %v2630_v63, %v7131_v34  ;;  %v3026_v25 = vadd.f32 %v3025_v36, %v6095_v9  ;;  %v6710_v26 = vmul.f32 %v2059_v19, %v1717_v55  ;;  %v7136_v29 = vld [vmem:[#allocation49_spill] sm:$0xff]  ;;  %v7137_v18 = vld [vmem:[#allocation50_spill] sm:$0xff]  ;;  %v7138_v59 = vld [vmem:[#allocation51_spill] sm:$0xff] }
 0x280   : > { %v2305_v50 = vadd.f32 %v2304_v22, %v7132_v35  ;;  %v2700_v56 = vadd.f32 %v2699_v53, %v7133_v48  ;;  %v3095_v33 = vadd.f32 %v3094_v21, %v6106_v31  ;;  %v6716_v17 = vmul.f32 %v3419_v38, %v1717_v55  ;;  %v3420_v39 = vld [vmem:[%s4465_s17 + $0x7a8] sm:$0xff]  ;;  %v7139_v36 = vld [vmem:[#allocation52_spill] sm:$0xff]  ;;  %v7140_v30 = vld [vmem:[#allocation53_spill] sm:$0xff] }
 0x281   : > { %v2237_v24 = vadd.f32 %v2236_v5, %v7134_v49  ;;  %v2632_v46 = vadd.f32 %v2631_v60, %v7135_v14  ;;  %v3027_v9 = vadd.f32 %v3026_v25, %v6117_v6  ;;  %v6721_v31 = vmul.f32 %v3547_v10, %v1717_v55  ;;  %v7141_v45 = vld [vmem:[#allocation54_spill] sm:$0xff]  ;;  %v3548_v58 = vld [vmem:[%s4465_s17 + $0xba8] sm:$0xff]  ;;  %v7143_v61 = vld [vmem:[#allocation56_spill] sm:$0xff] }
 0x282   : > { %v2306_v47 = vadd.f32 %v2305_v50, %v7136_v29  ;;  %v2701_v51 = vadd.f32 %v2700_v56, %v7137_v18  ;;  %v3096_v63 = vadd.f32 %v3095_v33, %v7138_v59  ;;  %v6727_v6 = vmul.f32 %v2060_v20, %v1926_v37  ;;  %v7142_v21 = vld [vmem:[#allocation55_spill] sm:$0xff]  ;;  %v7144_v34 = vld [vmem:[#allocation57_spill] sm:$0xff]  ;;  %v7145_v25 = vld [vmem:[#allocation58_spill] sm:$0xff] }
 0x283   : > { %v2238_v19 = vadd.f32 %v2237_v24, %v7139_v36  ;;  %v2633_v22 = vadd.f32 %v2632_v46, %v7140_v30  ;;  %v3028_v53 = vadd.f32 %v3027_v9, %v7141_v45  ;;  %v1720_v55 = vadd.f32 %v1719_v43, %v5365_v32  ;;  %v7146_v35 = vld [vmem:[#allocation59_spill] sm:$0xff]  ;;  %v7147_v48 = vld [vmem:[#allocation60_spill] sm:$0xff]  ;;  %v7148_v49 = vld [vmem:[#allocation61_spill] sm:$0xff]  ;;  %v1722_v43 = vpop.f32.mrf.mxu2 }
 0x284   : > { %v2307_v38 = vadd.f32 %v2306_v47, %v7142_v21  ;;  %v2702_v5 = vadd.f32 %v2701_v51, %v7143_v61  ;;  %v3097_v60 = vadd.f32 %v3096_v63, %v7144_v34  ;;  %v6737_v33 = vmul.f32 %v3420_v39, %v1926_v37  ;;  %v2061_v20 = vld [vmem:[%s4465_s17 + $0x3b0] sm:$0xff]  ;;  %v7149_v14 = vld [vmem:[#allocation62_spill] sm:$0xff]  ;;  %v7150_v9 = vld [vmem:[#allocation63_spill] sm:$0xff] }
 0x285   : > { %v2239_v10 = vadd.f32 %v2238_v19, %v7145_v25  ;;  %v2634_v50 = vadd.f32 %v2633_v22, %v7146_v35  ;;  %v3029_v56 = vadd.f32 %v3028_v53, %v7147_v48  ;;  %v6743_v47 = vmul.f32 %v3548_v58, %v1926_v37  ;;  %v3421_v18 = vld [vmem:[%s4465_s17 + $0x7b0] sm:$0xff]  ;;  %v7152_v63 = vld [vmem:[#allocation65_spill] sm:$0xff]  ;;  %v7153_v19 = vld [vmem:[#allocation66_spill] sm:$0xff] }
 0x286   : > { %v2308_v24 = vadd.f32 %v2307_v38, %v7148_v49  ;;  %v2703_v46 = vadd.f32 %v2702_v5, %v7149_v14  ;;  %v3098_v29 = vadd.f32 %v3097_v60, %v7150_v9  ;;  %v7151_v51 = vld [vmem:[#allocation64_spill] sm:$0xff]  ;;  %v1929_v22 = vadd.f32 %v1928_v27, %v5372_v52  ;;  %v7154_v45 = vld [vmem:[#allocation67_spill] sm:$0xff]  ;;  %v7156_v61 = vld [vmem:[#allocation69_spill] sm:$0xff] }
 0x287   : > { %v2240_v59 = vadd.f32 %v2239_v10, %v7151_v51  ;;  %v2635_v36 = vadd.f32 %v2634_v50, %v7152_v63  ;;  %v3030_v30 = vadd.f32 %v3029_v56, %v7153_v19  ;;  %v3549_v39 = vld [vmem:[%s4465_s17 + $0xbb0] sm:$0xff]  ;;  %v6754_v37 = vmul.f32 %v2061_v20, %v1720_v55  ;;  %v2062_v58 = vld [vmem:[%s4465_s17 + $0x3b8] sm:$0xff]  ;;  %v7157_v34 = vld [vmem:[#allocation70_spill] sm:$0xff]  ;;  %v1931_v56 = vpop.f32.mrf.mxu3 }
 0x288   : > { %v2309_v53 = vadd.f32 %v2308_v24, %v7154_v45  ;;  %v7155_v21 = vld [vmem:[#allocation68_spill] sm:$0xff]  ;;  %v3099_v5 = vadd.f32 %v3098_v29, %v7156_v61  ;;  %v7158_v25 = vld [vmem:[#allocation71_spill] sm:$0xff]  ;;  %v6760_v48 = vmul.f32 %v3421_v18, %v1720_v55  ;;  %v7160_v27 = vld [vmem:[#allocation73_spill] sm:$0xff]  ;;  %v6765_v20 = vmul.f32 %v3549_v39, %v1720_v55 }
 0x289   : > { %v2704_v38 = vadd.f32 %v2703_v46, %v7155_v21  ;;  %v2241_v60 = vadd.f32 %v2240_v59, %v7157_v34  ;;  %v2636_v10 = vadd.f32 %v2635_v36, %v7158_v25  ;;  %v7159_v35 = vld [vmem:[#allocation72_spill] sm:$0xff]  ;;  %v7161_v24 = vld [vmem:[#allocation74_spill] sm:$0xff]  ;;  %v7162_v46 = vld [vmem:[#allocation75_spill] sm:$0xff]  ;;  %v6771_v18 = vmul.f32 %v2062_v58, %v1929_v22 }
 0x28a   : > { %v3031_v50 = vadd.f32 %v3030_v30, %v7159_v35  ;;  %v2310_v49 = vadd.f32 %v2309_v53, %v7160_v27  ;;  %v3100_v9 = vadd.f32 %v3099_v5, %v7162_v46  ;;  %v3422_v29 = vld [vmem:[%s4465_s17 + $0x7b8] sm:$0xff]  ;;  %v7163_v51 = vld [vmem:[#allocation76_spill] sm:$0xff]  ;;  %v7165_v36 = vld [vmem:[#allocation78_spill] sm:$0xff]  ;;  %v1723_v55 = vadd.f32 %v1722_v43, %v5365_v32 }
 0x28b   : > { %v2705_v14 = vadd.f32 %v2704_v38, %v7161_v24  ;;  %v2242_v63 = vadd.f32 %v2241_v60, %v7163_v51  ;;  %v7164_v59 = vld [vmem:[#allocation77_spill] sm:$0xff]  ;;  %v7166_v21 = vld [vmem:[#allocation79_spill] sm:$0xff]  ;;  %v7167_v61 = vld [vmem:[#allocation80_spill] sm:$0xff] }
 0x28c   : > { %v2637_v19 = vadd.f32 %v2636_v10, %v7164_v59  ;;  %v3032_v45 = vadd.f32 %v3031_v50, %v7165_v36  ;;  %v3550_v30 = vld [vmem:[%s4465_s17 + $0xbb8] sm:$0xff]  ;;  %v2311_v53 = vadd.f32 %v2310_v49, %v7166_v21  ;;  %v7169_v39 = vld [vmem:[#allocation82_spill] sm:$0xff]  ;;  %v7170_v60 = vld [vmem:[#allocation83_spill] sm:$0xff]  ;;  %v6781_v50 = vmul.f32 %v3422_v29, %v1929_v22 }
 0x28d   : > { %v2706_v38 = vadd.f32 %v2705_v14, %v7167_v61  ;;  %v7168_v34 = vld [vmem:[#allocation81_spill] sm:$0xff]  ;;  %v2243_v25 = vadd.f32 %v2242_v63, %v7169_v39  ;;  %v7171_v10 = vld [vmem:[#allocation14_spill] sm:$0xff]  ;;  %v7172_v24 = vld [vmem:[#allocation84_spill] sm:$0xff]  ;;  %v6787_v36 = vmul.f32 %v3550_v30, %v1929_v22  ;;  %v1932_v29 = vadd.f32 %v1931_v56, %v5372_v52  ;;  %v1725_v30 = vpop.f32.mrf.mxu2 }
 0x28e   : > { %v3101_v5 = vadd.f32 %v3100_v9, %v7168_v34  ;;  %v2638_v35 = vadd.f32 %v2637_v19, %v7170_v60  ;;  %v3033_v27 = vadd.f32 %v3032_v45, %v7171_v10  ;;  %v2063_v58 = vld [vmem:[%s4465_s17 + $0x3c0] sm:$0xff]  ;;  %v2312_v46 = vadd.f32 %v2311_v53, %v7172_v24  ;;  %v7173_v49 = vld [vmem:[#allocation85_spill] sm:$0xff]  ;;  %v7174_v14 = vld [vmem:[#allocation15_spill] sm:$0xff] }
 0x28f   : > { %v2707_v51 = vadd.f32 %v2706_v38, %v7173_v49  ;;  %7175 = vst [vmem:[#allocation16_spill] sm:$0xff] %v6787_v36  ;;  %v3423_v9 = vld [vmem:[%s4465_s17 + $0x7c0] sm:$0xff]  ;;  %v7177_v63 = vld [vmem:[#allocation87_spill] sm:$0xff]  ;;  %v7178_v19 = vld [vmem:[#allocation88_spill] sm:$0xff] }
 0x290   : > { %v3102_v59 = vadd.f32 %v3101_v5, %v7174_v14  ;;  %v7176_v43 = vld [vmem:[#allocation86_spill] sm:$0xff]  ;;  %v2639_v61 = vadd.f32 %v2638_v35, %v7177_v63  ;;  %v3034_v34 = vadd.f32 %v3033_v27, %v7178_v19  ;;  %v7179_v39 = vld [vmem:[#allocation89_spill] sm:$0xff]  ;;  %v7181_v38 = vld [vmem:[#allocation91_spill] sm:$0xff]  ;;  %v6798_v5 = vmul.f32 %v2063_v58, %v1723_v55 }
 0x291   : > { %v2244_v21 = vadd.f32 %v2243_v25, %v7176_v43  ;;  %v3551_v45 = vld [vmem:[%s4465_s17 + $0xbc0] sm:$0xff]  ;;  %v2313_v60 = vadd.f32 %v2312_v46, %v7179_v39  ;;  %v2064_v22 = vld [vmem:[%s4465_s17 + $0x3c8] sm:$0xff]  ;;  %v7183_v25 = vld [vmem:[#allocation92_spill] sm:$0xff]  ;;  %v6804_v63 = vmul.f32 %v3423_v9, %v1723_v55 }
 0x292   : > { %v7180_v53 = vld [vmem:[#allocation90_spill] sm:$0xff]  ;;  %v3103_v24 = vadd.f32 %v3102_v59, %v7181_v38  ;;  %7182 = vst [vmem:[#allocation17_spill] sm:$0xff] %v6798_v5  ;;  %v7184_v35 = vld [vmem:[#allocation93_spill] sm:$0xff]  ;;  %v7186_v56 = vld [vmem:[#allocation95_spill] sm:$0xff]  ;;  %v6809_v59 = vmul.f32 %v3551_v45, %v1723_v55  ;;  %v1726_v45 = vadd.f32 %v1725_v30, %v5365_v32 }
 0x293   : > { %v2708_v10 = vadd.f32 %v2707_v51, %v7180_v53  ;;  %v2245_v49 = vadd.f32 %v2244_v21, %v7183_v25  ;;  %v2640_v14 = vadd.f32 %v2639_v61, %v7184_v35  ;;  %v7185_v27 = vld [vmem:[#allocation94_spill] sm:$0xff]  ;;  %v2314_v19 = vadd.f32 %v2313_v60, %v7186_v56  ;;  %v7187_v46 = vld [vmem:[#allocation96_spill] sm:$0xff]  ;;  %v7188_v51 = vld [vmem:[#allocation97_spill] sm:$0xff] }
 0x294   : > { %v3035_v43 = vadd.f32 %v3034_v34, %v7185_v27  ;;  %v3104_v53 = vadd.f32 %v3103_v24, %v7188_v51  ;;  %v3424_v58 = vld [vmem:[%s4465_s17 + $0x7c8] sm:$0xff]  ;;  %v7189_v38 = vld [vmem:[#allocation98_spill] sm:$0xff]  ;;  %v6815_v25 = vmul.f32 %v2064_v22, %v1932_v29  ;;  %v1934_v34 = vpop.f32.mrf.mxu3  ;;  %v7191_v24 = vld [vmem:[#allocation100_spill] sm:$0xff] }
 0x295   : > { %v2709_v39 = vadd.f32 %v2708_v10, %v7187_v46  ;;  %v2246_v5 = vadd.f32 %v2245_v49, %v7189_v38  ;;  %v7190_v36 = vld [vmem:[#allocation99_spill] sm:$0xff]  ;;  %v2315_v60 = vadd.f32 %v2314_v19, %v6345_v44  ;;  %v7192_v35 = vld [vmem:[#allocation101_spill] sm:$0xff]  ;;  %v6825_v22 = vmul.f32 %v3424_v58, %v1932_v29  ;;  %v2065_v27 = vld [vmem:[%s4465_s17 + $0x3d0] sm:$0xff] }
 0x296   : > { %v2641_v21 = vadd.f32 %v2640_v14, %v7190_v36  ;;  %v3036_v61 = vadd.f32 %v3035_v43, %v6343_v7  ;;  %v3552_v9 = vld [vmem:[%s4465_s17 + $0xbc8] sm:$0xff]  ;;  %v3105_v55 = vadd.f32 %v3104_v53, %v6353_v57  ;;  %v7193_v14 = vld [vmem:[#allocation102_spill] sm:$0xff]  ;;  %v3425_v57 = vld [vmem:[%s4465_s17 + $0x7d0] sm:$0xff]  ;;  %v1935_v38 = vadd.f32 %v1934_v34, %v5372_v52 }
 0x297   : > { %v2710_v10 = vadd.f32 %v2709_v39, %v6351_v2  ;;  %v2247_v49 = vadd.f32 %v2246_v5, %v7191_v24  ;;  %v7194_v43 = vld [vmem:[#allocation103_spill] sm:$0xff]  ;;  %v7195_v2 = vld [vmem:[#allocation104_spill] sm:$0xff]  ;;  %v6831_v46 = vmul.f32 %v3552_v9, %v1932_v29  ;;  %v7196_v30 = vld [vmem:[#allocation105_spill] sm:$0xff]  ;;  %v1728_v9 = vpop.f32.mrf.mxu2 }
 0x298   : > { %v2642_v36 = vadd.f32 %v2641_v21, %v7192_v35  ;;  %v3037_v7 = vadd.f32 %v3036_v61, %v7193_v14  ;;  %v2316_v56 = vadd.f32 %v2315_v60, %v7194_v43  ;;  %v3106_v19 = vadd.f32 %v3105_v55, %v7195_v2  ;;  %v7197_v51 = vld [vmem:[#allocation106_spill] sm:$0xff]  ;;  %v3553_v58 = vld [vmem:[%s4465_s17 + $0xbd0] sm:$0xff]  ;;  %v7198_v21 = vld [vmem:[#allocation107_spill] sm:$0xff] }
 0x299   : > { %v2711_v44 = vadd.f32 %v2710_v10, %v6393_v16  ;;  %v2248_v5 = vadd.f32 %v2247_v49, %v6410_v12  ;;  %v7199_v60 = vld [vmem:[#allocation108_spill] sm:$0xff]  ;;  %v7200_v16 = vld [vmem:[#allocation109_spill] sm:$0xff]  ;;  %v6842_v55 = vmul.f32 %v2065_v27, %v1726_v45  ;;  %v7201_v35 = vld [vmem:[#allocation110_spill] sm:$0xff]  ;;  %v6854_v27 = vmul.f32 %v3553_v58, %v1726_v45 }
 0x29a   : > { %v2643_v39 = vadd.f32 %v2642_v36, %v7196_v30  ;;  %v3038_v53 = vadd.f32 %v3037_v7, %v7197_v51  ;;  %v2317_v61 = vadd.f32 %v2316_v56, %v7198_v21  ;;  %v3107_v10 = vadd.f32 %v3106_v19, %v7200_v16  ;;  %v2066_v29 = vld [vmem:[%s4465_s17 + $0x3d8] sm:$0xff]  ;;  %v7202_v49 = vld [vmem:[#allocation111_spill] sm:$0xff]  ;;  %v7203_v43 = vld [vmem:[#allocation112_spill] sm:$0xff] }
 0x29b   : > { %v2712_v24 = vadd.f32 %v2711_v44, %v7199_v60  ;;  %v2249_v12 = vadd.f32 %v2248_v5, %v7201_v35  ;;  %v6848_v7 = vmul.f32 %v3425_v57, %v1726_v45  ;;  %v3426_v34 = vld [vmem:[%s4465_s17 + $0x7d8] sm:$0xff]  ;;  %v7205_v30 = vld [vmem:[#allocation114_spill] sm:$0xff]  ;;  %v7206_v21 = vld [vmem:[#allocation115_spill] sm:$0xff] }
 0x29c   : > { %v2644_v36 = vadd.f32 %v2643_v39, %v7202_v49  ;;  %v3039_v14 = vadd.f32 %v3038_v53, %v6459_v28  ;;  %v2318_v56 = vadd.f32 %v2317_v61, %v7203_v43  ;;  %v7204_v2 = vld [vmem:[#allocation113_spill] sm:$0xff]  ;;  %v3108_v19 = vadd.f32 %v3107_v10, %v6469_v13  ;;  %v7207_v5 = vld [vmem:[#allocation116_spill] sm:$0xff]  ;;  %v1937_v57 = vpop.f32.mrf.mxu3  ;;  %v7209_v35 = vld [vmem:[#allocation118_spill] sm:$0xff] }
 0x29d   : > { %v2713_v44 = vadd.f32 %v2712_v24, %v7204_v2  ;;  %v2250_v51 = vadd.f32 %v2249_v12, %v7205_v30  ;;  %v6859_v39 = vmul.f32 %v2066_v29, %v1935_v38  ;;  %v3554_v28 = vld [vmem:[%s4465_s17 + $0xbd8] sm:$0xff]  ;;  %v6865_v45 = vmul.f32 %v3426_v34, %v1935_v38  ;;  %v7210_v58 = vld [vmem:[#allocation119_spill] sm:$0xff]  ;;  %v7211_v12 = vld [vmem:[#allocation120_spill] sm:$0xff] }
 0x29e   : > { %v2645_v60 = vadd.f32 %v2644_v36, %v7206_v21  ;;  %v3040_v16 = vadd.f32 %v3039_v14, %v7207_v5  ;;  %v2319_v53 = vadd.f32 %v2318_v56, %v6497_v41  ;;  %v7208_v61 = vld [vmem:[#allocation117_spill] sm:$0xff]  ;;  %v3109_v13 = vadd.f32 %v3108_v19, %v7209_v35  ;;  %v7213_v43 = vld [vmem:[#allocation122_spill] sm:$0xff]  ;;  %v7214_v30 = vld [vmem:[#allocation123_spill] sm:$0xff] }
 0x29f   : > { %v2714_v24 = vadd.f32 %v2713_v44, %v7208_v61  ;;  %v2251_v10 = vadd.f32 %v2250_v51, %v7210_v58  ;;  %v7212_v36 = vld [vmem:[#allocation121_spill] sm:$0xff]  ;;  %v1729_v29 = vadd.f32 %v1728_v9, %v5365_v32  ;;  %v7215_v56 = vld [vmem:[#allocation124_spill] sm:$0xff]  ;;  %v6874_v44 = vmul.f32 %v3554_v28, %v1935_v38  ;;  %v2067_v34 = vld [vmem:[%s4465_s17 + $0x3e0] sm:$0xff] }
 0x2a0   : > { %v2646_v49 = vadd.f32 %v2645_v60, %v7211_v12  ;;  %v3041_v14 = vadd.f32 %v3040_v16, %v7212_v36  ;;  %v2320_v2 = vadd.f32 %v2319_v53, %v7213_v43  ;;  %v3110_v21 = vadd.f32 %v3109_v13, %v7215_v56  ;;  %v7216_v19 = vld [vmem:[#allocation125_spill] sm:$0xff]  ;;  %v7217_v51 = vld [vmem:[#allocation126_spill] sm:$0xff]  ;;  %v7218_v60 = vld [vmem:[#allocation127_spill] sm:$0xff] }
 0x2a1   : > { %v2715_v41 = vadd.f32 %v2714_v24, %v7214_v30  ;;  %v2252_v5 = vadd.f32 %v2251_v10, %v7216_v19  ;;  %v3427_v58 = vld [vmem:[%s4465_s17 + $0x7e0] sm:$0xff]  ;;  %v1938_v16 = vadd.f32 %v1937_v57, %v5372_v52  ;;  %v7219_v9 = vld [vmem:[#allocation128_spill] sm:$0xff]  ;;  %v7220_v53 = vld [vmem:[#allocation129_spill] sm:$0xff]  ;;  %v4324_v19 = vmov 0.0  }
 0x2a2   : > { %v2647_v61 = vadd.f32 %v2646_v49, %v7217_v51  ;;  %v3042_v35 = vadd.f32 %v3041_v14, %v7218_v60  ;;  %v2321_v12 = vadd.f32 %v2320_v2, %v7219_v9  ;;  %v7221_v24 = vld [vmem:[#allocation130_spill] sm:$0xff]  ;;  %v7222_v30 = vld [vmem:[#allocation131_spill] sm:$0xff]  ;;  %v7223_v28 = vld [vmem:[#allocation132_spill] sm:$0xff]  ;;  %v6889_v49 = vmul.f32 %v2067_v34, %v1729_v29  ;;  %408 = vst [vmem:[#allocation2] sm:$0x77] %v4324_v19 }
 0x2a3   : > { %v2716_v36 = vadd.f32 %v2715_v41, %v7220_v53  ;;  %v3111_v43 = vadd.f32 %v3110_v21, %v7221_v24  ;;  %v3555_v13 = vld [vmem:[%s4465_s17 + $0xbe0] sm:$0xff]  ;;  %v2253_v38 = vadd.f32 %v2252_v5, %v7222_v30  ;;  %v2068_v14 = vld [vmem:[%s4465_s17 + $0x3e8] sm:$0xff]  ;;  %v7224_v57 = vld [vmem:[#allocation133_spill] sm:$0xff]  ;;  %v2590_v9 = vmul.f32 %v3427_v58, %v1729_v29  ;;  %v1731_v53 = vpop.f32.mrf.mxu2 }
 0x2a4   : > { %v2648_v56 = vadd.f32 %v2647_v61, %v7223_v28  ;;  %v3043_v10 = vadd.f32 %v3042_v35, %v6593_v15  ;;  %v2322_v2 = vadd.f32 %v2321_v12, %v7224_v57  ;;  %v7225_v51 = vld [vmem:[#allocation134_spill] sm:$0xff]  ;;  %v7226_v60 = vld [vmem:[#allocation135_spill] sm:$0xff]  ;;  %v7227_v5 = vld [vmem:[#allocation136_spill] sm:$0xff]  ;;  %v2985_v34 = vmul.f32 %v3555_v13, %v1729_v29  ;;  %v1940_v29 = vpop.f32.mrf.mxu3 }
 0x2a5   : > { %v2717_v41 = vadd.f32 %v2716_v36, %v7225_v51  ;;  %v3112_v21 = vadd.f32 %v3111_v43, %v7226_v60  ;;  %v2254_v24 = vadd.f32 %v2253_v38, %v7227_v5  ;;  %v3428_v35 = vld [vmem:[%s4465_s17 + $0x7e8] sm:$0xff]  ;;  %v2196_v36 = vmul.f32 %v2068_v14, %v1938_v16  ;;  %v3429_v14 = vld [vmem:[%s4465_s17 + $0x7f0] sm:$0xff]  ;;  %v7229_v60 = vld [vmem:[#allocation17_spill] sm:$0xff] }
 0x2a6   : > { %v2649_v61 = vadd.f32 %v2648_v56, %v6629_v4  ;;  %v3044_v15 = vadd.f32 %v3043_v10, %v6631_v11  ;;  %v2323_v30 = vadd.f32 %v2322_v2, %v6637_v40  ;;  %v3556_v43 = vld [vmem:[%s4465_s17 + $0xbe8] sm:$0xff]  ;;  %v1732_v11 = vadd.f32 %v1731_v53, %v5365_v32  ;;  %v2069_v56 = vld [vmem:[%s4465_s17 + $0x3f0] sm:$0xff] }
 0x2a7   : > { %v2718_v28 = vadd.f32 %v2717_v41, %v6648_v23  ;;  %v3113_v12 = vadd.f32 %v3112_v21, %v6654_v54  ;;  %v2255_v58 = vadd.f32 %v2254_v24, %v6666_v0  ;;  %v2591_v54 = vmul.f32 %v3428_v35, %v1938_v16  ;;  %v3557_v19 = vld [vmem:[%s4465_s17 + $0xbf0] sm:$0xff] }
 0x2a8   : > { %v2650_v38 = vadd.f32 %v2649_v61, %v6672_v8  ;;  %v3045_v4 = vadd.f32 %v3044_v15, %v6677_v3  ;;  %v2324_v13 = vadd.f32 %v2323_v30, %v6683_v1  ;;  %v2986_v3 = vmul.f32 %v3556_v43, %v1938_v16  ;;  %v2070_v16 = vld [vmem:[%s4465_s17 + $0x3f8] sm:$0xff]  ;;  %v7228_v51 = vld [vmem:[#allocation16_spill] sm:$0xff] }
 0x2a9   : > { %v2719_v40 = vadd.f32 %v2718_v28, %v6693_v62  ;;  %v3114_v23 = vadd.f32 %v3113_v12, %v6699_v42  ;;  %v2256_v10 = vadd.f32 %v2255_v58, %v6710_v26  ;;  %v1941_v42 = vadd.f32 %v1940_v29, %v5372_v52 }
 0x2aa   : > { %v2651_v0 = vadd.f32 %v2650_v38, %v6716_v17  ;;  %v3046_v8 = vadd.f32 %v3045_v4, %v6721_v31  ;;  %v2325_v32 = vadd.f32 %v2324_v13, %v6727_v6  ;;  %v2197_v31 = vmul.f32 %v2069_v56, %v1732_v11 }
 0x2ab   : > { %v2720_v1 = vadd.f32 %v2719_v40, %v6737_v33  ;;  %v3115_v62 = vadd.f32 %v3114_v23, %v6743_v47  ;;  %v2257_v57 = vadd.f32 %v2256_v10, %v6754_v37  ;;  %v2592_v41 = vmul.f32 %v3429_v14, %v1732_v11  ;;  %v3430_v47 = vld [vmem:[%s4465_s17 + $0x7f8] sm:$0xff] }
 0x2ac   : > { %v2652_v26 = vadd.f32 %v2651_v0, %v6760_v48  ;;  %v3047_v17 = vadd.f32 %v3046_v8, %v6765_v20  ;;  %v2326_v2 = vadd.f32 %v2325_v32, %v6771_v18  ;;  %v2987_v53 = vmul.f32 %v3557_v19, %v1732_v11  ;;  %v3558_v48 = vld [vmem:[%s4465_s17 + $0xbf8] sm:$0xff] }
 0x2ad   : > { %v2721_v6 = vadd.f32 %v2720_v1, %v6781_v50  ;;  %v3116_v33 = vadd.f32 %v3115_v62, %v7228_v51  ;;  %v2258_v21 = vadd.f32 %v2257_v57, %v7229_v60  ;;  %v2198_v24 = vmul.f32 %v2070_v16, %v1941_v42 }
 0x2ae   : > { %v2653_v52 = vadd.f32 %v2652_v26, %v6804_v63  ;;  %v3048_v37 = vadd.f32 %v3047_v17, %v6809_v59  ;;  %v2327_v20 = vadd.f32 %v2326_v2, %v6815_v25  ;;  %v2593_v35 = vmul.f32 %v3430_v47, %v1941_v42 }
 0x2af   : > { %v2722_v5 = vadd.f32 %v2721_v6, %v6825_v22  ;;  %v3117_v18 = vadd.f32 %v3116_v33, %v6831_v46  ;;  %v2259_v50 = vadd.f32 %v2258_v21, %v6842_v55  ;;  %v2988_v28 = vmul.f32 %v3558_v48, %v1941_v42 }
 0x2b0   : > { %v2654_v61 = vadd.f32 %v2653_v52, %v6848_v7  ;;  %v3049_v15 = vadd.f32 %v3048_v37, %v6854_v27  ;;  %v2328_v63 = vadd.f32 %v2327_v20, %v6859_v39  ;;  %v3127_v20 = vld [vmem:[#allocation2] sm:$0x77] }
 0x2b1   : > { %v2723_v59 = vadd.f32 %v2722_v5, %v6865_v45  ;;  %v3118_v30 = vadd.f32 %v3117_v18, %v6874_v44  ;;  %v2260_v25 = vadd.f32 %v2259_v50, %v6889_v49 }
 0x2b2   : > { %v2655_v22 = vadd.f32 %v2654_v61, %v2590_v9  ;;  %v3050_v12 = vadd.f32 %v3049_v15, %v2985_v34  ;;  %v2329_v46 = vadd.f32 %v2328_v63, %v2196_v36 }
 0x2b3   : > { %v2724_v43 = vadd.f32 %v2723_v59, %v2591_v54  ;;  %v3119_v58 = vadd.f32 %v3118_v30, %v2986_v3  ;;  %v2261_v55 = vadd.f32 %v2260_v25, %v2197_v31 }
 0x2b4   : > { %v2656_v38 = vadd.f32 %v2655_v22, %v2592_v41  ;;  %v3051_v7 = vadd.f32 %v3050_v12, %v2987_v53  ;;  %v2330_v4 = vadd.f32 %v2329_v46, %v2198_v24 }
 0x2b5   : > { %v2725_v27 = vadd.f32 %v2724_v43, %v2593_v35  ;;  %v3120_v11 = vadd.f32 %v3119_v58, %v2988_v28  ;;  %v2262_v29 = vrot.slane %v2261_v55, 4 }
 0x2b6   : > { %v2657_v39 = vrot.slane %v2656_v38, 4  ;;  %v3052_v13 = vrot.slane %v3051_v7, 4  ;;  %v2331_v45 = vrot.slane %v2330_v4, 4 }
 0x2b7   : > { %v2726_v40 = vrot.slane %v2725_v27, 4  ;;  %v3121_v44 = vrot.slane %v3120_v11, 4  ;;  %v2263_v23 = vadd.f32 %v2262_v29, %v2261_v55 }
 0x2b8   : > { %v2658_v56 = vadd.f32 %v2657_v39, %v2656_v38  ;;  %v3053_v49 = vadd.f32 %v3052_v13, %v3051_v7  ;;  %v2332_v9 = vadd.f32 %v2331_v45, %v2330_v4 }
 0x2b9   : > { %v2727_v34 = vadd.f32 %v2726_v40, %v2725_v27  ;;  %v3122_v36 = vadd.f32 %v3121_v44, %v3120_v11  ;;  %v2264_v54 = vrot.slane %v2263_v23, 2 }
 0x2ba   : > { %v2659_v10 = vrot.slane %v2658_v56, 2  ;;  %v3054_v0 = vrot.slane %v3053_v49, 2  ;;  %v2333_v8 = vrot.slane %v2332_v9, 2 }
 0x2bb   : > { %v2728_v3 = vrot.slane %v2727_v34, 2  ;;  %v3123_v14 = vrot.slane %v3122_v36, 2  ;;  %v2265_v32 = vadd.f32 %v2264_v54, %v2263_v23 }
 0x2bc   : > { %v2660_v1 = vadd.f32 %v2659_v10, %v2658_v56  ;;  %v3055_v62 = vadd.f32 %v3054_v0, %v3053_v49  ;;  %v2334_v19 = vadd.f32 %v2333_v8, %v2332_v9 }
 0x2bd   : > { %v2729_v42 = vadd.f32 %v2728_v3, %v2727_v34  ;;  %v3124_v57 = vadd.f32 %v3123_v14, %v3122_v36  ;;  %v2266_v26 = vrot.slane %v2265_v32, 1 }
 0x2be   : > { %v2661_v17 = vrot.slane %v2660_v1, 1  ;;  %v3056_v31 = vrot.slane %v3055_v62, 1  ;;  %v2335_v16 = vrot.slane %v2334_v19, 1 }
 0x2bf   : > { %v2730_v2 = vrot.slane %v2729_v42, 1  ;;  %v3125_v6 = vrot.slane %v3124_v57, 1  ;;  %v2267_v51 = vadd.f32 %v2266_v26, %v2265_v32 }
 0x2c0   : > { %v2662_v33 = vadd.f32 %v2661_v17, %v2660_v1  ;;  %v3057_v41 = vadd.f32 %v3056_v31, %v3055_v62  ;;  %v2336_v47 = vadd.f32 %v2335_v16, %v2334_v19 }
 0x2c1   : > { %v2731_v60 = vadd.f32 %v2730_v2, %v2729_v42  ;;  %v3126_v21 = vadd.f32 %v3125_v6, %v3124_v57 }
 0x2c2   : > { %v3129_v52 = vsel %vm3128_vm4, %v2267_v51, %v2662_v33 }
 0x2c3   : > { %v3132_v37 = vsel %vm3131_vm5, %v3129_v52, %v3057_v41  ;;  %v3130_v53 = vsel %vm3128_vm4, %v2336_v47, %v2731_v60 }
 0x2c4   : > { %v3133_v48 = vsel %vm3131_vm5, %v3130_v53, %v3126_v21 }
 0x2c5   : > { %v3136_v5 = vrot.slane %v3133_v48, 4 }
 0x2c7   : > { %v3138_v18 = vsel %vm3137_vm6, %v3132_v37, %v3136_v5 }
 0x2c8   : > { %v3140_v24 = vadd.f32 %v3138_v18, %v3127_v20 }
 0x2ca   : > { %3141 = vst [vmem:[#allocation2] sm:$0x77] %v3140_v24 }
 0x2d1   : > { %v3145_v50 = vld [vmem:[#allocation2] sm:$0x77] }
 0x2d2   : > { %3147 = vst [vmem:[#allocation1] ss:$2 sm:$0xff] %v3145_v50 }
 0x2d9   : > { %v3148_v61 = vld.sshfl [vmem:[#allocation1] sm:$0xff pattern:$0x75316420]  ;;  %v3149_v15 = vld.sshfl [vmem:[#allocation1 + $0x8] sm:$0xff pattern:$0x75316420] }
 0x2da   : > { %v3153_v35 = vsel %vm3152_vm7, %v3148_v61, 0.0  ;;  %v3154_v63 = vsel %vm3152_vm7, %v3149_v15, 0.0 }
 0x2db   : > { %v3155_v59 = vadd.f32 %v3154_v63, %v3153_v35 }
 0x2dd   : > { %3156 = vadd.xlane.f32.xlu0 %v3155_v59 }
 0x350   : > { %v3157_v30 = vpop.xlane.xlu0 %3156 }
 0x351   : > { %3159 = vst.msk [vmem:[%s403_s18] sm:$0x7] %vm3158_vm8, %v3157_v30 }
 0x352 PF: > { %s17_s23 = sadd.s32 1, %s4309_s23   ;;  %s7230_s18 = smov %s4293_s19 }
 0x353   : > { %p14_p3 = scmp.ge.s32.totalorder %s17_s23, 4   ;;  %s7231_s19 = smov %s4297_s20 }
 0x354   : > { %s7232_s20 = smov %s4413_s6  ;;  %s7233_s21 = smov %s4305_s22 }
 0x355   : > { %s7234_s22 = smov %s7236_s25  ;;  %16 = sbr.rel (!%p14_p3) target bundleno = 4 (0x4), region = 108 }
 0x35a   :  { %3179 = vsyncpa [#allocation4], 1 }
 0x35b   :  { %3181 = vsyncpa [#allocation4 + $0x1], 1 }
 0x35c   :  { %3182 = vsyncpa [#allocation6], 1 }

</bundles_post_ra>
